<compile_context>
chip_gen: v6e
topology: v6e:2x2x1
jax: 0.10.0
libtpu: 0.0.40
codegen_flags: <defaults>
</compile_context>

<pallas_src>
import jax
import jax.numpy as jnp
from jax.experimental import pallas as pl
from jax.experimental.pallas import tpu as pltpu

N_NODES = 34          # KarateClub: 34 nodes
NUM_FEATURES = 34     # KarateClub: one-hot node features
NUM_CLASSES = 4       # KarateClub: 4 communities
NEG_SLOPE = 0.2       # GATConv default LeakyReLU slope

NP = 64               # padded node count (multiple of 8 sublanes)
FP = 64               # padded input-feature count
CC = 128              # concat width: H1*C1 == 128 == layer-2 input width
H1, C1 = 8, 16
C2 = NUM_CLASSES
MASK_NEG = -1e30      # additive adjacency bias for non-edges


def _gat_fused_kernel(x_ref, adjb_ref, w1_ref, b1_ref, w2_ref, b2_ref,
                      out_ref, xp_scr, acc_scr):
    f32 = jnp.float32
    bf16 = jnp.bfloat16

    def attention(a_dst, a_src):
        # a_dst: [NP, 1] (dst term per node i); a_src: [1, NP] (src term per node j)
        e = a_dst + a_src                                    # e[i, j]: edge j -> i
        e = jnp.where(e >= 0.0, e, NEG_SLOPE * e)            # LeakyReLU
        e = e + adjb_ref[...]                                # additive mask (0 / -1e30), read in place
        e_max = jnp.max(e, axis=-1, keepdims=True)
        p = jnp.exp(e - e_max)                               # masked entries underflow to 0
        denom = jnp.sum(p, axis=-1, keepdims=True)
        return (p * pl.reciprocal(denom, approx=True)).astype(bf16)   # EUP divide

    # ---- pad node features into a tile-friendly [NP, FP] VMEM tile (in-kernel pad)
    xp_scr[...] = jnp.zeros((NP, FP), f32)
    xp_scr[:N_NODES, :NUM_FEATURES] = x_ref[...]

    # ---- layer 1: GATConv(34 -> 16, heads=8), concat -> [NP, 128]
    # One MXU matmul against [W1 | W1@A1] yields h and all attention projections.
    hp1 = jnp.dot(xp_scr[...].astype(bf16), w1_ref[...].astype(bf16),
                  preferred_element_type=f32)                # [NP, 2*CC]
    h1 = hp1[:, :CC].astype(bf16)                            # [NP, CC]
    proj1 = hp1[:, CC:]                                      # [NP, CC]; col h: dst, col H1+h: src
    proj1_src_t = jnp.transpose(proj1)[H1:2 * H1, :]         # keep only the 8 src rows live

    for hh in range(H1):                                     # unrolled, tiny trip count
        alpha = attention(proj1[:, hh:hh + 1],
                          proj1_src_t[hh:hh + 1, :])         # [NP, NP] bf16
        agg = jnp.dot(alpha, h1, preferred_element_type=f32) # [NP, CC]
        lo, hi = hh * C1, (hh + 1) * C1
        acc_scr[:, lo:hi] = agg[:, lo:hi]                    # head hh's 16 lanes only

    x1 = acc_scr[...] + b1_ref[...]                          # bias row [1, CC]
    x1 = jnp.where(x1 > 0.0, x1, jnp.exp(jnp.minimum(x1, 0.0)) - 1.0)   # ELU (overflow-safe)
    # TODO(synk): dropout (p=0.6) is an identity in eval mode.

    # ---- layer 2: GATConv(128 -> 4, heads=1, concat=True)
    hp2 = jnp.dot(x1.astype(bf16), w2_ref[...].astype(bf16),
                  preferred_element_type=f32)                # [NP, 2*CC]
    h2 = hp2[:, :CC].astype(bf16)
    proj2 = hp2[:, CC:]
    a_src2 = jnp.transpose(proj2)[1:2, :]                    # single src row
    alpha2 = attention(proj2[:, 0:1], a_src2)
    out_ref[...] = jnp.dot(alpha2, h2, preferred_element_type=f32) + b2_ref[...]


@jax.jit
def gat_model_forward(x, adj_bias, pp):
    """x: [N, F] node features (unpadded), adj_bias: [NP, NP] additive mask, pp: packed params."""
    out = pl.pallas_call(
        _gat_fused_kernel,
        out_shape=jax.ShapeDtypeStruct((NP, CC), jnp.float32),
        scratch_shapes=[pltpu.VMEM((NP, FP), jnp.float32),    # padded features
                        pltpu.VMEM((NP, CC), jnp.float32)],   # layer-1 head accumulator
    )(x, adj_bias, pp["w1"], pp["b1"], pp["w2"], pp["b2"])
    return out[:N_NODES, :NUM_CLASSES]


def prepare_params(params):
    """Pack PyG-style GATConv params into the fused kernel's layouts.

    Each layer gets one weight [K, 2*CC] = [W_pad | W_pad @ A], so a single
    matmul produces both h (first CC lanes) and the attention projections
    (last CC lanes: col h = att_dst_h . h_i, col heads+h = att_src_h . h_i).
    """
    # ----- layer 1 -----
    w1 = jnp.zeros((FP, CC), jnp.float32).at[:NUM_FEATURES, :].set(params["W1"])
    rows = jnp.arange(H1)[:, None] * C1 + jnp.arange(C1)[None, :]        # [H1, C1]
    a1 = jnp.zeros((CC, CC), jnp.float32)
    a1 = a1.at[rows, jnp.arange(H1)[:, None]].set(params["att_dst1"])
    a1 = a1.at[rows, H1 + jnp.arange(H1)[:, None]].set(params["att_src1"])
    w1cat = jnp.concatenate([w1, w1 @ a1], axis=1)                       # [FP, 2*CC]
    b1 = params["bias1"].reshape(1, CC)

    # ----- layer 2 -----
    w2 = jnp.zeros((CC, CC), jnp.float32).at[:, :C2].set(params["W2"])
    a2 = jnp.zeros((CC, CC), jnp.float32)
    a2 = a2.at[:C2, 0].set(params["att_dst2"][0])
    a2 = a2.at[:C2, 1].set(params["att_src2"][0])
    w2cat = jnp.concatenate([w2, w2 @ a2], axis=1)                       # [CC, 2*CC]
    b2 = jnp.zeros((1, CC), jnp.float32).at[0, :C2].set(params["bias2"])

    return {"w1": w1cat, "b1": b1, "w2": w2cat, "b2": b2}


def init_params(key):
    """Deterministic glorot-ish init matching GATConv parameter shapes."""
    ks = jax.random.split(key, 8)

    def glorot(k, shape):
        fan_in, fan_out = shape[0], shape[-1]
        scale = jnp.sqrt(6.0 / (fan_in + fan_out))
        return jax.random.uniform(k, shape, jnp.float32, -scale, scale)

    return {
        "W1": glorot(ks[0], (NUM_FEATURES, H1 * C1)),
        "att_src1": glorot(ks[1], (H1, C1)),
        "att_dst1": glorot(ks[2], (H1, C1)),
        "bias1": jnp.zeros((H1 * C1,), jnp.float32),
        "W2": glorot(ks[3], (H1 * C1, C2)),
        "att_src2": glorot(ks[4], (1, C2)),
        "att_dst2": glorot(ks[5], (1, C2)),
        "bias2": jnp.zeros((C2,), jnp.float32),
    }


def build_adjacency_bias(edge_index):
    """Additive attention bias: 0 where edge src->dst or dst==src (PyG
    add_self_loops=True, plus pad-row safety), else -1e30."""
    src, dst = edge_index[0], edge_index[1]
    adj = jnp.full((NP, NP), MASK_NEG, jnp.float32)
    adj = adj.at[dst, src].set(0.0)
    diag = jnp.arange(NP)
    adj = adj.at[diag, diag].set(0.0)
    return adj


if __name__ == "__main__":
    key = jax.random.PRNGKey(0)
    k_param, k_x, k_src, k_dst = jax.random.split(key, 4)

    params = init_params(k_param)
    pp = prepare_params(params)

    # KarateClub-like inputs: 34 nodes, 34 features, synthetic edge list.
    x = jax.random.normal(k_x, (N_NODES, NUM_FEATURES), jnp.float32)
    num_edges = 80
    src = jax.random.randint(k_src, (num_edges,), 0, N_NODES)
    dst = jax.random.randint(k_dst, (num_edges,), 0, N_NODES)
    edge_index = jnp.stack([src, dst], axis=0)        # [2, E], PyG convention

    adj_bias = build_adjacency_bias(edge_index)

    logits = gat_model_forward(x, adj_bias, pp)
    jax.block_until_ready(logits)

    assert logits.shape == (N_NODES, NUM_CLASSES)
    assert bool(jnp.all(jnp.isfinite(logits)))
    print("KERNEL_OK")
</pallas_src>

<mosaic_0001>
module attributes {stable_mosaic.version = 11 : i64} {
  func.func @_gat_fused_kernel(%arg0: memref<34x34xf32, #tpu.memory_space<vmem>>, %arg1: memref<64x64xf32, #tpu.memory_space<vmem>>, %arg2: memref<64x256xf32, #tpu.memory_space<vmem>>, %arg3: memref<1x128xf32, #tpu.memory_space<vmem>>, %arg4: memref<128x256xf32, #tpu.memory_space<vmem>>, %arg5: memref<1x128xf32, #tpu.memory_space<vmem>>, %arg6: memref<64x128xf32, #tpu.memory_space<vmem>>, %arg7: memref<64x64xf32, #tpu.memory_space<vmem>>, %arg8: memref<64x128xf32, #tpu.memory_space<vmem>>) attributes {dimension_semantics = [], scalar_prefetch = 0 : i64, scratch_operands = 2 : i64, tpu.core_type = #tpu.core_type<tc>} {
    %cst = arith.constant 0.000000e+00 : f32
    %0 = vector.broadcast %cst : f32 to vector<64x64xf32>
    %c0 = arith.constant 0 : index
    %c0_0 = arith.constant 0 : index
    %1 = vector.load %arg7[%c0, %c0_0] : memref<64x64xf32, #tpu.memory_space<vmem>>, vector<64x64xf32>
    tpu.vector_store %arg7[%c0, %c0_0], %0 {strides = array<i32>} : memref<64x64xf32, #tpu.memory_space<vmem>>, vector<64x64xf32>,
    %c0_1 = arith.constant 0 : index
    %c0_2 = arith.constant 0 : index
    %2 = vector.load %arg0[%c0_1, %c0_2] : memref<34x34xf32, #tpu.memory_space<vmem>>, vector<34x34xf32>
    %c0_3 = arith.constant 0 : index
    %c0_4 = arith.constant 0 : index
    %3 = vector.load %arg7[%c0_3, %c0_4] : memref<64x64xf32, #tpu.memory_space<vmem>>, vector<34x34xf32>
    tpu.vector_store %arg7[%c0_3, %c0_4], %2 {strides = array<i32>} : memref<64x64xf32, #tpu.memory_space<vmem>>, vector<34x34xf32>,
    %c0_5 = arith.constant 0 : index
    %c0_6 = arith.constant 0 : index
    %4 = vector.load %arg7[%c0_5, %c0_6] : memref<64x64xf32, #tpu.memory_space<vmem>>, vector<64x64xf32>
    %5 = arith.truncf %4 : vector<64x64xf32> to vector<64x64xbf16>
    %c0_7 = arith.constant 0 : index
    %c0_8 = arith.constant 0 : index
    %6 = vector.load %arg2[%c0_7, %c0_8] : memref<64x256xf32, #tpu.memory_space<vmem>>, vector<64x256xf32>
    %7 = arith.truncf %6 : vector<64x256xf32> to vector<64x256xbf16>
    %cst_9 = arith.constant dense<0.000000e+00> : vector<64x256xf32>
    %8 = tpu.matmul %5, %7, %cst_9 {dimension_numbers = #tpu.dot_dimension_numbers<[1], [0], [0], [1], [0, 0, 1, 1], [], []>} : vector<64x64xbf16>, vector<64x256xbf16>, vector<64x256xf32> -> vector<64x256xf32>
    %9 = vector.extract_strided_slice %8 {offsets = [0, 0], sizes = [64, 128], strides = [1, 1]} : vector<64x256xf32> to vector<64x128xf32>
    %10 = arith.truncf %9 : vector<64x128xf32> to vector<64x128xbf16>
    %11 = vector.extract_strided_slice %8 {offsets = [0, 128], sizes = [64, 128], strides = [1, 1]} : vector<64x256xf32> to vector<64x128xf32>
    %12 = tpu.transpose %11, [1, 0] : vector<64x128xf32> -> vector<128x64xf32>
    %13 = vector.extract_strided_slice %12 {offsets = [8, 0], sizes = [8, 64], strides = [1, 1]} : vector<128x64xf32> to vector<8x64xf32>
    %14 = vector.extract_strided_slice %11 {offsets = [0, 0], sizes = [64, 1], strides = [1, 1]} : vector<64x128xf32> to vector<64x1xf32>
    %15 = vector.extract_strided_slice %13 {offsets = [0, 0], sizes = [1, 64], strides = [1, 1]} : vector<8x64xf32> to vector<1x64xf32>
    %16 = vector.broadcast %14 : vector<64x1xf32> to vector<64x64xf32>
    %17 = vector.broadcast %15 : vector<1x64xf32> to vector<64x64xf32>
    %18 = arith.addf %16, %17 : vector<64x64xf32>
    %cst_10 = arith.constant 0.000000e+00 : f32
    %19 = vector.broadcast %cst_10 : f32 to vector<64x64xf32>
    %20 = arith.cmpf oge, %18, %19 : vector<64x64xf32>
    %cst_11 = arith.constant 2.000000e-01 : f32
    %21 = vector.broadcast %cst_11 : f32 to vector<64x64xf32>
    %22 = arith.mulf %21, %18 : vector<64x64xf32>
    %23 = arith.select %20, %18, %22 : vector<64x64xi1>, vector<64x64xf32>
    %c0_12 = arith.constant 0 : index
    %c0_13 = arith.constant 0 : index
    %24 = vector.load %arg1[%c0_12, %c0_13] : memref<64x64xf32, #tpu.memory_space<vmem>>, vector<64x64xf32>
    %25 = arith.addf %23, %24 : vector<64x64xf32>
    %cst_14 = arith.constant dense<0xFF800000> : vector<64xf32>
    %26 = vector.multi_reduction <maximumf>, %25, %cst_14 [1] : vector<64x64xf32> to vector<64xf32>
    %27 = vector.shape_cast %26 : vector<64xf32> to vector<64x1xf32>
    %28 = vector.broadcast %27 : vector<64x1xf32> to vector<64x64xf32>
    %29 = arith.subf %25, %28 : vector<64x64xf32>
    %30 = math.exp %29 : vector<64x64xf32>
    %cst_15 = arith.constant dense<0.000000e+00> : vector<64xf32>
    %31 = vector.multi_reduction <add>, %30, %cst_15 [1] : vector<64x64xf32> to vector<64xf32>
    %32 = vector.shape_cast %31 : vector<64xf32> to vector<64x1xf32>
    %33 = tpu.reciprocal %32 {approx = true} : vector<64x1xf32> -> vector<64x1xf32>
    %34 = vector.broadcast %33 : vector<64x1xf32> to vector<64x64xf32>
    %35 = arith.mulf %30, %34 : vector<64x64xf32>
    %36 = arith.truncf %35 : vector<64x64xf32> to vector<64x64xbf16>
    %cst_16 = arith.constant dense<0.000000e+00> : vector<64x128xf32>
    %37 = tpu.matmul %36, %10, %cst_16 {dimension_numbers = #tpu.dot_dimension_numbers<[1], [0], [0], [1], [0, 0, 1, 1], [], []>} : vector<64x64xbf16>, vector<64x128xbf16>, vector<64x128xf32> -> vector<64x128xf32>
    %38 = vector.extract_strided_slice %37 {offsets = [0, 0], sizes = [64, 16], strides = [1, 1]} : vector<64x128xf32> to vector<64x16xf32>
    %c0_17 = arith.constant 0 : index
    %c0_18 = arith.constant 0 : index
    %39 = vector.load %arg8[%c0_17, %c0_18] : memref<64x128xf32, #tpu.memory_space<vmem>>, vector<64x16xf32>
    tpu.vector_store %arg8[%c0_17, %c0_18], %38 {strides = array<i32>} : memref<64x128xf32, #tpu.memory_space<vmem>>, vector<64x16xf32>,
    %40 = vector.extract_strided_slice %11 {offsets = [0, 1], sizes = [64, 1], strides = [1, 1]} : vector<64x128xf32> to vector<64x1xf32>
    %41 = vector.extract_strided_slice %13 {offsets = [1, 0], sizes = [1, 64], strides = [1, 1]} : vector<8x64xf32> to vector<1x64xf32>
    %42 = vector.broadcast %40 : vector<64x1xf32> to vector<64x64xf32>
    %43 = vector.broadcast %41 : vector<1x64xf32> to vector<64x64xf32>
    %44 = arith.addf %42, %43 : vector<64x64xf32>
    %cst_19 = arith.constant 0.000000e+00 : f32
    %45 = vector.broadcast %cst_19 : f32 to vector<64x64xf32>
    %46 = arith.cmpf oge, %44, %45 : vector<64x64xf32>
    %cst_20 = arith.constant 2.000000e-01 : f32
    %47 = vector.broadcast %cst_20 : f32 to vector<64x64xf32>
    %48 = arith.mulf %47, %44 : vector<64x64xf32>
    %49 = arith.select %46, %44, %48 : vector<64x64xi1>, vector<64x64xf32>
    %c0_21 = arith.constant 0 : index
    %c0_22 = arith.constant 0 : index
    %50 = vector.load %arg1[%c0_21, %c0_22] : memref<64x64xf32, #tpu.memory_space<vmem>>, vector<64x64xf32>
    %51 = arith.addf %49, %50 : vector<64x64xf32>
    %cst_23 = arith.constant dense<0xFF800000> : vector<64xf32>
    %52 = vector.multi_reduction <maximumf>, %51, %cst_23 [1] : vector<64x64xf32> to vector<64xf32>
    %53 = vector.shape_cast %52 : vector<64xf32> to vector<64x1xf32>
    %54 = vector.broadcast %53 : vector<64x1xf32> to vector<64x64xf32>
    %55 = arith.subf %51, %54 : vector<64x64xf32>
    %56 = math.exp %55 : vector<64x64xf32>
    %cst_24 = arith.constant dense<0.000000e+00> : vector<64xf32>
    %57 = vector.multi_reduction <add>, %56, %cst_24 [1] : vector<64x64xf32> to vector<64xf32>
    %58 = vector.shape_cast %57 : vector<64xf32> to vector<64x1xf32>
    %59 = tpu.reciprocal %58 {approx = true} : vector<64x1xf32> -> vector<64x1xf32>
    %60 = vector.broadcast %59 : vector<64x1xf32> to vector<64x64xf32>
    %61 = arith.mulf %56, %60 : vector<64x64xf32>
    %62 = arith.truncf %61 : vector<64x64xf32> to vector<64x64xbf16>
    %cst_25 = arith.constant dense<0.000000e+00> : vector<64x128xf32>
    %63 = tpu.matmul %62, %10, %cst_25 {dimension_numbers = #tpu.dot_dimension_numbers<[1], [0], [0], [1], [0, 0, 1, 1], [], []>} : vector<64x64xbf16>, vector<64x128xbf16>, vector<64x128xf32> -> vector<64x128xf32>
    %64 = vector.extract_strided_slice %63 {offsets = [0, 16], sizes = [64, 16], strides = [1, 1]} : vector<64x128xf32> to vector<64x16xf32>
    %c0_26 = arith.constant 0 : index
    %c16 = arith.constant 16 : index
    %65 = vector.load %arg8[%c0_26, %c16] : memref<64x128xf32, #tpu.memory_space<vmem>>, vector<64x16xf32>
    tpu.vector_store %arg8[%c0_26, %c16], %64 {strides = array<i32>} : memref<64x128xf32, #tpu.memory_space<vmem>>, vector<64x16xf32>,
    %66 = vector.extract_strided_slice %11 {offsets = [0, 2], sizes = [64, 1], strides = [1, 1]} : vector<64x128xf32> to vector<64x1xf32>
    %67 = vector.extract_strided_slice %13 {offsets = [2, 0], sizes = [1, 64], strides = [1, 1]} : vector<8x64xf32> to vector<1x64xf32>
    %68 = vector.broadcast %66 : vector<64x1xf32> to vector<64x64xf32>
    %69 = vector.broadcast %67 : vector<1x64xf32> to vector<64x64xf32>
    %70 = arith.addf %68, %69 : vector<64x64xf32>
    %cst_27 = arith.constant 0.000000e+00 : f32
    %71 = vector.broadcast %cst_27 : f32 to vector<64x64xf32>
    %72 = arith.cmpf oge, %70, %71 : vector<64x64xf32>
    %cst_28 = arith.constant 2.000000e-01 : f32
    %73 = vector.broadcast %cst_28 : f32 to vector<64x64xf32>
    %74 = arith.mulf %73, %70 : vector<64x64xf32>
    %75 = arith.select %72, %70, %74 : vector<64x64xi1>, vector<64x64xf32>
    %c0_29 = arith.constant 0 : index
    %c0_30 = arith.constant 0 : index
    %76 = vector.load %arg1[%c0_29, %c0_30] : memref<64x64xf32, #tpu.memory_space<vmem>>, vector<64x64xf32>
    %77 = arith.addf %75, %76 : vector<64x64xf32>
    %cst_31 = arith.constant dense<0xFF800000> : vector<64xf32>
    %78 = vector.multi_reduction <maximumf>, %77, %cst_31 [1] : vector<64x64xf32> to vector<64xf32>
    %79 = vector.shape_cast %78 : vector<64xf32> to vector<64x1xf32>
    %80 = vector.broadcast %79 : vector<64x1xf32> to vector<64x64xf32>
    %81 = arith.subf %77, %80 : vector<64x64xf32>
    %82 = math.exp %81 : vector<64x64xf32>
    %cst_32 = arith.constant dense<0.000000e+00> : vector<64xf32>
    %83 = vector.multi_reduction <add>, %82, %cst_32 [1] : vector<64x64xf32> to vector<64xf32>
    %84 = vector.shape_cast %83 : vector<64xf32> to vector<64x1xf32>
    %85 = tpu.reciprocal %84 {approx = true} : vector<64x1xf32> -> vector<64x1xf32>
    %86 = vector.broadcast %85 : vector<64x1xf32> to vector<64x64xf32>
    %87 = arith.mulf %82, %86 : vector<64x64xf32>
    %88 = arith.truncf %87 : vector<64x64xf32> to vector<64x64xbf16>
    %cst_33 = arith.constant dense<0.000000e+00> : vector<64x128xf32>
    %89 = tpu.matmul %88, %10, %cst_33 {dimension_numbers = #tpu.dot_dimension_numbers<[1], [0], [0], [1], [0, 0, 1, 1], [], []>} : vector<64x64xbf16>, vector<64x128xbf16>, vector<64x128xf32> -> vector<64x128xf32>
    %90 = vector.extract_strided_slice %89 {offsets = [0, 32], sizes = [64, 16], strides = [1, 1]} : vector<64x128xf32> to vector<64x16xf32>
    %c0_34 = arith.constant 0 : index
    %c32 = arith.constant 32 : index
    %91 = vector.load %arg8[%c0_34, %c32] : memref<64x128xf32, #tpu.memory_space<vmem>>, vector<64x16xf32>
    tpu.vector_store %arg8[%c0_34, %c32], %90 {strides = array<i32>} : memref<64x128xf32, #tpu.memory_space<vmem>>, vector<64x16xf32>,
    %92 = vector.extract_strided_slice %11 {offsets = [0, 3], sizes = [64, 1], strides = [1, 1]} : vector<64x128xf32> to vector<64x1xf32>
    %93 = vector.extract_strided_slice %13 {offsets = [3, 0], sizes = [1, 64], strides = [1, 1]} : vector<8x64xf32> to vector<1x64xf32>
    %94 = vector.broadcast %92 : vector<64x1xf32> to vector<64x64xf32>
    %95 = vector.broadcast %93 : vector<1x64xf32> to vector<64x64xf32>
    %96 = arith.addf %94, %95 : vector<64x64xf32>
    %cst_35 = arith.constant 0.000000e+00 : f32
    %97 = vector.broadcast %cst_35 : f32 to vector<64x64xf32>
    %98 = arith.cmpf oge, %96, %97 : vector<64x64xf32>
    %cst_36 = arith.constant 2.000000e-01 : f32
    %99 = vector.broadcast %cst_36 : f32 to vector<64x64xf32>
    %100 = arith.mulf %99, %96 : vector<64x64xf32>
    %101 = arith.select %98, %96, %100 : vector<64x64xi1>, vector<64x64xf32>
    %c0_37 = arith.constant 0 : index
    %c0_38 = arith.constant 0 : index
    %102 = vector.load %arg1[%c0_37, %c0_38] : memref<64x64xf32, #tpu.memory_space<vmem>>, vector<64x64xf32>
    %103 = arith.addf %101, %102 : vector<64x64xf32>
    %cst_39 = arith.constant dense<0xFF800000> : vector<64xf32>
    %104 = vector.multi_reduction <maximumf>, %103, %cst_39 [1] : vector<64x64xf32> to vector<64xf32>
    %105 = vector.shape_cast %104 : vector<64xf32> to vector<64x1xf32>
    %106 = vector.broadcast %105 : vector<64x1xf32> to vector<64x64xf32>
    %107 = arith.subf %103, %106 : vector<64x64xf32>
    %108 = math.exp %107 : vector<64x64xf32>
    %cst_40 = arith.constant dense<0.000000e+00> : vector<64xf32>
    %109 = vector.multi_reduction <add>, %108, %cst_40 [1] : vector<64x64xf32> to vector<64xf32>
    %110 = vector.shape_cast %109 : vector<64xf32> to vector<64x1xf32>
    %111 = tpu.reciprocal %110 {approx = true} : vector<64x1xf32> -> vector<64x1xf32>
    %112 = vector.broadcast %111 : vector<64x1xf32> to vector<64x64xf32>
    %113 = arith.mulf %108, %112 : vector<64x64xf32>
    %114 = arith.truncf %113 : vector<64x64xf32> to vector<64x64xbf16>
    %cst_41 = arith.constant dense<0.000000e+00> : vector<64x128xf32>
    %115 = tpu.matmul %114, %10, %cst_41 {dimension_numbers = #tpu.dot_dimension_numbers<[1], [0], [0], [1], [0, 0, 1, 1], [], []>} : vector<64x64xbf16>, vector<64x128xbf16>, vector<64x128xf32> -> vector<64x128xf32>
    %116 = vector.extract_strided_slice %115 {offsets = [0, 48], sizes = [64, 16], strides = [1, 1]} : vector<64x128xf32> to vector<64x16xf32>
    %c0_42 = arith.constant 0 : index
    %c48 = arith.constant 48 : index
    %117 = vector.load %arg8[%c0_42, %c48] : memref<64x128xf32, #tpu.memory_space<vmem>>, vector<64x16xf32>
    tpu.vector_store %arg8[%c0_42, %c48], %116 {strides = array<i32>} : memref<64x128xf32, #tpu.memory_space<vmem>>, vector<64x16xf32>,
    %118 = vector.extract_strided_slice %11 {offsets = [0, 4], sizes = [64, 1], strides = [1, 1]} : vector<64x128xf32> to vector<64x1xf32>
    %119 = vector.extract_strided_slice %13 {offsets = [4, 0], sizes = [1, 64], strides = [1, 1]} : vector<8x64xf32> to vector<1x64xf32>
    %120 = vector.broadcast %118 : vector<64x1xf32> to vector<64x64xf32>
    %121 = vector.broadcast %119 : vector<1x64xf32> to vector<64x64xf32>
    %122 = arith.addf %120, %121 : vector<64x64xf32>
    %cst_43 = arith.constant 0.000000e+00 : f32
    %123 = vector.broadcast %cst_43 : f32 to vector<64x64xf32>
    %124 = arith.cmpf oge, %122, %123 : vector<64x64xf32>
    %cst_44 = arith.constant 2.000000e-01 : f32
    %125 = vector.broadcast %cst_44 : f32 to vector<64x64xf32>
    %126 = arith.mulf %125, %122 : vector<64x64xf32>
    %127 = arith.select %124, %122, %126 : vector<64x64xi1>, vector<64x64xf32>
    %c0_45 = arith.constant 0 : index
    %c0_46 = arith.constant 0 : index
    %128 = vector.load %arg1[%c0_45, %c0_46] : memref<64x64xf32, #tpu.memory_space<vmem>>, vector<64x64xf32>
    %129 = arith.addf %127, %128 : vector<64x64xf32>
    %cst_47 = arith.constant dense<0xFF800000> : vector<64xf32>
    %130 = vector.multi_reduction <maximumf>, %129, %cst_47 [1] : vector<64x64xf32> to vector<64xf32>
    %131 = vector.shape_cast %130 : vector<64xf32> to vector<64x1xf32>
    %132 = vector.broadcast %131 : vector<64x1xf32> to vector<64x64xf32>
    %133 = arith.subf %129, %132 : vector<64x64xf32>
    %134 = math.exp %133 : vector<64x64xf32>
    %cst_48 = arith.constant dense<0.000000e+00> : vector<64xf32>
    %135 = vector.multi_reduction <add>, %134, %cst_48 [1] : vector<64x64xf32> to vector<64xf32>
    %136 = vector.shape_cast %135 : vector<64xf32> to vector<64x1xf32>
    %137 = tpu.reciprocal %136 {approx = true} : vector<64x1xf32> -> vector<64x1xf32>
    %138 = vector.broadcast %137 : vector<64x1xf32> to vector<64x64xf32>
    %139 = arith.mulf %134, %138 : vector<64x64xf32>
    %140 = arith.truncf %139 : vector<64x64xf32> to vector<64x64xbf16>
    %cst_49 = arith.constant dense<0.000000e+00> : vector<64x128xf32>
    %141 = tpu.matmul %140, %10, %cst_49 {dimension_numbers = #tpu.dot_dimension_numbers<[1], [0], [0], [1], [0, 0, 1, 1], [], []>} : vector<64x64xbf16>, vector<64x128xbf16>, vector<64x128xf32> -> vector<64x128xf32>
    %142 = vector.extract_strided_slice %141 {offsets = [0, 64], sizes = [64, 16], strides = [1, 1]} : vector<64x128xf32> to vector<64x16xf32>
    %c0_50 = arith.constant 0 : index
    %c64 = arith.constant 64 : index
    %143 = vector.load %arg8[%c0_50, %c64] : memref<64x128xf32, #tpu.memory_space<vmem>>, vector<64x16xf32>
    tpu.vector_store %arg8[%c0_50, %c64], %142 {strides = array<i32>} : memref<64x128xf32, #tpu.memory_space<vmem>>, vector<64x16xf32>,
    %144 = vector.extract_strided_slice %11 {offsets = [0, 5], sizes = [64, 1], strides = [1, 1]} : vector<64x128xf32> to vector<64x1xf32>
    %145 = vector.extract_strided_slice %13 {offsets = [5, 0], sizes = [1, 64], strides = [1, 1]} : vector<8x64xf32> to vector<1x64xf32>
    %146 = vector.broadcast %144 : vector<64x1xf32> to vector<64x64xf32>
    %147 = vector.broadcast %145 : vector<1x64xf32> to vector<64x64xf32>
    %148 = arith.addf %146, %147 : vector<64x64xf32>
    %cst_51 = arith.constant 0.000000e+00 : f32
    %149 = vector.broadcast %cst_51 : f32 to vector<64x64xf32>
    %150 = arith.cmpf oge, %148, %149 : vector<64x64xf32>
    %cst_52 = arith.constant 2.000000e-01 : f32
    %151 = vector.broadcast %cst_52 : f32 to vector<64x64xf32>
    %152 = arith.mulf %151, %148 : vector<64x64xf32>
    %153 = arith.select %150, %148, %152 : vector<64x64xi1>, vector<64x64xf32>
    %c0_53 = arith.constant 0 : index
    %c0_54 = arith.constant 0 : index
    %154 = vector.load %arg1[%c0_53, %c0_54] : memref<64x64xf32, #tpu.memory_space<vmem>>, vector<64x64xf32>
    %155 = arith.addf %153, %154 : vector<64x64xf32>
    %cst_55 = arith.constant dense<0xFF800000> : vector<64xf32>
    %156 = vector.multi_reduction <maximumf>, %155, %cst_55 [1] : vector<64x64xf32> to vector<64xf32>
    %157 = vector.shape_cast %156 : vector<64xf32> to vector<64x1xf32>
    %158 = vector.broadcast %157 : vector<64x1xf32> to vector<64x64xf32>
    %159 = arith.subf %155, %158 : vector<64x64xf32>
    %160 = math.exp %159 : vector<64x64xf32>
    %cst_56 = arith.constant dense<0.000000e+00> : vector<64xf32>
    %161 = vector.multi_reduction <add>, %160, %cst_56 [1] : vector<64x64xf32> to vector<64xf32>
    %162 = vector.shape_cast %161 : vector<64xf32> to vector<64x1xf32>
    %163 = tpu.reciprocal %162 {approx = true} : vector<64x1xf32> -> vector<64x1xf32>
    %164 = vector.broadcast %163 : vector<64x1xf32> to vector<64x64xf32>
    %165 = arith.mulf %160, %164 : vector<64x64xf32>
    %166 = arith.truncf %165 : vector<64x64xf32> to vector<64x64xbf16>
    %cst_57 = arith.constant dense<0.000000e+00> : vector<64x128xf32>
    %167 = tpu.matmul %166, %10, %cst_57 {dimension_numbers = #tpu.dot_dimension_numbers<[1], [0], [0], [1], [0, 0, 1, 1], [], []>} : vector<64x64xbf16>, vector<64x128xbf16>, vector<64x128xf32> -> vector<64x128xf32>
    %168 = vector.extract_strided_slice %167 {offsets = [0, 80], sizes = [64, 16], strides = [1, 1]} : vector<64x128xf32> to vector<64x16xf32>
    %c0_58 = arith.constant 0 : index
    %c80 = arith.constant 80 : index
    %169 = vector.load %arg8[%c0_58, %c80] : memref<64x128xf32, #tpu.memory_space<vmem>>, vector<64x16xf32>
    tpu.vector_store %arg8[%c0_58, %c80], %168 {strides = array<i32>} : memref<64x128xf32, #tpu.memory_space<vmem>>, vector<64x16xf32>,
    %170 = vector.extract_strided_slice %11 {offsets = [0, 6], sizes = [64, 1], strides = [1, 1]} : vector<64x128xf32> to vector<64x1xf32>
    %171 = vector.extract_strided_slice %13 {offsets = [6, 0], sizes = [1, 64], strides = [1, 1]} : vector<8x64xf32> to vector<1x64xf32>
    %172 = vector.broadcast %170 : vector<64x1xf32> to vector<64x64xf32>
    %173 = vector.broadcast %171 : vector<1x64xf32> to vector<64x64xf32>
    %174 = arith.addf %172, %173 : vector<64x64xf32>
    %cst_59 = arith.constant 0.000000e+00 : f32
    %175 = vector.broadcast %cst_59 : f32 to vector<64x64xf32>
    %176 = arith.cmpf oge, %174, %175 : vector<64x64xf32>
    %cst_60 = arith.constant 2.000000e-01 : f32
    %177 = vector.broadcast %cst_60 : f32 to vector<64x64xf32>
    %178 = arith.mulf %177, %174 : vector<64x64xf32>
    %179 = arith.select %176, %174, %178 : vector<64x64xi1>, vector<64x64xf32>
    %c0_61 = arith.constant 0 : index
    %c0_62 = arith.constant 0 : index
    %180 = vector.load %arg1[%c0_61, %c0_62] : memref<64x64xf32, #tpu.memory_space<vmem>>, vector<64x64xf32>
    %181 = arith.addf %179, %180 : vector<64x64xf32>
    %cst_63 = arith.constant dense<0xFF800000> : vector<64xf32>
    %182 = vector.multi_reduction <maximumf>, %181, %cst_63 [1] : vector<64x64xf32> to vector<64xf32>
    %183 = vector.shape_cast %182 : vector<64xf32> to vector<64x1xf32>
    %184 = vector.broadcast %183 : vector<64x1xf32> to vector<64x64xf32>
    %185 = arith.subf %181, %184 : vector<64x64xf32>
    %186 = math.exp %185 : vector<64x64xf32>
    %cst_64 = arith.constant dense<0.000000e+00> : vector<64xf32>
    %187 = vector.multi_reduction <add>, %186, %cst_64 [1] : vector<64x64xf32> to vector<64xf32>
    %188 = vector.shape_cast %187 : vector<64xf32> to vector<64x1xf32>
    %189 = tpu.reciprocal %188 {approx = true} : vector<64x1xf32> -> vector<64x1xf32>
    %190 = vector.broadcast %189 : vector<64x1xf32> to vector<64x64xf32>
    %191 = arith.mulf %186, %190 : vector<64x64xf32>
    %192 = arith.truncf %191 : vector<64x64xf32> to vector<64x64xbf16>
    %cst_65 = arith.constant dense<0.000000e+00> : vector<64x128xf32>
    %193 = tpu.matmul %192, %10, %cst_65 {dimension_numbers = #tpu.dot_dimension_numbers<[1], [0], [0], [1], [0, 0, 1, 1], [], []>} : vector<64x64xbf16>, vector<64x128xbf16>, vector<64x128xf32> -> vector<64x128xf32>
    %194 = vector.extract_strided_slice %193 {offsets = [0, 96], sizes = [64, 16], strides = [1, 1]} : vector<64x128xf32> to vector<64x16xf32>
    %c0_66 = arith.constant 0 : index
    %c96 = arith.constant 96 : index
    %195 = vector.load %arg8[%c0_66, %c96] : memref<64x128xf32, #tpu.memory_space<vmem>>, vector<64x16xf32>
    tpu.vector_store %arg8[%c0_66, %c96], %194 {strides = array<i32>} : memref<64x128xf32, #tpu.memory_space<vmem>>, vector<64x16xf32>,
    %196 = vector.extract_strided_slice %11 {offsets = [0, 7], sizes = [64, 1], strides = [1, 1]} : vector<64x128xf32> to vector<64x1xf32>
    %197 = vector.extract_strided_slice %13 {offsets = [7, 0], sizes = [1, 64], strides = [1, 1]} : vector<8x64xf32> to vector<1x64xf32>
    %198 = vector.broadcast %196 : vector<64x1xf32> to vector<64x64xf32>
    %199 = vector.broadcast %197 : vector<1x64xf32> to vector<64x64xf32>
    %200 = arith.addf %198, %199 : vector<64x64xf32>
    %cst_67 = arith.constant 0.000000e+00 : f32
    %201 = vector.broadcast %cst_67 : f32 to vector<64x64xf32>
    %202 = arith.cmpf oge, %200, %201 : vector<64x64xf32>
    %cst_68 = arith.constant 2.000000e-01 : f32
    %203 = vector.broadcast %cst_68 : f32 to vector<64x64xf32>
    %204 = arith.mulf %203, %200 : vector<64x64xf32>
    %205 = arith.select %202, %200, %204 : vector<64x64xi1>, vector<64x64xf32>
    %c0_69 = arith.constant 0 : index
    %c0_70 = arith.constant 0 : index
    %206 = vector.load %arg1[%c0_69, %c0_70] : memref<64x64xf32, #tpu.memory_space<vmem>>, vector<64x64xf32>
    %207 = arith.addf %205, %206 : vector<64x64xf32>
    %cst_71 = arith.constant dense<0xFF800000> : vector<64xf32>
    %208 = vector.multi_reduction <maximumf>, %207, %cst_71 [1] : vector<64x64xf32> to vector<64xf32>
    %209 = vector.shape_cast %208 : vector<64xf32> to vector<64x1xf32>
    %210 = vector.broadcast %209 : vector<64x1xf32> to vector<64x64xf32>
    %211 = arith.subf %207, %210 : vector<64x64xf32>
    %212 = math.exp %211 : vector<64x64xf32>
    %cst_72 = arith.constant dense<0.000000e+00> : vector<64xf32>
    %213 = vector.multi_reduction <add>, %212, %cst_72 [1] : vector<64x64xf32> to vector<64xf32>
    %214 = vector.shape_cast %213 : vector<64xf32> to vector<64x1xf32>
    %215 = tpu.reciprocal %214 {approx = true} : vector<64x1xf32> -> vector<64x1xf32>
    %216 = vector.broadcast %215 : vector<64x1xf32> to vector<64x64xf32>
    %217 = arith.mulf %212, %216 : vector<64x64xf32>
    %218 = arith.truncf %217 : vector<64x64xf32> to vector<64x64xbf16>
    %cst_73 = arith.constant dense<0.000000e+00> : vector<64x128xf32>
    %219 = tpu.matmul %218, %10, %cst_73 {dimension_numbers = #tpu.dot_dimension_numbers<[1], [0], [0], [1], [0, 0, 1, 1], [], []>} : vector<64x64xbf16>, vector<64x128xbf16>, vector<64x128xf32> -> vector<64x128xf32>
    %220 = vector.extract_strided_slice %219 {offsets = [0, 112], sizes = [64, 16], strides = [1, 1]} : vector<64x128xf32> to vector<64x16xf32>
    %c0_74 = arith.constant 0 : index
    %c112 = arith.constant 112 : index
    %221 = vector.load %arg8[%c0_74, %c112] : memref<64x128xf32, #tpu.memory_space<vmem>>, vector<64x16xf32>
    tpu.vector_store %arg8[%c0_74, %c112], %220 {strides = array<i32>} : memref<64x128xf32, #tpu.memory_space<vmem>>, vector<64x16xf32>,
    %c0_75 = arith.constant 0 : index
    %c0_76 = arith.constant 0 : index
    %222 = vector.load %arg8[%c0_75, %c0_76] : memref<64x128xf32, #tpu.memory_space<vmem>>, vector<64x128xf32>
    %c0_77 = arith.constant 0 : index
    %c0_78 = arith.constant 0 : index
    %223 = vector.load %arg3[%c0_77, %c0_78] : memref<1x128xf32, #tpu.memory_space<vmem>>, vector<1x128xf32>
    %224 = vector.broadcast %223 : vector<1x128xf32> to vector<64x128xf32>
    %225 = arith.addf %222, %224 : vector<64x128xf32>
    %cst_79 = arith.constant 0.000000e+00 : f32
    %226 = vector.broadcast %cst_79 : f32 to vector<64x128xf32>
    %227 = arith.cmpf ogt, %225, %226 : vector<64x128xf32>
    %cst_80 = arith.constant 0.000000e+00 : f32
    %228 = vector.broadcast %cst_80 : f32 to vector<64x128xf32>
    %229 = arith.minimumf %225, %228 : vector<64x128xf32>
    %230 = math.exp %229 : vector<64x128xf32>
    %cst_81 = arith.constant 1.000000e+00 : f32
    %231 = vector.broadcast %cst_81 : f32 to vector<64x128xf32>
    %232 = arith.subf %230, %231 : vector<64x128xf32>
    %233 = arith.select %227, %225, %232 : vector<64x128xi1>, vector<64x128xf32>
    %234 = arith.truncf %233 : vector<64x128xf32> to vector<64x128xbf16>
    %c0_82 = arith.constant 0 : index
    %c0_83 = arith.constant 0 : index
    %235 = vector.load %arg4[%c0_82, %c0_83] : memref<128x256xf32, #tpu.memory_space<vmem>>, vector<128x256xf32>
    %236 = arith.truncf %235 : vector<128x256xf32> to vector<128x256xbf16>
    %cst_84 = arith.constant dense<0.000000e+00> : vector<64x256xf32>
    %237 = tpu.matmul %234, %236, %cst_84 {dimension_numbers = #tpu.dot_dimension_numbers<[1], [0], [0], [1], [0, 0, 1, 1], [], []>} : vector<64x128xbf16>, vector<128x256xbf16>, vector<64x256xf32> -> vector<64x256xf32>
    %238 = vector.extract_strided_slice %237 {offsets = [0, 0], sizes = [64, 128], strides = [1, 1]} : vector<64x256xf32> to vector<64x128xf32>
    %239 = arith.truncf %238 : vector<64x128xf32> to vector<64x128xbf16>
    %240 = vector.extract_strided_slice %237 {offsets = [0, 128], sizes = [64, 128], strides = [1, 1]} : vector<64x256xf32> to vector<64x128xf32>
    %241 = tpu.transpose %240, [1, 0] : vector<64x128xf32> -> vector<128x64xf32>
    %242 = vector.extract_strided_slice %241 {offsets = [1, 0], sizes = [1, 64], strides = [1, 1]} : vector<128x64xf32> to vector<1x64xf32>
    %243 = vector.extract_strided_slice %240 {offsets = [0, 0], sizes = [64, 1], strides = [1, 1]} : vector<64x128xf32> to vector<64x1xf32>
    %244 = vector.broadcast %243 : vector<64x1xf32> to vector<64x64xf32>
    %245 = vector.broadcast %242 : vector<1x64xf32> to vector<64x64xf32>
    %246 = arith.addf %244, %245 : vector<64x64xf32>
    %cst_85 = arith.constant 0.000000e+00 : f32
    %247 = vector.broadcast %cst_85 : f32 to vector<64x64xf32>
    %248 = arith.cmpf oge, %246, %247 : vector<64x64xf32>
    %cst_86 = arith.constant 2.000000e-01 : f32
    %249 = vector.broadcast %cst_86 : f32 to vector<64x64xf32>
    %250 = arith.mulf %249, %246 : vector<64x64xf32>
    %251 = arith.select %248, %246, %250 : vector<64x64xi1>, vector<64x64xf32>
    %c0_87 = arith.constant 0 : index
    %c0_88 = arith.constant 0 : index
    %252 = vector.load %arg1[%c0_87, %c0_88] : memref<64x64xf32, #tpu.memory_space<vmem>>, vector<64x64xf32>
    %253 = arith.addf %251, %252 : vector<64x64xf32>
    %cst_89 = arith.constant dense<0xFF800000> : vector<64xf32>
    %254 = vector.multi_reduction <maximumf>, %253, %cst_89 [1] : vector<64x64xf32> to vector<64xf32>
    %255 = vector.shape_cast %254 : vector<64xf32> to vector<64x1xf32>
    %256 = vector.broadcast %255 : vector<64x1xf32> to vector<64x64xf32>
    %257 = arith.subf %253, %256 : vector<64x64xf32>
    %258 = math.exp %257 : vector<64x64xf32>
    %cst_90 = arith.constant dense<0.000000e+00> : vector<64xf32>
    %259 = vector.multi_reduction <add>, %258, %cst_90 [1] : vector<64x64xf32> to vector<64xf32>
    %260 = vector.shape_cast %259 : vector<64xf32> to vector<64x1xf32>
    %261 = tpu.reciprocal %260 {approx = true} : vector<64x1xf32> -> vector<64x1xf32>
    %262 = vector.broadcast %261 : vector<64x1xf32> to vector<64x64xf32>
    %263 = arith.mulf %258, %262 : vector<64x64xf32>
    %264 = arith.truncf %263 : vector<64x64xf32> to vector<64x64xbf16>
    %cst_91 = arith.constant dense<0.000000e+00> : vector<64x128xf32>
    %265 = tpu.matmul %264, %239, %cst_91 {dimension_numbers = #tpu.dot_dimension_numbers<[1], [0], [0], [1], [0, 0, 1, 1], [], []>} : vector<64x64xbf16>, vector<64x128xbf16>, vector<64x128xf32> -> vector<64x128xf32>
    %c0_92 = arith.constant 0 : index
    %c0_93 = arith.constant 0 : index
    %266 = vector.load %arg5[%c0_92, %c0_93] : memref<1x128xf32, #tpu.memory_space<vmem>>, vector<1x128xf32>
    %267 = vector.broadcast %266 : vector<1x128xf32> to vector<64x128xf32>
    %268 = arith.addf %265, %267 : vector<64x128xf32>
    %c0_94 = arith.constant 0 : index
    %c0_95 = arith.constant 0 : index
    %269 = vector.load %arg6[%c0_94, %c0_95] : memref<64x128xf32, #tpu.memory_space<vmem>>, vector<64x128xf32>
    tpu.vector_store %arg6[%c0_94, %c0_95], %268 {strides = array<i32>} : memref<64x128xf32, #tpu.memory_space<vmem>>, vector<64x128xf32>,
    return
  }
}

</mosaic_0001>

<bundles_post_ra>
// kernel: gat_model_forward.1
= control target key start
LH: loop header
LB: loop body
LE: loop exit
PB: predicated region body
PF: predicated region fallthrough
CT: control target
= control target key end

     0   :  { %11 = vsyncpa [#allocation5], 0  ;;  %s5152_s0 = inlined_call_operand.hbm [shape: f32[34,34], index: 0, kind: input, shape index: {}]   ;;  %s5153_s1 = inlined_call_operand.hbm [shape: f32[64,64], index: 1, kind: input, shape index: {}]   ;;  %s5154_s2 = inlined_call_operand.hbm [shape: f32[64,256], index: 2, kind: input, shape index: {}]   ;;  %s5155_s3 = inlined_call_operand.vmem [shape: f32[1,128], index: 3, kind: input, shape index: {}]   ;;  %s5156_s4 = inlined_call_operand.hbm [shape: f32[128,256], index: 4, kind: input, shape index: {}]   ;;  %s5157_s5 = inlined_call_operand.vmem [shape: f32[1,128], index: 5, kind: input, shape index: {}]   ;;  %s5158_s6 = inlined_call_operand.vmem [shape: f32[64,128], index: 6, kind: output, shape index: {}]  }
   0x1   :  { %12 = vsyncpa [#allocation7], 0 }
   0x2   :  { %13 = vsyncpa [#allocation10], 0  ;;  %s3607_s21 = smov [#allocation6]   ;;  %s3608_s23 = smov [#allocation4]  }
   0x3   :  { %s31_s22 = sshll.u32 %s3607_s21, 4  ;;  %s19_s24 = sshll.u32 %s3608_s23, 4  ;;  %s32_s22 = int_to_ptr.vmem [resolvable:$true] %s31_s22  ;;  %s20_s24 = int_to_ptr.vmem [resolvable:$true] %s19_s24 }
   0x4   :  { %s3529_s25 = scalar_lea.vmem %s32_s22, 1024  ;;  %p3534_p1 = scmp.lt.s32.totalorder %s32_s22, %s32_s22 }
   0x5   :  { %p3530_p0 = scmp.ne.s32.totalorder %s32_s22, %s3529_s25  ;;  %p3535_p2 = scmp.lt.s32.totalorder %s3529_s25, %s3529_s25 }
   0x7   :  { %p3536_p3 = por %p3535_p2, %p3534_p1 }
   0x9   :  { %p3537_p4 = pnand %p3536_p3, %p3530_p0 }
   0xb   :  { %3540 = shalt.err (!%p3537_p4)
}
   0xc   :  { %s3609_s26 = smov 128   ;;  %s3610_s27 = smov 8  }
   0xd   :  { %37 = dma.hbm_to_vmem [thread:$0]  %s5153_s1, 1024, %s32_s22, [#allocation7], %s3609_s26, %s3609_s26, %s3610_s27  }
   0xe   :  { %s3549_s30 = scalar_lea.vmem %s20_s24, 640  ;;  %p3554_p6 = scmp.lt.s32.totalorder %s20_s24, %s20_s24 }
   0xf   :  { %p3550_p5 = scmp.ne.s32.totalorder %s20_s24, %s3549_s30  ;;  %p3555_p7 = scmp.lt.s32.totalorder %s3549_s30, %s3549_s30 }
  0x11   :  { %p3556_p8 = por %p3555_p7, %p3554_p6 }
  0x13   :  { %p3557_p9 = pnand %p3556_p8, %p3550_p5 }
  0x15   :  { %3560 = shalt.err (!%p3557_p9)
}
  0x16   :  { %25 = dma.hbm_to_vmem [thread:$0]  %s5152_s0, 640, %s20_s24, [#allocation5], %s3609_s26, %s3609_s26, %s3610_s27  }
  0x17   :  { %s3611_s9 = smov [#allocation8]  }
  0x18   :  { %s43_s10 = sshll.u32 %s3611_s9, 4  ;;  %s44_s10 = int_to_ptr.vmem [resolvable:$true] %s43_s10 }
  0x19   :  { %s3569_s11 = scalar_lea.vmem %s44_s10, 2048  ;;  %p3574_p11 = scmp.lt.s32.totalorder %s44_s10, %s44_s10 }
  0x1a   :  { %p3570_p10 = scmp.ne.s32.totalorder %s44_s10, %s3569_s11  ;;  %p3575_p12 = scmp.lt.s32.totalorder %s3569_s11, %s3569_s11 }
  0x1c   :  { %p3576_p13 = por %p3575_p12, %p3574_p11 }
  0x1e   :  { %p3577_p0 = pnand %p3576_p13, %p3570_p10 }
  0x20   :  { %3580 = shalt.err (!%p3577_p0)
}
  0x21   :  { %s3612_s1 = smov 256   ;;  %s3613_s12 = smov 16  }
  0x22   :  { %49 = dma.hbm_to_vmem [thread:$0]  %s5154_s2, 2048, %s44_s10, [#allocation7], %s3612_s1, %s3612_s1, %s3613_s12  }
  0x23   :  { %s3614_s15 = smov [#allocation9]  }
  0x24   :  { %s57_s16 = sshll.u32 %s3614_s15, 4  ;;  %s58_s16 = int_to_ptr.vmem [resolvable:$true] %s57_s16 }
  0x25   :  { %s3589_s0 = scalar_lea.vmem %s58_s16, 4096  ;;  %p3594_p2 = scmp.lt.s32.totalorder %s58_s16, %s58_s16 }
  0x26   :  { %p3590_p1 = scmp.ne.s32.totalorder %s58_s16, %s3589_s0  ;;  %p3595_p3 = scmp.lt.s32.totalorder %s3589_s0, %s3589_s0 }
  0x28   :  { %p3596_p4 = por %p3595_p3, %p3594_p2 }
  0x2a   :  { %p3597_p5 = pnand %p3596_p4, %p3590_p1 }
  0x2c   :  { %3600 = shalt.err (!%p3597_p5)
}
  0x2d   :  { %63 = dma.hbm_to_vmem [thread:$0]  %s5156_s4, 4096, %s58_s16, [#allocation10], %s3612_s1, %s3612_s1, %s3613_s12  }
  0x2e   :  { %3601 = dma.done.wait [#allocation5], 640  }
  0x2f   :  { %3602 = vsyncadd [#allocation5], 4294966656 }
  0x30   :  { %3603 = dma.done.wait [#allocation7], 3072  }
  0x31   :  { %3604 = vsyncadd [#allocation7], 4294964224 }
  0x32   :  { %3605 = dma.done.wait [#allocation10], 4096  }
  0x33   :  { %3606 = vsyncadd [#allocation10], 4294963200  ;;  %vm79_vm0 = vcmask 523264   ;;  %v5159_v0 = vmov 0   ;;  %v3616_v1 = vmov 0.0   ;;  %v125_v2 = vld [vmem:[#allocation8 + $0x68] sm:$0xff] }
  0x34   :  { %180 = vmatprep.mubr.bf16.mxu0 %v5159_v0  ;;  %200 = vmatprep.mubr.bf16.mxu1 %v5159_v0  ;;  %80 = vst.msk [vmem:[#allocation2] sm:$0xff] %vm79_vm0, %v3616_v1  ;;  %81 = vst.msk [vmem:[#allocation2 + $0x8] sm:$0xff] %vm79_vm0, %v3616_v1  ;;  %v127_v3 = vld [vmem:[#allocation8 + $0x78] sm:$0xff]  ;;  %v124_v4 = vld [vmem:[#allocation8 + $0x60] sm:$0xff]  ;;  %vm93_vm1 = vcmask 277504   ;;  %vm98_vm2 = vcmask 271360  }
  0x35   :  { %82 = vst.msk [vmem:[#allocation2 + $0x10] sm:$0xff] %vm79_vm0, %v3616_v1  ;;  %83 = vst.msk [vmem:[#allocation2 + $0x18] sm:$0xff] %vm79_vm0, %v3616_v1  ;;  %v135_v5 = vpack.c.bf16 %v127_v3, %v125_v2  ;;  %v126_v6 = vld [vmem:[#allocation8 + $0x70] sm:$0xff]  ;;  %v121_v7 = vld [vmem:[#allocation8 + $0x48] sm:$0xff]  ;;  %v3617_v43 = vmov 1   ;;  %v3618_v52 = vmov 5  }
  0x36   :  { %84 = vst.msk [vmem:[#allocation2 + $0x20] sm:$0xff] %vm79_vm0, %v3616_v1  ;;  %85 = vst.msk [vmem:[#allocation2 + $0x28] sm:$0xff] %vm79_vm0, %v3616_v1  ;;  %v123_v8 = vld [vmem:[#allocation8 + $0x58] sm:$0xff]  ;;  %v134_v9 = vpack.c.bf16 %v126_v6, %v124_v4  ;;  %v120_v11 = vld [vmem:[#allocation8 + $0x40] sm:$0xff]  ;;  %3168 = vset.pattern.permute.xlu1 %v3617_v43  ;;  %3167 = vset.pattern.permute.xlu0 %v3617_v43  ;;  %v3619_v53 = vmov 2   ;;  %v3620_v59 = vmov 3  }
  0x37   :  { %86 = vst.msk [vmem:[#allocation2 + $0x30] sm:$0xff] %vm79_vm0, %v3616_v1  ;;  %87 = vst.msk [vmem:[#allocation2 + $0x38] sm:$0xff] %vm79_vm0, %v3616_v1  ;;  %v133_v10 = vpack.c.bf16 %v123_v8, %v121_v7  ;;  %v122_v12 = vld [vmem:[#allocation8 + $0x50] sm:$0xff]  ;;  %v117_v13 = vld [vmem:[#allocation8 + $0x28] sm:$0xff]  ;;  %156 = vmatprep.subr.bf16.mxu0 %v135_v5  ;;  %3142 = vmatprep.subr.bf16.mxu1 %v135_v5  ;;  %v3621_v63 = vmov 7   ;;  %v3622_v3 = vmov 4  }
  0x38   :  { %v119_v14 = vld [vmem:[#allocation8 + $0x38] sm:$0xff]  ;;  %157 = vmatpush1.bf16.msra.mxu0 %v134_v9  ;;  %3146 = vmatpush1.bf16.msra.mxu1 %v134_v9  ;;  %v132_v15 = vpack.c.bf16 %v122_v12, %v120_v11  ;;  %v116_v16 = vld [vmem:[#allocation8 + $0x20] sm:$0xff]  ;;  %v118_v18 = vld [vmem:[#allocation8 + $0x30] sm:$0xff]  ;;  %v3623_v4 = vmov 6  }
  0x39   :  { %158 = vmatprep.subr.bf16.mxu0 %v133_v10  ;;  %3143 = vmatprep.subr.bf16.mxu1 %v133_v10  ;;  %v131_v17 = vpack.c.bf16 %v119_v14, %v117_v13  ;;  %v88_v19 = vld [vmem:[#allocation4] sm:$0xff]  ;;  %v89_v20 = vld [vmem:[#allocation4 + $0x8] sm:$0xff]  ;;  %v113_v21 = vld [vmem:[#allocation8 + $0x8] sm:$0xff]  ;;  %v130_v26 = vpack.c.bf16 %v118_v18, %v116_v16 }
  0x3a   :  { %v115_v22 = vld [vmem:[#allocation8 + $0x18] sm:$0xff]  ;;  %94 = vst.msk [vmem:[#allocation2] sm:$0xff] %vm93_vm1, %v88_v19  ;;  %95 = vst.msk [vmem:[#allocation2 + $0x8] sm:$0xff] %vm93_vm1, %v89_v20  ;;  %v90_v24 = vld [vmem:[#allocation4 + $0x10] sm:$0xff] }
  0x3b   :  { %v92_v23 = vld [vmem:[#allocation4 + $0x20] sm:$0x3]  ;;  %v91_v25 = vld [vmem:[#allocation4 + $0x18] sm:$0xff]  ;;  %96 = vst.msk [vmem:[#allocation2 + $0x10] sm:$0xff] %vm93_vm1, %v90_v24  ;;  %v129_v27 = vpack.c.bf16 %v115_v22, %v113_v21  ;;  %v112_v28 = vld [vmem:[#allocation8] sm:$0xff] }
  0x3c   :  { %99 = vst.msk [vmem:[#allocation2 + $0x20] sm:$0x3] %vm98_vm2, %v92_v23  ;;  %159 = vmatpush1.bf16.msra.mxu0 %v132_v15  ;;  %3147 = vmatpush1.bf16.msra.mxu1 %v132_v15  ;;  %v114_v29 = vld [vmem:[#allocation8 + $0x10] sm:$0xff] }
  0x3d   :  { %97 = vst.msk [vmem:[#allocation2 + $0x18] sm:$0xff] %vm93_vm1, %v91_v25  ;;  %160 = vmatprep.subr.bf16.mxu0 %v131_v17  ;;  %3144 = vmatprep.subr.bf16.mxu1 %v131_v17  ;;  %v128_v30 = vpack.c.bf16 %v114_v29, %v112_v28  ;;  %v105_v31 = vld [vmem:[#allocation2 + $0x28] sm:$0xff] }
  0x3e   :  { %v106_v37 = vld [vmem:[#allocation2 + $0x30] sm:$0xff]  ;;  %v107_v38 = vld [vmem:[#allocation2 + $0x38] sm:$0xff] }
  0x3f   :  { %v111_v41 = vpack.c.bf16 %v107_v38, %v106_v37 }
  0x40   :  { %161 = vmatpush1.bf16.msra.mxu0 %v130_v26  ;;  %3148 = vmatpush1.bf16.msra.mxu1 %v130_v26 }
  0x41   :  { %162 = vmatprep.subr.bf16.mxu0 %v129_v27  ;;  %3145 = vmatprep.subr.bf16.mxu1 %v129_v27  ;;  %v100_v32 = vld [vmem:[#allocation2] sm:$0xff]  ;;  %v101_v33 = vld [vmem:[#allocation2 + $0x8] sm:$0xff] }
  0x42   :  { %v108_v35 = vpack.c.bf16 %v101_v33, %v100_v32  ;;  %v102_v39 = vld [vmem:[#allocation2 + $0x10] sm:$0xff] }
  0x43   :  { %v104_v34 = vld [vmem:[#allocation2 + $0x20] sm:$0xff] }
  0x44   :  { %v110_v36 = vpack.c.bf16 %v105_v31, %v104_v34  ;;  %163 = vmatpush1.bf16.msra.mxu0 %v128_v30  ;;  %3149 = vmatpush1.bf16.msra.mxu1 %v128_v30  ;;  %v103_v40 = vld [vmem:[#allocation2 + $0x18] sm:$0xff] }
  0x45   :  { %v109_v42 = vpack.c.bf16 %v103_v40, %v102_v39 }
  0x47   :  { %2876 = vmatmul.mubr.msk.bf16.vlgmr.msra.gmra.mxu0 %vm79_vm0, %v108_v35  ;;  %2878 = vmatmul.mubr.msk.bf16.vlgmr.msra.gmra.mxu1 %vm79_vm0, %v110_v36 }
  0x48   :  { %210 = vmatprep.mubr.bf16.mxu1 %v5159_v0  ;;  %190 = vmatprep.mubr.bf16.mxu0 %v5159_v0 }
  0x4f   :  { %2879 = vmatmul.mubr.msk.bf16.gmra.mxu1 %vm79_vm0, %v111_v41  ;;  %2877 = vmatmul.mubr.msk.bf16.gmra.mxu0 %vm79_vm0, %v109_v42 }
 0x107   :  { %v182_v44 = vpop.f32.mrf.mxu0  ;;  %v202_v45 = vpop.f32.mrf.mxu1 }
 0x109   :  { %v3693_v46 = vpop.f32.mrf.mxu0  ;;  %v3695_v47 = vpop.f32.mrf.mxu1 }
 0x10a   :  { %544 = vperm.xlu1 %3168, %v3695_v47   ;;  %528 = vperm.xlu0 %3167, %v3693_v46  }
 0x10b   :  { %v186_v48 = vpop.f32.mrf.mxu0  ;;  %v206_v49 = vpop.f32.mrf.mxu1 }
 0x10c   :  { %v3716_v62 = vpack.c.bf16 %v206_v49, %v202_v45  ;;  %v3735_v2 = vpack.c.bf16 %v186_v48, %v182_v44 }
 0x10d   :  { %v3699_v50 = vpop.f32.mrf.mxu0  ;;  %v3701_v51 = vpop.f32.mrf.mxu1 }
 0x10e   :  { %3174 = vset.pattern.permute.xlu1 %v3618_v52  ;;  %3169 = vset.pattern.permute.xlu0 %v3619_v53  ;;  %5212 = vst [vmem:[#allocation15_spill] sm:$0xff] %v3716_v62  ;;  %5214 = vst [vmem:[#allocation17_spill] sm:$0xff] %v3735_v2 }
 0x10f   :  { %v212_v54 = vpop.f32.mrf.mxu1  ;;  %1576 = vperm.xlu1 %3174, %v3693_v46   ;;  %790 = vperm.xlu0 %3169, %v3693_v46   ;;  %v192_v55 = vpop.f32.mrf.mxu0 }
 0x111   :  { %v3707_v56 = vpop.f32.mrf.mxu1  ;;  %v3709_v57 = vpop.f32.mrf.mxu0 }
 0x113   :  { %v216_v58 = vpop.f32.mrf.mxu1  ;;  %1592 = vperm.xlu1 %3174, %v3695_v47   ;;  %3170 = vset.pattern.permute.xlu0 %v3620_v59  ;;  %v196_v61 = vpop.f32.mrf.mxu0 }
 0x114   :  { %v3713_v60 = vpack.c.bf16 %v216_v58, %v212_v54  ;;  %1052 = vperm.xlu0 %3170, %v3693_v46   ;;  %v3724_v1 = vpack.c.bf16 %v196_v61, %v192_v55 }
 0x115   :  { %v3802_v5 = vpop.f32.mrf.mxu0  ;;  %v3808_v6 = vpop.f32.mrf.mxu1 }
 0x116   :  { %5211 = vst [vmem:[#allocation14_spill] sm:$0xff] %v3713_v60  ;;  %2998 = vmatprep.subr.bf16.mxu1 %v3713_v60  ;;  %3030 = vmatprep.subr.bf16.mxu0 %v3713_v60  ;;  %5213 = vst [vmem:[#allocation16_spill] sm:$0xff] %v3724_v1 }
 0x117   :  { %2999 = vmatpush3.bf16.msra.mxu1 %v3713_v60  ;;  %3031 = vmatpush3.bf16.msra.mxu0 %v3713_v60 }
 0x118   :  { %3176 = vset.pattern.permute.xlu1 %v3621_v63  ;;  %3000 = vmatprep.subr.bf16.mxu1 %v3716_v62 }
 0x119   :  { %3032 = vmatprep.subr.bf16.mxu0 %v3716_v62  ;;  %2100 = vperm.xlu1 %3176, %v3693_v46  }
 0x11a   :  { %3171 = vset.pattern.permute.xlu0 %v3619_v53 }
 0x11b   :  { %806 = vperm.xlu0 %3171, %v3695_v47   ;;  %3001 = vmatpush3.bf16.msra.mxu1 %v3716_v62 }
 0x11c   :  { %3033 = vmatpush3.bf16.msra.mxu0 %v3716_v62  ;;  %3002 = vmatprep.subr.bf16.mxu1 %v3724_v1 }
 0x11d   :  { %2116 = vperm.xlu1 %3176, %v3695_v47   ;;  %3034 = vmatprep.subr.bf16.mxu0 %v3724_v1 }
 0x11f   :  { %3172 = vset.pattern.permute.xlu0 %v3620_v59  ;;  %3003 = vmatpush3.bf16.msra.mxu1 %v3724_v1 }
 0x120   :  { %1068 = vperm.xlu0 %3172, %v3695_v47   ;;  %3035 = vmatpush3.bf16.msra.mxu0 %v3724_v1 }
 0x121   :  { %3177 = vset.pattern.permute.xlu1 %v5159_v0  ;;  %3004 = vmatprep.subr.bf16.mxu1 %v3735_v2 }
 0x122   :  { %3036 = vmatprep.subr.bf16.mxu0 %v3735_v2  ;;  %284 = vperm.xlu1 %3177, %v3701_v51  }
 0x123   :  { %3005 = vmatpush3.bf16.msra.mxu1 %v3735_v2 }
 0x124   :  { %3173 = vset.pattern.permute.xlu0 %v3622_v3  ;;  %3037 = vmatpush3.bf16.msra.mxu0 %v3735_v2  ;;  %v297_v2 = vlaneseq }
 0x125   :  { %1314 = vperm.xlu0 %3173, %v3693_v46   ;;  %3014 = vmatprep.subr.bf16.mxu1 %v3713_v60 }
 0x126   :  { %3178 = vset.pattern.permute.xlu1 %v3617_v43  ;;  %3062 = vmatprep.subr.bf16.mxu0 %v3713_v60  ;;  %v3971_v60 = vshrl.u32 %v297_v2, 7 }
 0x127   :  { %532 = vperm.xlu1 %3178, %v3699_v50  }
 0x128   :  { %5236 = vst [vmem:[#allocation39_spill] sm:$0xff] %v3971_v60 }
 0x129   :  { %1330 = vperm.xlu0 %3173, %v3695_v47  }
 0x12b   :  { %3183 = vset.pattern.permute.xlu1 %v3620_v59 }
 0x12c   :  { %1072 = vperm.xlu1 %3183, %v3701_v51  }
 0x12d   :  { %3175 = vset.pattern.permute.xlu0 %v3623_v4 }
 0x12e   :  { %1838 = vperm.xlu0 %3175, %v3693_v46  }
 0x130   :  { %3186 = vset.pattern.permute.xlu1 %v3622_v3 }
 0x131   :  { %1334 = vperm.xlu1 %3186, %v3701_v51  }
 0x132   :  { %1854 = vperm.xlu0 %3175, %v3695_v47  }
 0x135   :  { %3187 = vset.pattern.permute.xlu1 %v3623_v4 }
 0x136   :  { %3179 = vset.pattern.permute.xlu0 %v3617_v43  ;;  %1842 = vperm.xlu1 %3187, %v3699_v50  }
 0x137   :  { %548 = vperm.xlu0 %3179, %v3701_v51  }
 0x13a   :  { %1858 = vperm.xlu1 %3187, %v3701_v51  }
 0x13b   :  { %3180 = vset.pattern.permute.xlu0 %v3619_v53 }
 0x13c   :  { %794 = vperm.xlu0 %3180, %v3699_v50  }
 0x13e   :  { %3189 = vset.pattern.permute.xlu1 %v5159_v0 }
 0x13f   :  { %269 = vperm.xlu1 %3189, %v3709_v57  }
 0x140   :  { %3181 = vset.pattern.permute.xlu0 %v3620_v59 }
 0x141   :  { %1056 = vperm.xlu0 %3181, %v3699_v50  }
 0x143   :  { %3190 = vset.pattern.permute.xlu1 %v3617_v43 }
 0x144   :  { %536 = vperm.xlu1 %3190, %v3709_v57  }
 0x145   :  { %3182 = vset.pattern.permute.xlu0 %v3619_v53 }
 0x146   :  { %810 = vperm.xlu0 %3182, %v3701_v51  }
 0x148   :  { %552 = vperm.xlu1 %3190, %v3707_v56  }
 0x14a   :  { %3184 = vset.pattern.permute.xlu0 %v3622_v3 }
 0x14b   :  { %1318 = vperm.xlu0 %3184, %v3699_v50  }
 0x14c   :  { %3196 = vset.pattern.permute.xlu1 %v3618_v52 }
 0x14d   :  { %1584 = vperm.xlu1 %3196, %v3709_v57  }
 0x14f   :  { %3185 = vset.pattern.permute.xlu0 %v3618_v52 }
 0x150   :  { %1580 = vperm.xlu0 %3185, %v3699_v50  }
 0x151   :  { %3197 = vset.pattern.permute.xlu1 %v3622_v3 }
 0x152   :  { %1338 = vperm.xlu1 %3197, %v3707_v56  }
 0x154   :  { %1596 = vperm.xlu0 %3185, %v3701_v51  }
 0x156   :  { %3198 = vset.pattern.permute.xlu1 %v3618_v52 }
 0x157   :  { %1600 = vperm.xlu1 %3198, %v3707_v56  }
 0x158   :  { %3188 = vset.pattern.permute.xlu0 %v3621_v63 }
 0x159   :  { %2104 = vperm.xlu0 %3188, %v3699_v50  }
 0x15b   :  { %3199 = vset.pattern.permute.xlu1 %v3623_v4 }
 0x15c   :  { %1846 = vperm.xlu1 %3199, %v3709_v57  }
 0x15d   :  { %3191 = vset.pattern.permute.xlu0 %v3619_v53 }
 0x15e   :  { %798 = vperm.xlu0 %3191, %v3709_v57  }
 0x160   :  { %3200 = vset.pattern.permute.xlu1 %v3621_v63 }
 0x161   :  { %2108 = vperm.xlu1 %3200, %v3709_v57  }
 0x162   :  { %3192 = vset.pattern.permute.xlu0 %v3620_v59 }
 0x163   :  { %1060 = vperm.xlu0 %3192, %v3709_v57  }
 0x165   :  { %3201 = vset.pattern.permute.xlu1 %v3623_v4 }
 0x166   :  { %1862 = vperm.xlu1 %3201, %v3707_v56  }
 0x167   :  { %3193 = vset.pattern.permute.xlu0 %v3619_v53 }
 0x168   :  { %814 = vperm.xlu0 %3193, %v3707_v56  }
 0x16a   :  { %3202 = vset.pattern.permute.xlu1 %v5159_v0 }
 0x16b   :  { %274 = vperm.xlu1 %3202, %v3802_v5  }
 0x16c   :  { %3194 = vset.pattern.permute.xlu0 %v3620_v59 }
 0x16d   :  { %1076 = vperm.xlu0 %3194, %v3707_v56  }
 0x16f   :  { %294 = vperm.xlu1 %3202, %v3808_v6  }
 0x171   :  { %3195 = vset.pattern.permute.xlu0 %v3622_v3 }
 0x172   :  { %1322 = vperm.xlu0 %3195, %v3709_v57  }
 0x173   :  { %3209 = vset.pattern.permute.xlu1 %v3618_v52 }
 0x174   :  { %1588 = vperm.xlu1 %3209, %v3802_v5  }
 0x176   :  { %3203 = vset.pattern.permute.xlu0 %v3617_v43 }
 0x177   :  { %540 = vperm.xlu0 %3203, %v3802_v5  }
 0x178   :  { %1604 = vperm.xlu1 %3209, %v3808_v6  }
 0x17b   :  { %556 = vperm.xlu0 %3203, %v3808_v6  }
 0x17c   :  { %3213 = vset.pattern.permute.xlu1 %v3621_v63 }
 0x17d   :  { %2124 = vperm.xlu1 %3213, %v3707_v56  }
 0x17f   :  { %3204 = vset.pattern.permute.xlu0 %v3619_v53 }
 0x180   :  { %802 = vperm.xlu0 %3204, %v3802_v5  }
 0x181   :  { %2112 = vperm.xlu1 %3213, %v3802_v5  }
 0x184   :  { %3205 = vset.pattern.permute.xlu0 %v3620_v59 }
 0x185   :  { %1064 = vperm.xlu0 %3205, %v3802_v5   ;;  %3214 = vset.pattern.permute.xlu1 %v3623_v4  ;;  %v3827_v7 = vpop.permute.xlu0 %528  ;;  %v3831_v8 = vpop.permute.xlu1 %544 }
 0x186   :  { %1866 = vperm.xlu1 %3214, %v3808_v6  }
 0x189   :  { %3206 = vset.pattern.permute.xlu0 %v3619_v53 }
 0x18a   :  { %818 = vperm.xlu0 %3206, %v3808_v6   ;;  %3215 = vset.pattern.permute.xlu1 %v3621_v63  ;;  %v3835_v9 = vpop.permute.xlu0 %790  ;;  %v3840_v10 = vpop.permute.xlu1 %1576 }
 0x18b   :  { %2128 = vperm.xlu1 %3215, %v3808_v6  }
 0x18e   :  { %3207 = vset.pattern.permute.xlu0 %v3620_v59  ;;  %v3846_v12 = vpop.permute.xlu1 %1592 }
 0x18f   :  { %1080 = vperm.xlu0 %3207, %v3808_v6   ;;  %v3842_v11 = vpop.permute.xlu0 %1052  ;;  %5215 = vst [vmem:[#allocation18_spill] sm:$0xff] %v3846_v12 }
 0x193   :  { %3208 = vset.pattern.permute.xlu0 %v3622_v3 }
 0x194   :  { %1326 = vperm.xlu0 %3208, %v3802_v5   ;;  %v3853_v15 = vpop.permute.xlu1 %2100 }
 0x195   :  { %5216 = vst [vmem:[#allocation19_spill] sm:$0xff] %v3853_v15 }
 0x196   :  { %v3848_v13 = vpop.permute.xlu0 %806 }
 0x198   :  { %1342 = vperm.xlu0 %3208, %v3808_v6   ;;  %v3860_v17 = vpop.permute.xlu1 %2116 }
 0x199   :  { %5217 = vst [vmem:[#allocation20_spill] sm:$0xff] %v3860_v17 }
 0x19b   :  { %v3851_v14 = vpop.permute.xlu0 %1068 }
 0x19c   :  { %3210 = vset.pattern.permute.xlu0 %v3623_v4 }
 0x19d   :  { %1850 = vperm.xlu0 %3210, %v3802_v5   ;;  %v3867_v19 = vpop.permute.xlu1 %284 }
 0x1a0   :  { %v3857_v16 = vpop.permute.xlu0 %1314 }
 0x1a1   :  { %3211 = vset.pattern.permute.xlu0 %v3621_v63 }
 0x1a2   :  { %2120 = vperm.xlu0 %3211, %v3701_v51   ;;  %v3874_v22 = vpop.permute.xlu1 %532 }
 0x1a4   :  { %v3863_v18 = vpop.permute.xlu0 %1330 }
 0x1a5   :  { %5218 = vst [vmem:[#allocation21_spill] sm:$0xff] %v3863_v18  ;;  %v823_v18 = vsub.s32 2, %v3971_v60 }
 0x1a6   :  { %3212 = vset.pattern.permute.xlu0 %v5159_v0 }
 0x1a7   :  { %259 = vperm.xlu0 %3212, %v3693_v46   ;;  %v3880_v24 = vpop.permute.xlu1 %1072 }
 0x1a9   :  { %v3869_v20 = vpop.permute.xlu0 %1838 }
 0x1aa   :  { %5219 = vst [vmem:[#allocation22_spill] sm:$0xff] %v3869_v20  ;;  %v3987_v20 = vld [vmem:[#allocation6 + $0x8] sm:$0xff] }
 0x1ab   :  { %264 = vperm.xlu0 %3212, %v3699_v50  }
 0x1ac   :  { %v3886_v26 = vpop.permute.xlu1 %1334 }
 0x1ad   :  { %v3872_v21 = vpop.permute.xlu0 %1854 }
 0x1ae   :  { %5220 = vst [vmem:[#allocation23_spill] sm:$0xff] %v3872_v21  ;;  %v299_v21 = vsub.s32 0, %v3971_v60 }
 0x1af   :  { %279 = vperm.xlu0 %3212, %v3695_v47  }
 0x1b1   :  { %v3891_v28 = vpop.permute.xlu1 %1842 }
 0x1b2   :  { %v3877_v23 = vpop.permute.xlu0 %548  ;;  %5221 = vst [vmem:[#allocation24_spill] sm:$0xff] %v3891_v28 }
 0x1b3   :  { %289 = vperm.xlu0 %3212, %v3707_v56  }
 0x1b4   :  { %225 = vxpose.xlu1.b32.start [1/8] (short) (narrow) %v3693_v46, 16 }
 0x1b5   :  { %v3897_v30 = vpop.permute.xlu1 %1858 }
 0x1b6   :  { %5222 = vst [vmem:[#allocation25_spill] sm:$0xff] %v3897_v30  ;;  %v3985_v30 = vld [vmem:[#allocation6] sm:$0xff] }
 0x1b7   :  { %v3883_v25 = vpop.permute.xlu0 %794 }
 0x1b8   :  { %226 = vxpose.xlu1.b32.cont [2/8] (short) (narrow) %v3699_v50, 16 }
 0x1ba   :  { %v270_v33 = vpop.permute.xlu1 %269 }
 0x1bc   :  { %v3888_v27 = vpop.permute.xlu0 %1056  ;;  %227 = vxpose.xlu1.b32.cont [3/8] (short) (narrow) %v3709_v57, 16 }
 0x1bf   :  { %v3908_v35 = vpop.permute.xlu1 %536 }
 0x1c0   :  { %228 = vxpose.xlu1.b32.cont [4/8] (short) (narrow) %v3802_v5, 16 }
 0x1c1   :  { %v3894_v29 = vpop.permute.xlu0 %810 }
 0x1c3   :  { %v3912_v37 = vpop.permute.xlu1 %552 }
 0x1c4   :  { %229 = vxpose.xlu1.b32.cont [5/8] (short) (narrow) %v3695_v47, 16 }
 0x1c6   :  { %v3899_v31 = vpop.permute.xlu0 %1318 }
 0x1c8   :  { %230 = vxpose.xlu1.b32.cont [6/8] (short) (narrow) %v3701_v51, 16  ;;  %v3916_v39 = vpop.permute.xlu1 %1584 }
 0x1cb   :  { %v3902_v32 = vpop.permute.xlu0 %1580 }
 0x1cc   :  { %231 = vxpose.xlu1.b32.cont [7/8] (short) (narrow) %v3707_v56, 16 }
 0x1cd   :  { %v3922_v42 = vpop.permute.xlu1 %1338 }
 0x1ce   :  { %5224 = vst [vmem:[#allocation27_spill] sm:$0xff] %v3922_v42 }
 0x1cf   :  { %v3905_v34 = vpop.permute.xlu0 %1596 }
 0x1d0   :  { %232 = vxpose.xlu1.b32.end [8/8] (short) (narrow) %v3808_v6, 16 }
 0x1d2   :  { %v3926_v44 = vpop.permute.xlu1 %1600 }
 0x1d3   :  { %5225 = vst [vmem:[#allocation28_spill] sm:$0xff] %v3926_v44 }
 0x1d4   :  { %v3910_v36 = vpop.permute.xlu0 %2104 }
 0x1d5   :  { %5223 = vst [vmem:[#allocation26_spill] sm:$0xff] %v3910_v36 }
 0x1d7   :  { %v3931_v46 = vpop.permute.xlu1 %1846 }
 0x1d8   :  { %5226 = vst [vmem:[#allocation29_spill] sm:$0xff] %v3931_v46 }
 0x1d9   :  { %v3914_v38 = vpop.permute.xlu0 %798 }
 0x1dc   :  { %v3935_v48 = vpop.permute.xlu1 %2108 }
 0x1dd   :  { %5227 = vst [vmem:[#allocation30_spill] sm:$0xff] %v3935_v48  ;;  %v5169_v48 = vsub.s32 1, %v3971_v60 }
 0x1de   :  { %v3918_v40 = vpop.permute.xlu0 %1060 }
 0x1e1   :  { %v3941_v51 = vpop.permute.xlu1 %1862 }
 0x1e2   :  { %5228 = vst [vmem:[#allocation31_spill] sm:$0xff] %v3941_v51 }
 0x1e3   :  { %v3920_v41 = vpop.permute.xlu0 %814 }
 0x1e6   :  { %v275_v53 = vpop.permute.xlu1 %274 }
 0x1e8   :  { %v3924_v43 = vpop.permute.xlu0 %1076 }
 0x1ea   :  { %v3947_v55 = vpop.permute.xlu1 %294 }
 0x1ed   :  { %v3928_v45 = vpop.permute.xlu0 %1322 }
 0x1ee   :  { %3216 = vset.pattern.permute.xlu1 %v5159_v0 }
 0x1ef   :  { %v3951_v57 = vpop.permute.xlu1 %1588 }
 0x1f2   :  { %v3933_v47 = vpop.permute.xlu0 %540 }
 0x1f3   :  { %v3957_v61 = vpop.permute.xlu1 %1604 }
 0x1f4   :  { %5229 = vst [vmem:[#allocation32_spill] sm:$0xff] %v3957_v61 }
 0x1f6   :  { %v3937_v49 = vpop.permute.xlu0 %556 }
 0x1f8   :  { %v3961_v3 = vpop.permute.xlu1 %2124 }
 0x1f9   :  { %5231 = vst [vmem:[#allocation34_spill] sm:$0xff] %v3961_v3 }
 0x1fb   :  { %v3939_v50 = vpop.permute.xlu0 %802 }
 0x1fc   :  { %v3965_v5 = vpop.permute.xlu1 %2112 }
 0x1fd   :  { %5233 = vst [vmem:[#allocation36_spill] sm:$0xff] %v3965_v5 }
 0x200   :  { %v3943_v52 = vpop.permute.xlu0 %1064 }
 0x201   :  { %v3967_v0 = vpop.permute.xlu1 %1866 }
 0x202   :  { %5234 = vst [vmem:[#allocation37_spill] sm:$0xff] %v3967_v0 }
 0x205   :  { %v3945_v54 = vpop.permute.xlu0 %818 }
 0x206   :  { %v3969_v62 = vpop.permute.xlu1 %2128 }
 0x207   :  { %5235 = vst [vmem:[#allocation38_spill] sm:$0xff] %v3969_v62 }
 0x20a   :  { %v3949_v56 = vpop.permute.xlu0 %1080 }
 0x20f   :  { %v3953_v58 = vpop.permute.xlu0 %1326 }
 0x213   :  { %v3955_v59 = vpop.permute.xlu0 %1342 }
 0x218   :  { %v3959_v63 = vpop.permute.xlu0 %1850 }
 0x219   :  { %5230 = vst [vmem:[#allocation33_spill] sm:$0xff] %v3959_v63 }
 0x21d   :  { %v3963_v4 = vpop.permute.xlu0 %2120 }
 0x21e   :  { %5232 = vst [vmem:[#allocation35_spill] sm:$0xff] %v3963_v4 }
 0x222   :  { %v260_v6 = vpop.permute.xlu0 %259 }
 0x226   :  { %v265_v1 = vpop.permute.xlu0 %264 }
 0x22a   :  { %v280_v51 = vpop.permute.xlu0 %279 }
 0x22e   :  { %v290_v0 = vpop.permute.xlu0 %289 }
 0x230   :  { %v241_v17 = vpop.trf.xlu1 }
 0x234   :  { %v3975_v3 = vpop.trf.xlu1 }
 0x235   :  { %v300_v4 = vrot.slane %v3975_v3, %v299_v21  ;;  %v3981_v15 = vrot.slane %v3975_v3, %v5169_v48 }
 0x237   :  { %v563_v2 = vadd.f32 %v3981_v15, %v3827_v7  ;;  %v301_v62 = vadd.f32 %v300_v4, %v260_v6  ;;  %v302_v17 = vadd.f32 %v300_v4, %v265_v1  ;;  %v305_v46 = vadd.f32 %v300_v4, %v280_v51  ;;  %v3990_v51 = vld [vmem:[#allocation6 + $0x20] sm:$0xff] }
 0x238   :  { %v306_v5 = vadd.f32 %v300_v4, %v3867_v19  ;;  %v303_v44 = vadd.f32 %v300_v4, %v270_v33  ;;  %v307_v21 = vadd.f32 %v300_v4, %v290_v0  ;;  %v304_v36 = vadd.f32 %v300_v4, %v275_v53  ;;  %v3998_v53 = vld [vmem:[#allocation6 + $0x28] sm:$0xff] }
 0x239   :  { %vm571_vm3 = vcmp.ge.f32.partialorder %v563_v2, 0.0  ;;  %v579_v12 = vmul.f32 0.2, %v563_v2  ;;  %vm309_vm4 = vcmp.ge.f32.partialorder %v301_v62, 0.0  ;;  %v317_v48 = vmul.f32 0.2, %v301_v62 }
 0x23a   :  { %vm310_vm5 = vcmp.ge.f32.partialorder %v302_v17, 0.0  ;;  %v318_v63 = vmul.f32 0.2, %v302_v17  ;;  %vm313_vm6 = vcmp.ge.f32.partialorder %v305_v46, 0.0  ;;  %v321_v7 = vmul.f32 0.2, %v305_v46 }
 0x23b   :  { %v587_v6 = vsel %vm571_vm3, %v563_v2, %v579_v12  ;;  %v325_v1 = vsel %vm309_vm4, %v301_v62, %v317_v48  ;;  %vm314_vm7 = vcmp.ge.f32.partialorder %v306_v5, 0.0  ;;  %v322_v42 = vmul.f32 0.2, %v306_v5 }
 0x23c   :  { %v3993_v28 = vadd.f32 %v3985_v30, %v587_v6  ;;  %v3996_v0 = vadd.f32 %v3985_v30, %v325_v1  ;;  %v326_v19 = vsel %vm310_vm5, %v302_v17, %v318_v63  ;;  %v329_v33 = vsel %vm313_vm6, %v305_v46, %v321_v7  ;;  %v4011_v46 = vld [vmem:[#allocation6 + $0x10] sm:$0xff] }
 0x23d   :  { %v4002_v61 = vadd.f32 %v3987_v20, %v326_v19  ;;  %v330_v62 = vsel %vm314_vm7, %v306_v5, %v322_v42  ;;  %vm311_vm8 = vcmp.ge.f32.partialorder %v303_v44, 0.0  ;;  %v4009_v2 = vadd.f32 %v3990_v51, %v329_v33 }
 0x23e   :  { %5237 = vst [vmem:[#allocation40_spill] sm:$0xff] %v3993_v28  ;;  %5238 = vst [vmem:[#allocation41_spill] sm:$0xff] %v3996_v0  ;;  %v611_v12 = vsel %vm79_vm0, %v3993_v28, -inf  ;;  %v349_v48 = vsel %vm79_vm0, %v3996_v0, -inf  ;;  %v319_v63 = vmul.f32 0.2, %v303_v44  ;;  %v4015_v7 = vadd.f32 %v3998_v53, %v330_v62 }
 0x23f   :  { %5239 = vst [vmem:[#allocation42_spill] sm:$0xff] %v4002_v61  ;;  %v1085_v17 = vsub.s32 3, %v3971_v60  ;;  %612 = vmax.xlane.f32.xlu1 %v611_v12  ;;  %350 = vmax.xlane.f32.xlu0 %v349_v48  ;;  %vm315_vm9 = vcmp.ge.f32.partialorder %v307_v21, 0.0  ;;  %v323_v42 = vmul.f32 0.2, %v307_v21  ;;  %v352_v5 = vsel %vm79_vm0, %v4002_v61, -inf }
 0x240   :  { %v327_v6 = vsel %vm311_vm8, %v303_v44, %v319_v63  ;;  %vm312_vm10 = vcmp.ge.f32.partialorder %v304_v36, 0.0  ;;  %v320_v1 = vmul.f32 0.2, %v304_v36  ;;  %v4022_v28 = vld [vmem:[#allocation6 + $0x30] sm:$0xff]  ;;  %v4024_v0 = vld [vmem:[#allocation6 + $0x18] sm:$0xff]  ;;  %v565_v62 = vadd.f32 %v3981_v15, %v3908_v35 }
 0x241   :  { %v4020_v19 = vadd.f32 %v4011_v46, %v327_v6  ;;  %v331_v33 = vsel %vm315_vm9, %v307_v21, %v323_v42  ;;  %v308_v12 = vadd.f32 %v300_v4, %v3947_v55  ;;  %v361_v48 = vsel %vm79_vm0, %v4009_v2, -inf  ;;  %v4048_v6 = vld [vmem:[#allocation6 + $0x38] sm:$0xff] }
 0x242   :  { %v328_v61 = vsel %vm312_vm10, %v304_v36, %v320_v1  ;;  %v567_v44 = vadd.f32 %v3981_v15, %v3831_v8  ;;  %v564_v63 = vadd.f32 %v3981_v15, %v3874_v22  ;;  %v4036_v21 = vrot.slane %v3975_v3, %v823_v18 }
 0x243   :  { %353 = vmax.xlane.f32.xlu1 %v352_v5  ;;  %362 = vmax.xlane.f32.xlu0 %v361_v48  ;;  %v364_v35 = vsel %vm79_vm0, %v4015_v7, -inf  ;;  %vm573_vm11 = vcmp.ge.f32.partialorder %v565_v62, 0.0  ;;  %v581_v55 = vmul.f32 0.2, %v565_v62  ;;  %v4041_v4 = vadd.f32 %v4022_v28, %v331_v33 }
 0x244   :  { %v4044_v36 = vadd.f32 %v4024_v0, %v328_v61  ;;  %vm316_vm12 = vcmp.ge.f32.partialorder %v308_v12, 0.0  ;;  %v324_v8 = vmul.f32 0.2, %v308_v12  ;;  %v355_v22 = vsel %vm79_vm0, %v4020_v19, -inf }
 0x245   :  { %5240 = vst [vmem:[#allocation43_spill] sm:$0xff] %v4041_v4  ;;  %v589_v18 = vsel %vm573_vm11, %v565_v62, %v581_v55  ;;  %vm575_vm13 = vcmp.ge.f32.partialorder %v567_v44, 0.0  ;;  %v583_v42 = vmul.f32 0.2, %v567_v44  ;;  %vm572_vm14 = vcmp.ge.f32.partialorder %v564_v63, 0.0 }
 0x246   :  { %v332_v5 = vsel %vm316_vm12, %v308_v12, %v324_v8  ;;  %v580_v1 = vmul.f32 0.2, %v564_v63  ;;  %v568_v33 = vadd.f32 %v3981_v15, %v3877_v23  ;;  %v826_v61 = vadd.f32 %v4036_v21, %v3883_v25 }
 0x247   :  { %365 = vmax.xlane.f32.xlu1 %v364_v35  ;;  %356 = vmax.xlane.f32.xlu0 %v355_v22  ;;  %v4055_v48 = vrot.slane %v3975_v3, %v1085_v17  ;;  %v367_v62 = vsel %vm79_vm0, %v4041_v4, -inf  ;;  %v358_v12 = vsel %vm79_vm0, %v4044_v36, -inf  ;;  %v4062_v55 = vadd.f32 %v589_v18, %v4011_v46 }
 0x248   :  { %v4065_v8 = vadd.f32 %v4048_v6, %v332_v5  ;;  %v591_v23 = vsel %vm575_vm13, %v567_v44, %v583_v42  ;;  %v588_v35 = vsel %vm572_vm14, %v564_v63, %v580_v1  ;;  %v584_v22 = vmul.f32 0.2, %v568_v33 }
 0x249   :  { %5241 = vst [vmem:[#allocation44_spill] sm:$0xff] %v4062_v55  ;;  %vm576_vm15 = vcmp.ge.f32.partialorder %v568_v33, 0.0  ;;  %v842_v25 = vmul.f32 0.2, %v826_v61  ;;  %v569_v17 = vadd.f32 %v3981_v15, %v3912_v37  ;;  %v828_v4 = vadd.f32 %v4036_v21, %v3939_v50 }
 0x24a   :  { %vm834_vm1 = vcmp.ge.f32.partialorder %v826_v61, 0.0  ;;  %v617_v18 = vsel %vm79_vm0, %v4062_v55, -inf  ;;  %v4074_v5 = vadd.f32 %v591_v23, %v3990_v51  ;;  %v4077_v44 = vadd.f32 %v588_v35, %v3987_v20 }
 0x24b   :  { %368 = vmax.xlane.f32.xlu1 %v367_v62  ;;  %359 = vmax.xlane.f32.xlu0 %v358_v12  ;;  %v370_v63 = vsel %vm79_vm0, %v4065_v8, -inf  ;;  %v592_v42 = vsel %vm576_vm15, %v568_v33, %v584_v22  ;;  %v585_v37 = vmul.f32 0.2, %v569_v17  ;;  %v566_v50 = vadd.f32 %v3981_v15, %v3933_v47 }
 0x24c   :  { %v850_v1 = vsel %vm834_vm1, %v826_v61, %v842_v25  ;;  %vm577_vm2 = vcmp.ge.f32.partialorder %v569_v17, 0.0  ;;  %v844_v62 = vmul.f32 0.2, %v828_v4  ;;  %v1088_v12 = vadd.f32 %v4055_v48, %v3888_v27 }
 0x24d   :  { %vm836_vm3 = vcmp.ge.f32.partialorder %v828_v4, 0.0  ;;  %v623_v23 = vsel %vm79_vm0, %v4074_v5, -inf  ;;  %v614_v35 = vsel %vm79_vm0, %v4077_v44, -inf  ;;  %v4090_v33 = vadd.f32 %v592_v42, %v3998_v53 }
 0x24e   :  { %v4093_v47 = vadd.f32 %v850_v1, %v3987_v20  ;;  %v593_v61 = vsel %vm577_vm2, %v569_v17, %v585_v37  ;;  %v582_v22 = vmul.f32 0.2, %v566_v50  ;;  %v570_v27 = vadd.f32 %v3981_v15, %v3937_v49 }
 0x24f   :  { %618 = vmax.xlane.f32.xlu1 %v617_v18  ;;  %371 = vmax.xlane.f32.xlu0 %v370_v63  ;;  %v852_v25 = vsel %vm836_vm3, %v828_v4, %v844_v62  ;;  %vm574_vm4 = vcmp.ge.f32.partialorder %v566_v50, 0.0  ;;  %v1104_v18 = vmul.f32 0.2, %v1088_v12  ;;  %v1090_v63 = vadd.f32 %v4055_v48, %v3943_v52 }
 0x250   :  { %vm1096_vm5 = vcmp.ge.f32.partialorder %v1088_v12, 0.0  ;;  %v626_v42 = vsel %vm79_vm0, %v4090_v33, -inf  ;;  %v4102_v1 = vadd.f32 %v593_v61, %v4022_v28  ;;  %v876_v17 = vsel %vm79_vm0, %v4093_v47, -inf }
 0x251   :  { %v4107_v15 = vadd.f32 %v852_v25, %v4024_v0  ;;  %v590_v49 = vsel %vm574_vm4, %v566_v50, %v582_v22  ;;  %v586_v4 = vmul.f32 0.2, %v570_v27  ;;  %v1112_v37 = vsel %vm1096_vm5, %v1088_v12, %v1104_v18 }
 0x252   :  { %5242 = vst [vmem:[#allocation45_spill] sm:$0xff] %v4102_v1  ;;  %vm578_vm6 = vcmp.ge.f32.partialorder %v570_v27, 0.0  ;;  %v1106_v52 = vmul.f32 0.2, %v1090_v63  ;;  %v825_v62 = vadd.f32 %v4036_v21, %v3835_v9  ;;  %vm1098_vm7 = vcmp.ge.f32.partialorder %v1090_v63, 0.0 }
 0x253   :  { %624 = vmax.xlane.f32.xlu1 %v623_v23  ;;  %615 = vmax.xlane.f32.xlu0 %v614_v35  ;;  %v830_v23 = vadd.f32 %v4036_v21, %v3894_v29  ;;  %v629_v35 = vsel %vm79_vm0, %v4102_v1, -inf  ;;  %v882_v61 = vsel %vm79_vm0, %v4107_v15, -inf  ;;  %v4118_v50 = vadd.f32 %v590_v49, %v4024_v0 }
 0x254   :  { %v4121_v12 = vadd.f32 %v1112_v37, %v3987_v20  ;;  %v594_v22 = vsel %vm578_vm6, %v570_v27, %v586_v4  ;;  %v1114_v9 = vsel %vm1098_vm7, %v1090_v63, %v1106_v52  ;;  %v841_v25 = vmul.f32 0.2, %v825_v62 }
 0x255   :  { %v827_v18 = vadd.f32 %v4036_v21, %v3914_v38  ;;  %v832_v29 = vadd.f32 %v4036_v21, %v3945_v54  ;;  %vm833_vm8 = vcmp.ge.f32.partialorder %v825_v62, 0.0  ;;  %vm838_vm9 = vcmp.ge.f32.partialorder %v830_v23, 0.0 }
 0x256   :  { %v620_v49 = vsel %vm79_vm0, %v4118_v50, -inf  ;;  %v1138_v27 = vsel %vm79_vm0, %v4121_v12, -inf  ;;  %v4133_v63 = vadd.f32 %v594_v22, %v4048_v6  ;;  %v4136_v38 = vadd.f32 %v1114_v9, %v4024_v0 }
 0x257   :  { %627 = vmax.xlane.f32.xlu1 %v626_v42  ;;  %877 = vmax.xlane.f32.xlu0 %v876_v17  ;;  %v846_v42 = vmul.f32 0.2, %v830_v23  ;;  %v1347_v17 = vsub.s32 4, %v3971_v60  ;;  %v849_v54 = vsel %vm833_vm8, %v825_v62, %v841_v25  ;;  %vm835_vm10 = vcmp.ge.f32.partialorder %v827_v18, 0.0 }
 0x258   :  { %v843_v4 = vmul.f32 0.2, %v827_v18  ;;  %v848_v37 = vmul.f32 0.2, %v832_v29  ;;  %vm840_vm11 = vcmp.ge.f32.partialorder %v832_v29, 0.0  ;;  %v632_v22 = vsel %vm79_vm0, %v4133_v63, -inf }
 0x259   :  { %v854_v52 = vsel %vm838_vm9, %v830_v23, %v846_v42  ;;  %v1144_v9 = vsel %vm79_vm0, %v4136_v38, -inf  ;;  %v4147_v62 = vadd.f32 %v849_v54, %v3985_v30  ;;  %v1094_v1 = vadd.f32 %v4055_v48, %v3949_v56 }
 0x25a   :  { %v4150_v25 = vadd.f32 %v854_v52, %v3998_v53  ;;  %v851_v23 = vsel %vm835_vm10, %v827_v18, %v843_v4  ;;  %v856_v42 = vsel %vm840_vm11, %v832_v29, %v848_v37  ;;  %v1609_v54 = vsub.s32 5, %v3971_v60 }
 0x25b   :  { %630 = vmax.xlane.f32.xlu1 %v629_v35  ;;  %883 = vmax.xlane.f32.xlu0 %v882_v61  ;;  %v1087_v35 = vadd.f32 %v4055_v48, %v3842_v11  ;;  %v1092_v61 = vadd.f32 %v4055_v48, %v3880_v24  ;;  %v1089_v11 = vadd.f32 %v4055_v48, %v3918_v40  ;;  %v873_v18 = vsel %vm79_vm0, %v4147_v62, -inf }
 0x25c   :  { %v4163_v29 = vadd.f32 %v851_v23, %v4011_v46  ;;  %v4166_v40 = vadd.f32 %v856_v42, %v4048_v6  ;;  %v829_v56 = vadd.f32 %v4036_v21, %v3848_v13  ;;  %vm1102_vm15 = vcmp.ge.f32.partialorder %v1094_v1, 0.0 }
 0x25d   :  { %v1103_v24 = vmul.f32 0.2, %v1087_v35  ;;  %vm1095_vm12 = vcmp.ge.f32.partialorder %v1087_v35, 0.0  ;;  %vm1100_vm13 = vcmp.ge.f32.partialorder %v1092_v61, 0.0  ;;  %vm1097_vm14 = vcmp.ge.f32.partialorder %v1089_v11, 0.0 }
 0x25e   :  { %v1105_v4 = vmul.f32 0.2, %v1089_v11  ;;  %v4175_v23 = vrot.slane %v3975_v3, %v1609_v54  ;;  %v879_v42 = vsel %vm79_vm0, %v4163_v29, -inf  ;;  %v894_v55 = vsel %vm79_vm0, %v4166_v40, -inf }
 0x25f   :  { %621 = vmax.xlane.f32.xlu1 %v620_v49  ;;  %1139 = vmax.xlane.f32.xlu0 %v1138_v27  ;;  %v4155_v49 = vrot.slane %v3975_v3, %v1347_v17  ;;  %v1108_v27 = vmul.f32 0.2, %v1092_v61  ;;  %v888_v17 = vsel %vm79_vm0, %v4150_v25, -inf  ;;  %v1111_v37 = vsel %vm1095_vm12, %v1087_v35, %v1103_v24 }
 0x260   :  { %v4182_v13 = vadd.f32 %v1111_v37, %v3985_v30  ;;  %v845_v24 = vmul.f32 0.2, %v829_v56  ;;  %v831_v54 = vadd.f32 %v4036_v21, %v3920_v41  ;;  %vm837_vm1 = vcmp.ge.f32.partialorder %v829_v56, 0.0 }
 0x261   :  { %v1116_v52 = vsel %vm1100_vm13, %v1092_v61, %v1108_v27  ;;  %v1113_v61 = vsel %vm1097_vm14, %v1089_v11, %v1105_v4  ;;  %v1612_v11 = vadd.f32 %v4175_v23, %v3902_v32  ;;  %v1093_v32 = vadd.f32 %v4055_v48, %v3924_v43 }
 0x262   :  { %v4185_v35 = vadd.f32 %v1116_v52, %v3998_v53  ;;  %v4194_v37 = vadd.f32 %v1113_v61, %v4011_v46  ;;  %vm839_vm3 = vcmp.ge.f32.partialorder %v831_v54, 0.0  ;;  %v1614_v43 = vadd.f32 %v4175_v23, %v3951_v57 }
 0x263   :  { %633 = vmax.xlane.f32.xlu1 %v632_v22  ;;  %1145 = vmax.xlane.f32.xlu0 %v1144_v9  ;;  %v1110_v22 = vmul.f32 0.2, %v1094_v1  ;;  %v1350_v9 = vadd.f32 %v4155_v49, %v3899_v31  ;;  %vm1620_vm6 = vcmp.ge.f32.partialorder %v1612_v11, 0.0  ;;  %vm1101_vm7 = vcmp.ge.f32.partialorder %v1093_v32, 0.0 }
 0x264   :  { %v1150_v41 = vsel %vm79_vm0, %v4185_v35, -inf  ;;  %vm1622_vm8 = vcmp.ge.f32.partialorder %v1614_v43, 0.0 }
 0x265   :  { %v1118_v31 = vsel %vm1102_vm15, %v1094_v1, %v1110_v22  ;;  %v1366_v27 = vmul.f32 0.2, %v1350_v9  ;;  %vm1358_vm2 = vcmp.ge.f32.partialorder %v1350_v9, 0.0  ;;  %v1141_v22 = vsel %vm79_vm0, %v4194_v37, -inf }
 0x266   :  { %v4203_v21 = vadd.f32 %v1118_v31, %v4048_v6 }
 0x267   :  { %874 = vmax.xlane.f32.xlu1 %v873_v18  ;;  %889 = vmax.xlane.f32.xlu0 %v888_v17  ;;  %v1352_v18 = vadd.f32 %v4155_v49, %v3953_v58  ;;  %v1091_v17 = vadd.f32 %v4055_v48, %v3851_v14  ;;  %v853_v58 = vsel %vm837_vm1, %v829_v56, %v845_v24  ;;  %v847_v14 = vmul.f32 0.2, %v831_v54 }
 0x268   :  { %v1374_v1 = vsel %vm1358_vm2, %v1350_v9, %v1366_v27  ;;  %v1156_v61 = vsel %vm79_vm0, %v4203_v21, -inf  ;;  %v4212_v31 = vadd.f32 %v853_v58, %v3990_v51  ;;  %v1109_v27 = vmul.f32 0.2, %v1093_v32 }
 0x269   :  { %v1368_v4 = vmul.f32 0.2, %v1352_v18  ;;  %vm1360_vm4 = vcmp.ge.f32.partialorder %v1352_v18, 0.0  ;;  %v1107_v52 = vmul.f32 0.2, %v1091_v17  ;;  %vm1099_vm5 = vcmp.ge.f32.partialorder %v1091_v17, 0.0 }
 0x26a   :  { %v4215_v56 = vadd.f32 %v1374_v1, %v3987_v20  ;;  %v855_v9 = vsel %vm839_vm3, %v831_v54, %v847_v14  ;;  %v1354_v58 = vadd.f32 %v4155_v49, %v3886_v26  ;;  %v885_v1 = vsel %vm79_vm0, %v4212_v31, -inf }
 0x26b   :  { %880 = vmax.xlane.f32.xlu1 %v879_v42  ;;  %895 = vmax.xlane.f32.xlu0 %v894_v55  ;;  %v1135_v55 = vsel %vm79_vm0, %v4182_v13, -inf  ;;  %v1628_v42 = vmul.f32 0.2, %v1612_v11  ;;  %v1376_v24 = vsel %vm1360_vm4, %v1352_v18, %v1368_v4  ;;  %v1115_v48 = vsel %vm1099_vm5, %v1091_v17, %v1107_v52 }
 0x26c   :  { %v1400_v54 = vsel %vm79_vm0, %v4215_v56, -inf  ;;  %v4228_v18 = vadd.f32 %v855_v9, %v4022_v28  ;;  %v4231_v57 = vadd.f32 %v1376_v24, %v4024_v0  ;;  %v1630_v17 = vmul.f32 0.2, %v1614_v43 }
 0x26d   :  { %v1370_v4 = vmul.f32 0.2, %v1354_v58  ;;  %v1351_v52 = vadd.f32 %v4155_v49, %v3928_v45  ;;  %vm1362_vm10 = vcmp.ge.f32.partialorder %v1354_v58, 0.0  ;;  %v1871_v9 = vsub.s32 6, %v3971_v60 }
 0x26f   :  { %1136 = vmax.xlane.f32.xlu1 %v1135_v55  ;;  %1151 = vmax.xlane.f32.xlu0 %v1150_v41  ;;  %v1349_v55 = vadd.f32 %v4155_v49, %v3857_v16  ;;  %v1636_v41 = vsel %vm1620_vm6, %v1612_v11, %v1628_v42  ;;  %v4234_v16 = vadd.f32 %v1115_v48, %v3990_v51  ;;  %v891_v42 = vsel %vm79_vm0, %v4228_v18, -inf }
 0x270   :  { %v4237_v26 = vadd.f32 %v1636_v41, %v3987_v20  ;;  %v1117_v11 = vsel %vm1101_vm7, %v1093_v32, %v1109_v27  ;;  %v1638_v32 = vsel %vm1622_vm8, %v1614_v43, %v1630_v17  ;;  %v1378_v27 = vsel %vm1362_vm10, %v1354_v58, %v1370_v4 }
 0x271   :  { %v1365_v14 = vmul.f32 0.2, %v1349_v55  ;;  %vm1357_vm9 = vcmp.ge.f32.partialorder %v1349_v55, 0.0  ;;  %v1147_v24 = vsel %vm79_vm0, %v4234_v16, -inf  ;;  %v1367_v41 = vmul.f32 0.2, %v1351_v52 }
 0x272   :  { %v1662_v45 = vsel %vm79_vm0, %v4237_v26, -inf  ;;  %vm1359_vm11 = vcmp.ge.f32.partialorder %v1351_v52, 0.0  ;;  %v1616_v43 = vadd.f32 %v4175_v23, %v3905_v34  ;;  %v4263_v17 = vrot.slane %v3975_v3, %v1871_v9 }
 0x273   :  { %1142 = vmax.xlane.f32.xlu1 %v1141_v22  ;;  %1157 = vmax.xlane.f32.xlu0 %v1156_v61  ;;  %v1356_v22 = vadd.f32 %v4155_v49, %v3955_v59  ;;  %v1406_v61 = vsel %vm79_vm0, %v4231_v57, -inf  ;;  %v4253_v59 = vadd.f32 %v1117_v11, %v4022_v28  ;;  %v1373_v48 = vsel %vm1357_vm9, %v1349_v55, %v1365_v14 }
 0x274   :  { %v4268_v58 = vadd.f32 %v1373_v48, %v3985_v30  ;;  %v1375_v11 = vsel %vm1359_vm11, %v1351_v52, %v1367_v41  ;;  %v1613_v34 = vadd.f32 %v4175_v23, %v3916_v39  ;;  %v1632_v9 = vmul.f32 0.2, %v1616_v43  ;;  %v5248_v41 = vld [vmem:[#allocation21_spill] sm:$0xff] }
 0x275   :  { %vm1364_vm12 = vcmp.ge.f32.partialorder %v1356_v22, 0.0  ;;  %v1153_v55 = vsel %vm79_vm0, %v4253_v59, -inf  ;;  %vm1624_vm14 = vcmp.ge.f32.partialorder %v1616_v43, 0.0  ;;  %v4282_v52 = vadd.f32 %v1375_v11, %v4011_v46 }
 0x276   :  { %5244 = vst [vmem:[#allocation47_spill] sm:$0xff] %v4268_v58  ;;  %vm1621_vm15 = vcmp.ge.f32.partialorder %v1613_v34, 0.0  ;;  %v2133_v11 = vsub.s32 7, %v3971_v60 }
 0x277   :  { %886 = vmax.xlane.f32.xlu1 %v885_v1  ;;  %1401 = vmax.xlane.f32.xlu0 %v1400_v54  ;;  %v1372_v1 = vmul.f32 0.2, %v1356_v22  ;;  %v1611_v54 = vadd.f32 %v4175_v23, %v3840_v10  ;;  %v4271_v10 = vadd.f32 %v1378_v27, %v3998_v53  ;;  %v1629_v27 = vmul.f32 0.2, %v1613_v34 }
 0x279   :  { %5245 = vst [vmem:[#allocation48_spill] sm:$0xff] %v4271_v10  ;;  %v1380_v14 = vsel %vm1364_vm12, %v1356_v22, %v1372_v1  ;;  %v1627_v4 = vmul.f32 0.2, %v1611_v54  ;;  %vm1619_vm13 = vcmp.ge.f32.partialorder %v1611_v54, 0.0  ;;  %v1412_v39 = vsel %vm79_vm0, %v4271_v10, -inf  ;;  %v5251_v10 = vld [vmem:[#allocation33_spill] sm:$0xff] }
 0x27a   :  { %v4285_v22 = vadd.f32 %v1380_v14, %v4048_v6  ;;  %v1353_v1 = vadd.f32 %v4155_v49, %v5248_v41  ;;  %v1403_v14 = vsel %vm79_vm0, %v4282_v52, -inf }
 0x27b   :  { %892 = vmax.xlane.f32.xlu1 %v891_v42  ;;  %1407 = vmax.xlane.f32.xlu0 %v1406_v61  ;;  %v4258_v42 = vadd.f32 %v1638_v32, %v4024_v0  ;;  %v5246_v32 = vld [vmem:[#allocation32_spill] sm:$0xff]  ;;  %v1635_v48 = vsel %vm1619_vm13, %v1611_v54, %v1627_v4 }
 0x27c   :  { %5247 = vst [vmem:[#allocation32_spill] sm:$0xff] %v4282_v52  ;;  %v1418_v54 = vsel %vm79_vm0, %v4285_v22, -inf  ;;  %v4299_v4 = vadd.f32 %v1635_v48, %v3985_v30  ;;  %vm1361_vm2 = vcmp.ge.f32.partialorder %v1353_v1, 0.0  ;;  %v1369_v41 = vmul.f32 0.2, %v1353_v1 }
 0x27d   :  { %5243 = vst [vmem:[#allocation46_spill] sm:$0xff] %v4258_v42  ;;  %v1668_v61 = vsel %vm79_vm0, %v4258_v42, -inf  ;;  %v1876_v52 = vadd.f32 %v4263_v17, %v5251_v10  ;;  %v4309_v42 = vrot.slane %v3975_v3, %v2133_v11 }
 0x27e   :  { %v1659_v48 = vsel %vm79_vm0, %v4299_v4, -inf }
 0x27f   :  { %1148 = vmax.xlane.f32.xlu1 %v1147_v24  ;;  %1663 = vmax.xlane.f32.xlu0 %v1662_v45  ;;  %v1618_v24 = vadd.f32 %v4175_v23, %v5246_v32  ;;  %v1397_v45 = vsel %vm79_vm0, %v4268_v58, -inf  ;;  %v5249_v32 = vld [vmem:[#allocation24_spill] sm:$0xff]  ;;  %v1892_v3 = vmul.f32 0.2, %v1876_v52  ;;  %vm1884_vm5 = vcmp.ge.f32.partialorder %v1876_v52, 0.0 }
 0x280   :  { %v1874_v58 = vadd.f32 %v4263_v17, %v5249_v32 }
 0x281   :  { %vm1626_vm1 = vcmp.ge.f32.partialorder %v1618_v24, 0.0 }
 0x282   :  { %v1890_v60 = vmul.f32 0.2, %v1874_v58  ;;  %vm1882_vm3 = vcmp.ge.f32.partialorder %v1874_v58, 0.0 }
 0x283   :  { %1154 = vmax.xlane.f32.xlu1 %v1153_v55  ;;  %1669 = vmax.xlane.f32.xlu0 %v1668_v61  ;;  %v1640_v55 = vsel %vm1624_vm14, %v1616_v43, %v1632_v9  ;;  %v1634_v61 = vmul.f32 0.2, %v1618_v24  ;;  %v1637_v9 = vsel %vm1621_vm15, %v1613_v34, %v1629_v27  ;;  %v1377_v27 = vsel %vm1361_vm2, %v1353_v1, %v1369_v41  ;;  %v5257_v1 = vld [vmem:[#allocation28_spill] sm:$0xff] }
 0x284   :  { %v4302_v43 = vadd.f32 %v1640_v55, %v3998_v53  ;;  %v1898_v10 = vsel %vm1882_vm3, %v1874_v58, %v1890_v60  ;;  %v1617_v41 = vadd.f32 %v4175_v23, %v5257_v1  ;;  %v5261_v1 = vld [vmem:[#allocation25_spill] sm:$0xff] }
 0x285   :  { %v1642_v32 = vsel %vm1626_vm1, %v1618_v24, %v1634_v61  ;;  %v4316_v24 = vadd.f32 %v1637_v9, %v4011_v46  ;;  %v5254_v61 = vld [vmem:[#allocation18_spill] sm:$0xff]  ;;  %v4326_v9 = vadd.f32 %v1377_v27, %v3990_v51  ;;  %v4333_v58 = vadd.f32 %v1898_v10, %v3987_v20 }
 0x286   :  { %v1674_v34 = vsel %vm79_vm0, %v4302_v43, -inf  ;;  %v1615_v11 = vadd.f32 %v4175_v23, %v5254_v61  ;;  %v5258_v61 = vld [vmem:[#allocation36_spill] sm:$0xff]  ;;  %vm1625_vm8 = vcmp.ge.f32.partialorder %v1617_v41, 0.0 }
 0x287   :  { %1398 = vmax.xlane.f32.xlu1 %v1397_v45  ;;  %1413 = vmax.xlane.f32.xlu0 %v1412_v39  ;;  %v5250_v45 = vld [vmem:[#allocation27_spill] sm:$0xff]  ;;  %5252 = vst [vmem:[#allocation21_spill] sm:$0xff] %v4316_v24  ;;  %v1924_v10 = vsel %vm79_vm0, %v4333_v58, -inf }
 0x288   :  { %v1355_v39 = vadd.f32 %v4155_v49, %v5250_v45  ;;  %v4319_v49 = vadd.f32 %v1642_v32, %v4048_v6  ;;  %v1665_v32 = vsel %vm79_vm0, %v4316_v24, -inf  ;;  %5256 = vst [vmem:[#allocation27_spill] sm:$0xff] %v4333_v58  ;;  %vm1623_vm6 = vcmp.ge.f32.partialorder %v1615_v11, 0.0 }
 0x289   :  { %v1409_v24 = vsel %vm79_vm0, %v4326_v9, -inf }
 0x28a   :  { %5253 = vst [vmem:[#allocation24_spill] sm:$0xff] %v4319_v49  ;;  %v1371_v55 = vmul.f32 0.2, %v1355_v39  ;;  %vm1363_vm4 = vcmp.ge.f32.partialorder %v1355_v39, 0.0  ;;  %v1680_v60 = vsel %vm79_vm0, %v4319_v49, -inf }
 0x28b   :  { %1404 = vmax.xlane.f32.xlu1 %v1403_v14  ;;  %1419 = vmax.xlane.f32.xlu0 %v1418_v54  ;;  %v5255_v14 = vld [vmem:[#allocation26_spill] sm:$0xff] }
 0x28c   :  { %v2136_v54 = vadd.f32 %v4309_v42, %v5255_v14  ;;  %v1379_v45 = vsel %vm1363_vm4, %v1355_v39, %v1371_v55  ;;  %v2138_v14 = vadd.f32 %v4309_v42, %v5258_v61  ;;  %v1878_v61 = vadd.f32 %v4263_v17, %v5261_v1  ;;  %v5264_v1 = vld [vmem:[#allocation37_spill] sm:$0xff] }
 0x28d   :  { %v4344_v49 = vadd.f32 %v1379_v45, %v4022_v28 }
 0x28e   :  { %v2152_v27 = vmul.f32 0.2, %v2136_v54  ;;  %vm2144_vm7 = vcmp.ge.f32.partialorder %v2136_v54, 0.0  ;;  %v2154_v55 = vmul.f32 0.2, %v2138_v14  ;;  %vm2146_vm9 = vcmp.ge.f32.partialorder %v2138_v14, 0.0 }
 0x28f   :  { %1660 = vmax.xlane.f32.xlu1 %v1659_v48  ;;  %1675 = vmax.xlane.f32.xlu0 %v1674_v34  ;;  %v1900_v48 = vsel %vm1884_vm5, %v1876_v52, %v1892_v3  ;;  %v1631_v34 = vmul.f32 0.2, %v1615_v11  ;;  %5259 = vst [vmem:[#allocation33_spill] sm:$0xff] %v4344_v49  ;;  %v1633_v52 = vmul.f32 0.2, %v1617_v41  ;;  %v5260_v3 = vld [vmem:[#allocation22_spill] sm:$0xff] }
 0x290   :  { %v4347_v23 = vadd.f32 %v1900_v48, %v4024_v0  ;;  %v1415_v45 = vsel %vm79_vm0, %v4344_v49, -inf  ;;  %v1880_v49 = vadd.f32 %v4263_v17, %v5264_v1  ;;  %vm1886_vm11 = vcmp.ge.f32.partialorder %v1878_v61, 0.0  ;;  %v5267_v1 = vld [vmem:[#allocation35_spill] sm:$0xff] }
 0x291   :  { %v1639_v39 = vsel %vm1623_vm6, %v1615_v11, %v1631_v34  ;;  %v1641_v34 = vsel %vm1625_vm8, %v1617_v41, %v1633_v52  ;;  %vm780_vm8 = vcmask 261248  }
 0x292   :  { %v1930_v48 = vsel %vm79_vm0, %v4347_v23, -inf  ;;  %v4358_v11 = vadd.f32 %v1639_v39, %v3990_v51  ;;  %v4370_v41 = vadd.f32 %v1641_v34, %v4022_v28  ;;  %v2140_v34 = vadd.f32 %v4309_v42, %v5267_v1 }
 0x293   :  { %1666 = vmax.xlane.f32.xlu1 %v1665_v32  ;;  %1681 = vmax.xlane.f32.xlu0 %v1680_v60  ;;  %v1873_v32 = vadd.f32 %v4263_v17, %v5260_v3  ;;  %v2160_v60 = vsel %vm2144_vm7, %v2136_v54, %v2152_v27  ;;  %v5263_v54 = vld [vmem:[#allocation29_spill] sm:$0xff]  ;;  %v1894_v3 = vmul.f32 0.2, %v1878_v61  ;;  %vm1888_vm13 = vcmp.ge.f32.partialorder %v1880_v49, 0.0 }
 0x294   :  { %v4361_v58 = vadd.f32 %v2160_v60, %v3987_v20  ;;  %v1875_v27 = vadd.f32 %v4263_v17, %v5263_v54  ;;  %v1671_v39 = vsel %vm79_vm0, %v4358_v11, -inf  ;;  %5265 = vst [vmem:[#allocation26_spill] sm:$0xff] %v4370_v41  ;;  %v5266_v60 = vld [vmem:[#allocation19_spill] sm:$0xff]  ;;  %v1896_v54 = vmul.f32 0.2, %v1880_v49 }
 0x295   :  { %vm1881_vm10 = vcmp.ge.f32.partialorder %v1873_v32, 0.0  ;;  %vm2148_vm15 = vcmp.ge.f32.partialorder %v2140_v34, 0.0  ;;  %vm518_vm7 = vcmask 130048  }
 0x296   :  { %5262 = vst [vmem:[#allocation18_spill] sm:$0xff] %v4361_v58  ;;  %vm1883_vm12 = vcmp.ge.f32.partialorder %v1875_v27, 0.0 }
 0x297   :  { %1410 = vmax.xlane.f32.xlu1 %v1409_v24  ;;  %1925 = vmax.xlane.f32.xlu0 %v1924_v10  ;;  %v2162_v24 = vsel %vm2146_vm9, %v2138_v14, %v2154_v55  ;;  %v1889_v10 = vmul.f32 0.2, %v1873_v32  ;;  %v2186_v14 = vsel %vm79_vm0, %v4361_v58, -inf  ;;  %v1891_v55 = vmul.f32 0.2, %v1875_v27 }
 0x298   :  { %v4373_v20 = vadd.f32 %v2162_v24, %v4024_v0  ;;  %v1677_v0 = vsel %vm79_vm0, %v4370_v41, -inf  ;;  %v5270_v41 = vld [vmem:[#allocation38_spill] sm:$0xff]  ;;  %vm1042_vm9 = vcmask 392448  }
 0x299   :  { %v1897_v52 = vsel %vm1881_vm10, %v1873_v32, %v1889_v10  ;;  %v2142_v58 = vadd.f32 %v4309_v42, %v5270_v41  ;;  %v5272_v41 = vld [vmem:[#allocation23_spill] sm:$0xff]  ;;  %vm1304_vm10 = vcmask 523648  }
 0x29a   :  { %v2192_v24 = vsel %vm79_vm0, %v4373_v20, -inf  ;;  %v4386_v32 = vadd.f32 %v1897_v52, %v3985_v30 }
 0x29b   :  { %1416 = vmax.xlane.f32.xlu1 %v1415_v45  ;;  %1931 = vmax.xlane.f32.xlu0 %v1930_v48  ;;  %v2135_v45 = vadd.f32 %v4309_v42, %v5266_v60  ;;  %v1902_v48 = vsel %vm1886_vm11, %v1878_v61, %v1894_v3  ;;  %v1904_v3 = vsel %vm1888_vm13, %v1880_v49, %v1896_v54  ;;  %v5269_v60 = vld [vmem:[#allocation30_spill] sm:$0xff]  ;;  %vm2150_vm2 = vcmp.ge.f32.partialorder %v2142_v58, 0.0 }
 0x29c   :  { %v4389_v10 = vadd.f32 %v1902_v48, %v3998_v53  ;;  %v2137_v1 = vadd.f32 %v4309_v42, %v5269_v60  ;;  %v1921_v52 = vsel %vm79_vm0, %v4386_v32, -inf  ;;  %v1877_v60 = vadd.f32 %v4263_v17, %v5272_v41 }
 0x29d   :  { %vm2143_vm14 = vcmp.ge.f32.partialorder %v2135_v45, 0.0  ;;  %v2151_v61 = vmul.f32 0.2, %v2135_v45  ;;  %vm1566_vm11 = vcmask 654848   ;;  %vm2090_vm13 = vcmask 917248  }
 0x29e   :  { %5268 = vst [vmem:[#allocation28_spill] sm:$0xff] %v4389_v10  ;;  %v1936_v48 = vsel %vm79_vm0, %v4389_v10, -inf  ;;  %vm2145_vm1 = vcmp.ge.f32.partialorder %v2137_v1, 0.0  ;;  %vm1885_vm3 = vcmp.ge.f32.partialorder %v1877_v60, 0.0 }
 0x29f   :  { %1672 = vmax.xlane.f32.xlu1 %v1671_v39  ;;  %2187 = vmax.xlane.f32.xlu0 %v2186_v14  ;;  %v1899_v39 = vsel %vm1883_vm12, %v1875_v27, %v1891_v55  ;;  %v2156_v14 = vmul.f32 0.2, %v2140_v34  ;;  %v4403_v55 = vadd.f32 %v1904_v3, %v4048_v6  ;;  %v2159_v49 = vsel %vm2143_vm14, %v2135_v45, %v2151_v61 }
 0x2a0   :  { %v4400_v27 = vadd.f32 %v1899_v39, %v4011_v46  ;;  %v4412_v3 = vadd.f32 %v2159_v49, %v3985_v30  ;;  %vm1828_vm12 = vcmask 786048   ;;  %vm2352_vm14 = vcmask 1048448  }
 0x2a1   :  { %5271 = vst [vmem:[#allocation36_spill] sm:$0xff] %v4403_v55  ;;  %v2164_v54 = vsel %vm2148_vm15, %v2140_v34, %v2156_v14  ;;  %v1942_v39 = vsel %vm79_vm0, %v4403_v55, -inf  ;;  %v1893_v14 = vmul.f32 0.2, %v1877_v60 }
 0x2a2   :  { %v1927_v10 = vsel %vm79_vm0, %v4400_v27, -inf  ;;  %v4415_v45 = vadd.f32 %v2164_v54, %v3998_v53  ;;  %v2183_v41 = vsel %vm79_vm0, %v4412_v3, -inf }
 0x2a3   :  { %1678 = vmax.xlane.f32.xlu1 %v1677_v0  ;;  %2193 = vmax.xlane.f32.xlu0 %v2192_v24  ;;  %v2153_v0 = vmul.f32 0.2, %v2137_v1  ;;  %v2158_v24 = vmul.f32 0.2, %v2142_v58 }
 0x2a4   :  { %v2198_v55 = vsel %vm79_vm0, %v4415_v45, -inf }
 0x2a5   :  { %v2161_v34 = vsel %vm2145_vm1, %v2137_v1, %v2153_v0  ;;  %v2166_v61 = vsel %vm2150_vm2, %v2142_v58, %v2158_v24  ;;  %v1901_v58 = vsel %vm1885_vm3, %v1877_v60, %v1893_v14  ;;  %v5274_v1 = vld [vmem:[#allocation20_spill] sm:$0xff] }
 0x2a6   :  { %v4424_v30 = vadd.f32 %v2161_v34, %v4011_v46  ;;  %v4427_v53 = vadd.f32 %v2166_v61, %v4048_v6  ;;  %v4436_v46 = vadd.f32 %v1901_v58, %v3990_v51 }
 0x2a7   :  { %1922 = vmax.xlane.f32.xlu1 %v1921_v52  ;;  %1937 = vmax.xlane.f32.xlu0 %v1936_v48  ;;  %v5273_v52 = vld [vmem:[#allocation31_spill] sm:$0xff] }
 0x2a8   :  { %v1879_v48 = vadd.f32 %v4263_v17, %v5273_v52  ;;  %v2139_v17 = vadd.f32 %v4309_v42, %v5274_v1  ;;  %v2189_v49 = vsel %vm79_vm0, %v4424_v30, -inf  ;;  %v2204_v54 = vsel %vm79_vm0, %v4427_v53, -inf }
 0x2a9   :  { %v1933_v60 = vsel %vm79_vm0, %v4436_v46, -inf }
 0x2aa   :  { %vm1887_vm4 = vcmp.ge.f32.partialorder %v1879_v48, 0.0  ;;  %v2155_v0 = vmul.f32 0.2, %v2139_v17  ;;  %vm2147_vm5 = vcmp.ge.f32.partialorder %v2139_v17, 0.0 }
 0x2ab   :  { %1928 = vmax.xlane.f32.xlu1 %v1927_v10  ;;  %1943 = vmax.xlane.f32.xlu0 %v1942_v39  ;;  %v1895_v10 = vmul.f32 0.2, %v1879_v48 }
 0x2ac   :  { %v2163_v34 = vsel %vm2147_vm5, %v2139_v17, %v2155_v0  ;;  %v5276_v17 = vld [vmem:[#allocation41_spill] sm:$0xff] }
 0x2ad   :  { %v1903_v6 = vsel %vm1887_vm4, %v1879_v48, %v1895_v10  ;;  %v4448_v52 = vadd.f32 %v2163_v34, %v3990_v51  ;;  %v5277_v51 = vld [vmem:[#allocation40_spill] sm:$0xff] }
 0x2ae   :  { %v4443_v39 = vadd.f32 %v1903_v6, %v4022_v28 }
 0x2af   :  { %2184 = vmax.xlane.f32.xlu1 %v2183_v41  ;;  %2199 = vmax.xlane.f32.xlu0 %v2198_v55  ;;  %v5275_v55 = vld [vmem:[#allocation34_spill] sm:$0xff] }
 0x2b0   :  { %v2141_v24 = vadd.f32 %v4309_v42, %v5275_v55  ;;  %v1939_v14 = vsel %vm79_vm0, %v4443_v39, -inf  ;;  %v2195_v42 = vsel %vm79_vm0, %v4448_v52, -inf }
 0x2b2   :  { %v2157_v61 = vmul.f32 0.2, %v2141_v24  ;;  %vm2149_vm6 = vcmp.ge.f32.partialorder %v2141_v24, 0.0 }
 0x2b3   :  { %2190 = vmax.xlane.f32.xlu1 %v2189_v49  ;;  %2205 = vmax.xlane.f32.xlu0 %v2204_v54 }
 0x2b4   :  { %v2165_v48 = vsel %vm2149_vm6, %v2141_v24, %v2157_v61  ;;  %v5278_v24 = vld [vmem:[#allocation42_spill] sm:$0xff] }
 0x2b5   :  { %v4453_v41 = vadd.f32 %v2165_v48, %v4022_v28 }
 0x2b7   :  { %1934 = vmax.xlane.f32.xlu1 %v1933_v60  ;;  %v2201_v58 = vsel %vm79_vm0, %v4453_v41, -inf }
 0x2bb   :  { %1940 = vmax.xlane.f32.xlu1 %v1939_v14 }
 0x2bf   :  { %2196 = vmax.xlane.f32.xlu1 %v2195_v42 }
 0x2c3   :  { %2202 = vmax.xlane.f32.xlu1 %v2201_v58 }
 0x2c8   :  { %v613_v10 = vpop.xlane.xlu1 %612  ;;  %v351_v1 = vpop.xlane.xlu0 %350 }
 0x2c9   :  { %v373_v49 = vsub.f32 %v5276_v17, %v351_v1  ;;  %v635_v6 = vsub.f32 %v5277_v51, %v613_v10 }
 0x2cb   :  { %v381_v54 = vmul.f32 1.442695, %v373_v49  ;;  %v643_v14 = vmul.f32 1.442695, %v635_v6 }
 0x2cc   :  { %v354_v0 = vpop.xlane.xlu1 %353  ;;  %v363_v55 = vpop.xlane.xlu0 %362 }
 0x2cd   :  { %v374_v60 = vsub.f32 %v5278_v24, %v354_v0  ;;  %v377_v34 = vsub.f32 %v4009_v2, %v363_v55  ;;  %3217 = vpow2.f32 %v381_v54 }
 0x2cf   :  { %v383_v28 = vmul.f32 1.442695, %v374_v60  ;;  %v389_v61 = vmul.f32 1.442695, %v377_v34 }
 0x2d0   :  { %v366_v48 = vpop.xlane.xlu1 %365  ;;  %v4461_v42 = vpop.xlane.xlu0 %356 }
 0x2d1   :  { %3219 = vpow2.f32 %v383_v28  ;;  %v378_v58 = vsub.f32 %v4015_v7, %v366_v48 }
 0x2d2   :  { %3221 = vpow2.f32 %v389_v61 }
 0x2d3   :  { %v391_v1 = vmul.f32 1.442695, %v378_v58  ;;  %3223 = vpow2.f32 %v643_v14 }
 0x2d4   :  { %v4464_v10 = vpop.xlane.xlu1 %368  ;;  %v360_v17 = vpop.xlane.xlu0 %359 }
 0x2d5   :  { %3225 = vpow2.f32 %v391_v1 }
 0x2d8   :  { %v4466_v49 = vpop.xlane.xlu1 %618  ;;  %v4468_v2 = vpop.xlane.xlu0 %371 }
 0x2da   :  { %v4470_v54 = vpop.eup %3217 }
 0x2db   :  { %v397_v6 = vsel %vm79_vm0, %v4470_v54, 0.0 }
 0x2dc   :  { %v625_v51 = vpop.xlane.xlu1 %624  ;;  %v616_v0 = vpop.xlane.xlu0 %615  ;;  %398 = vadd.xlane.f32.xlu1 %v397_v6 }
 0x2dd   :  { %v639_v7 = vsub.f32 %v4074_v5, %v625_v51  ;;  %v636_v55 = vsub.f32 %v4077_v44, %v616_v0 }
 0x2de   :  { %v4476_v24 = vpop.eup %3219 }
 0x2df   :  { %v4478_v60 = vpop.eup %3221  ;;  %v651_v34 = vmul.f32 1.442695, %v639_v7  ;;  %v645_v28 = vmul.f32 1.442695, %v636_v55  ;;  %v400_v61 = vsel %vm79_vm0, %v4476_v24, 0.0 }
 0x2e0   :  { %5279 = vst [vmem:[#allocation22_spill] sm:$0xff] %v4478_v60  ;;  %v628_v14 = vpop.xlane.xlu1 %627  ;;  %401 = vadd.xlane.f32.xlu0 %v400_v61  ;;  %v409_v48 = vsel %vm79_vm0, %v4478_v60, 0.0  ;;  %v878_v58 = vpop.xlane.xlu0 %877 }
 0x2e1   :  { %v4484_v1 = vpop.eup %3223  ;;  %3227 = vpow2.f32 %v651_v34  ;;  %v640_v5 = vsub.f32 %v4090_v33, %v628_v14  ;;  %410 = vadd.xlane.f32.xlu1 %v409_v48  ;;  %v898_v44 = vsub.f32 %v4093_v47, %v878_v58 }
 0x2e2   :  { %5280 = vst [vmem:[#allocation25_spill] sm:$0xff] %v4484_v1  ;;  %v4488_v51 = vpop.eup %3225  ;;  %3229 = vpow2.f32 %v645_v28  ;;  %v659_v61 = vsel %vm79_vm0, %v4484_v1, 0.0 }
 0x2e3   :  { %5281 = vst [vmem:[#allocation29_spill] sm:$0xff] %v4488_v51  ;;  %v653_v6 = vmul.f32 1.442695, %v640_v5  ;;  %v412_v0 = vsel %vm79_vm0, %v4488_v51, 0.0  ;;  %v907_v7 = vmul.f32 1.442695, %v898_v44 }
 0x2e4   :  { %v4492_v55 = vpop.xlane.xlu1 %630  ;;  %413 = vadd.xlane.f32.xlu0 %v412_v0  ;;  %v4496_v34 = vpop.xlane.xlu0 %883 }
 0x2e5   :  { %3231 = vpow2.f32 %v653_v6  ;;  %660 = vadd.xlane.f32.xlu1 %v659_v61  ;;  %v376_v6 = vsub.f32 %v4044_v36, %v360_v17  ;;  %v380_v36 = vsub.f32 %v4065_v8, %v4468_v2 }
 0x2e6   :  { %3233 = vpow2.f32 %v907_v7 }
 0x2e7   :  { %v387_v51 = vmul.f32 1.442695, %v376_v6 }
 0x2e8   :  { %v622_v33 = vpop.xlane.xlu1 %621  ;;  %v1140_v47 = vpop.xlane.xlu0 %1139 }
 0x2e9   :  { %v1160_v28 = vsub.f32 %v4121_v12, %v1140_v47 }
 0x2eb   :  { %v1169_v14 = vmul.f32 1.442695, %v1160_v28 }
 0x2ec   :  { %v634_v48 = vpop.xlane.xlu1 %633  ;;  %v4499_v58 = vpop.xlane.xlu0 %1145 }
 0x2ed   :  { %3235 = vpow2.f32 %v1169_v14 }
 0x2ee   :  { %v4501_v5 = vpop.eup %3227 }
 0x2ef   :  { %5282 = vst [vmem:[#allocation37_spill] sm:$0xff] %v4501_v5  ;;  %v4503_v44 = vpop.eup %3229  ;;  %v671_v0 = vsel %vm79_vm0, %v4501_v5, 0.0 }
 0x2f0   :  { %5283 = vst [vmem:[#allocation19_spill] sm:$0xff] %v4503_v44  ;;  %v875_v61 = vpop.xlane.xlu1 %874  ;;  %672 = vadd.xlane.f32.xlu1 %v671_v0  ;;  %v662_v7 = vsel %vm79_vm0, %v4503_v44, 0.0  ;;  %v890_v12 = vpop.xlane.xlu0 %889 }
 0x2f1   :  { %v897_v47 = vsub.f32 %v4147_v62, %v875_v61  ;;  %663 = vadd.xlane.f32.xlu0 %v662_v7  ;;  %v902_v28 = vsub.f32 %v4150_v25, %v890_v12  ;;  %v395_v62 = vmul.f32 1.442695, %v380_v36  ;;  %v638_v25 = vsub.f32 %v4118_v50, %v622_v33 }
 0x2f2   :  { %v4512_v1 = vpop.eup %3231 }
 0x2f3   :  { %v905_v14 = vmul.f32 1.442695, %v897_v47  ;;  %v915_v60 = vmul.f32 1.442695, %v902_v28  ;;  %v674_v5 = vsel %vm79_vm0, %v4512_v1, 0.0  ;;  %v4522_v44 = vpop.eup %3233 }
 0x2f4   :  { %v4518_v17 = vpop.xlane.xlu1 %880  ;;  %v4520_v0 = vpop.xlane.xlu0 %895  ;;  %v924_v6 = vsel %vm79_vm0, %v4522_v44, 0.0  ;;  %v649_v47 = vmul.f32 1.442695, %v638_v25 }
 0x2f5   :  { %3237 = vpow2.f32 %v905_v14  ;;  %675 = vadd.xlane.f32.xlu0 %v674_v5  ;;  %v900_v5 = vsub.f32 %v4107_v15, %v4496_v34 }
 0x2f6   :  { %3239 = vpow2.f32 %v915_v60  ;;  %v642_v60 = vsub.f32 %v4133_v63, %v634_v48 }
 0x2f7   :  { %3241 = vpow2.f32 %v387_v51  ;;  %v911_v15 = vmul.f32 1.442695, %v900_v5 }
 0x2f8   :  { %v1137_v61 = vpop.xlane.xlu1 %1136  ;;  %v4527_v7 = vpop.xlane.xlu0 %1151  ;;  %3243 = vpow2.f32 %v395_v62  ;;  %v657_v28 = vmul.f32 1.442695, %v642_v60  ;;  %v5285_v60 = vld [vmem:[#allocation44_spill] sm:$0xff] }
 0x2f9   :  { %v1159_v8 = vsub.f32 %v4182_v13, %v1137_v61  ;;  %925 = vadd.xlane.f32.xlu0 %v924_v6  ;;  %v375_v13 = vsub.f32 %v4020_v19, %v4461_v42  ;;  %v5284_v61 = vld [vmem:[#allocation43_spill] sm:$0xff]  ;;  %v1162_v42 = vsub.f32 %v4136_v38, %v4499_v58  ;;  %v904_v38 = vsub.f32 %v4166_v40, %v4520_v0 }
 0x2fa   :  { %v4530_v2 = vpop.eup %3235  ;;  %v379_v6 = vsub.f32 %v5284_v61, %v4464_v10 }
 0x2fb   :  { %v1167_v12 = vmul.f32 1.442695, %v1159_v8  ;;  %v1186_v50 = vsel %vm79_vm0, %v4530_v2, 0.0  ;;  %v385_v25 = vmul.f32 1.442695, %v375_v13 }
 0x2fc   :  { %v4533_v51 = vpop.xlane.xlu1 %1142  ;;  %v4537_v33 = vpop.xlane.xlu0 %1157  ;;  %v393_v10 = vmul.f32 1.442695, %v379_v6  ;;  %v1173_v13 = vmul.f32 1.442695, %v1162_v42  ;;  %v919_v0 = vmul.f32 1.442695, %v904_v38  ;;  %v1164_v6 = vsub.f32 %v4185_v35, %v4527_v7 }
 0x2fd   :  { %3245 = vpow2.f32 %v1167_v12  ;;  %1187 = vadd.xlane.f32.xlu0 %v1186_v50  ;;  %v637_v50 = vsub.f32 %v5285_v60, %v4466_v49  ;;  %v5286_v49 = vld [vmem:[#allocation45_spill] sm:$0xff]  ;;  %v1166_v35 = vsub.f32 %v4203_v21, %v4537_v33 }
 0x2fe   :  { %3247 = vpow2.f32 %v649_v47  ;;  %v641_v61 = vsub.f32 %v5286_v49, %v4492_v55 }
 0x2ff   :  { %3249 = vpow2.f32 %v657_v28  ;;  %v1181_v33 = vmul.f32 1.442695, %v1166_v35 }
 0x300   :  { %v887_v14 = vpop.xlane.xlu1 %886  ;;  %v4543_v36 = vpop.xlane.xlu0 %1401  ;;  %v655_v55 = vmul.f32 1.442695, %v641_v61 }
 0x301   :  { %v901_v63 = vsub.f32 %v4212_v31, %v887_v14 }
 0x302   :  { %v4546_v48 = vpop.eup %3237 }
 0x303   :  { %v4548_v62 = vpop.eup %3239  ;;  %v913_v8 = vmul.f32 1.442695, %v901_v63  ;;  %v921_v19 = vsel %vm79_vm0, %v4546_v48, 0.0 }
 0x304   :  { %v4556_v34 = vpop.xlane.xlu1 %892  ;;  %922 = vadd.xlane.f32.xlu1 %v921_v19  ;;  %v936_v31 = vsel %vm79_vm0, %v4548_v62, 0.0  ;;  %v4560_v12 = vpop.xlane.xlu0 %1407 }
 0x305   :  { %v4562_v47 = vpop.eup %3241  ;;  %3251 = vpow2.f32 %v913_v8  ;;  %937 = vadd.xlane.f32.xlu0 %v936_v31  ;;  %v899_v31 = vsub.f32 %v4163_v29, %v4518_v17  ;;  %v1161_v29 = vsub.f32 %v4194_v37, %v4533_v51  ;;  %v903_v51 = vsub.f32 %v4228_v18, %v4556_v34 }
 0x306   :  { %3253 = vpow2.f32 %v385_v25  ;;  %v406_v5 = vsel %vm79_vm0, %v4562_v47, 0.0  ;;  %v4574_v14 = vpop.eup %3243  ;;  %v647_v25 = vmul.f32 1.442695, %v637_v50 }
 0x307   :  { %3255 = vpow2.f32 %v911_v15  ;;  %v418_v19 = vsel %vm79_vm0, %v4574_v14, 0.0  ;;  %v1171_v37 = vmul.f32 1.442695, %v1161_v29  ;;  %v917_v18 = vmul.f32 1.442695, %v903_v51 }
 0x308   :  { %v4568_v58 = vpop.xlane.xlu1 %1148  ;;  %v4572_v28 = vpop.xlane.xlu0 %1663  ;;  %3257 = vpow2.f32 %v393_v10  ;;  %v1177_v10 = vmul.f32 1.442695, %v1164_v6 }
 0x309   :  { %407 = vadd.xlane.f32.xlu0 %v406_v5  ;;  %3259 = vpow2.f32 %v1173_v13  ;;  %v909_v5 = vmul.f32 1.442695, %v899_v31  ;;  %v1163_v34 = vsub.f32 %v4234_v16, %v4568_v58 }
 0x30a   :  { %v4576_v63 = vpop.eup %3245  ;;  %3261 = vpow2.f32 %v647_v25  ;;  %v1422_v25 = vsub.f32 %v4215_v56, %v4543_v36 }
 0x30b   :  { %v1183_v40 = vsel %vm79_vm0, %v4576_v63, 0.0  ;;  %v4590_v42 = vpop.eup %3247  ;;  %3263 = vpow2.f32 %v919_v0  ;;  %v1175_v58 = vmul.f32 1.442695, %v1163_v34 }
 0x30c   :  { %v4584_v8 = vpop.xlane.xlu1 %1154  ;;  %1184 = vadd.xlane.f32.xlu1 %v1183_v40  ;;  %v4588_v15 = vpop.xlane.xlu0 %1669  ;;  %v668_v60 = vsel %vm79_vm0, %v4590_v42, 0.0  ;;  %3265 = vpow2.f32 %v655_v55  ;;  %v1431_v36 = vmul.f32 1.442695, %v1422_v25 }
 0x30d   :  { %419 = vadd.xlane.f32.xlu0 %v418_v19  ;;  %v4602_v13 = vpop.eup %3249  ;;  %3267 = vpow2.f32 %v1177_v10  ;;  %v1424_v19 = vsub.f32 %v4231_v57, %v4560_v12  ;;  %v1165_v25 = vsub.f32 %v4253_v59, %v4584_v8  ;;  %v5288_v8 = vld [vmem:[#allocation47_spill] sm:$0xff] }
 0x30e   :  { %v680_v61 = vsel %vm79_vm0, %v4602_v13, 0.0  ;;  %3269 = vpow2.f32 %v909_v5  ;;  %v1684_v5 = vsub.f32 %v4237_v26, %v4572_v28 }
 0x30f   :  { %3271 = vpow2.f32 %v1181_v33  ;;  %v1435_v12 = vmul.f32 1.442695, %v1424_v19  ;;  %v1179_v59 = vmul.f32 1.442695, %v1165_v25 }
 0x310   :  { %v4596_v7 = vpop.xlane.xlu1 %1398  ;;  %v4600_v50 = vpop.xlane.xlu0 %1413  ;;  %3273 = vpow2.f32 %v1171_v37  ;;  %v1693_v28 = vmul.f32 1.442695, %v1684_v5  ;;  %v5287_v37 = vld [vmem:[#allocation46_spill] sm:$0xff] }
 0x311   :  { %669 = vadd.xlane.f32.xlu0 %v668_v60  ;;  %3275 = vpow2.f32 %v1431_v36  ;;  %v1686_v51 = vsub.f32 %v5287_v37, %v4588_v15 }
 0x312   :  { %v4604_v38 = vpop.eup %3251  ;;  %3277 = vpow2.f32 %v917_v18 }
 0x313   :  { %v933_v21 = vsel %vm79_vm0, %v4604_v38, 0.0  ;;  %v4610_v17 = vpop.eup %3253  ;;  %3279 = vpow2.f32 %v1435_v12  ;;  %v5289_v12 = vld [vmem:[#allocation48_spill] sm:$0xff] }
 0x314   :  { %v4614_v49 = vpop.xlane.xlu1 %1404  ;;  %934 = vadd.xlane.f32.xlu1 %v933_v21  ;;  %v4618_v40 = vpop.xlane.xlu0 %1419  ;;  %v403_v6 = vsel %vm79_vm0, %v4610_v17, 0.0  ;;  %3281 = vpow2.f32 %v1175_v58  ;;  %v1426_v5 = vsub.f32 %v5289_v12, %v4600_v50 }
 0x315   :  { %v4620_v0 = vpop.eup %3255  ;;  %681 = vadd.xlane.f32.xlu0 %v680_v61  ;;  %3283 = vpow2.f32 %v1693_v28 }
 0x316   :  { %v4626_v56 = vpop.eup %3257  ;;  %v930_v31 = vsel %vm79_vm0, %v4620_v0, 0.0  ;;  %3285 = vpow2.f32 %v1179_v59  ;;  %v1439_v50 = vmul.f32 1.442695, %v1426_v5 }
 0x317   :  { %v4636_v35 = vpop.eup %3259  ;;  %v415_v60 = vsel %vm79_vm0, %v4626_v56, 0.0 }
 0x318   :  { %v4630_v55 = vpop.xlane.xlu1 %1660  ;;  %404 = vadd.xlane.f32.xlu1 %v403_v6  ;;  %v4634_v10 = vpop.xlane.xlu0 %1675  ;;  %v1192_v21 = vsel %vm79_vm0, %v4636_v35, 0.0 }
 0x319   :  { %931 = vadd.xlane.f32.xlu0 %v930_v31  ;;  %v4642_v57 = vpop.eup %3261  ;;  %v1421_v31 = vsub.f32 %v5288_v8, %v4596_v7  ;;  %v1683_v12 = vsub.f32 %v4299_v4, %v4630_v55  ;;  %v5291_v55 = vld [vmem:[#allocation21_spill] sm:$0xff] }
 0x31a   :  { %v4650_v33 = vpop.eup %3263  ;;  %v665_v61 = vsel %vm79_vm0, %v4642_v57, 0.0 }
 0x31b   :  { %v4658_v26 = vpop.eup %3265  ;;  %v942_v36 = vsel %vm79_vm0, %v4650_v33, 0.0  ;;  %v1429_v7 = vmul.f32 1.442695, %v1421_v31  ;;  %v1691_v4 = vmul.f32 1.442695, %v1683_v12 }
 0x31c   :  { %v4646_v29 = vpop.xlane.xlu1 %1666  ;;  %416 = vadd.xlane.f32.xlu1 %v415_v60  ;;  %v4652_v16 = vpop.xlane.xlu0 %1681  ;;  %v677_v34 = vsel %vm79_vm0, %v4658_v26, 0.0  ;;  %v1697_v60 = vmul.f32 1.442695, %v1686_v51 }
 0x31d   :  { %1193 = vadd.xlane.f32.xlu0 %v1192_v21  ;;  %v4666_v19 = vpop.eup %3267 }
 0x31e   :  { %v4674_v15 = vpop.eup %3269  ;;  %v1198_v58 = vsel %vm79_vm0, %v4666_v19, 0.0  ;;  %3287 = vpow2.f32 %v1697_v60 }
 0x31f   :  { %v4682_v25 = vpop.eup %3271  ;;  %v927_v28 = vsel %vm79_vm0, %v4674_v15, 0.0  ;;  %3289 = vpow2.f32 %v1429_v7 }
 0x320   :  { %v4662_v6 = vpop.xlane.xlu1 %1410  ;;  %666 = vadd.xlane.f32.xlu1 %v665_v61  ;;  %v4670_v18 = vpop.xlane.xlu0 %1925  ;;  %v5290_v61 = vld [vmem:[#allocation32_spill] sm:$0xff]  ;;  %v1204_v59 = vsel %vm79_vm0, %v4682_v25, 0.0  ;;  %3291 = vpow2.f32 %v1439_v50 }
 0x321   :  { %943 = vadd.xlane.f32.xlu0 %v942_v36  ;;  %v1423_v37 = vsub.f32 %v5290_v61, %v4614_v49  ;;  %v4688_v51 = vpop.eup %3273  ;;  %v1428_v36 = vsub.f32 %v4285_v22, %v4618_v40  ;;  %v1688_v40 = vsub.f32 %v4302_v43, %v4634_v10  ;;  %v5292_v10 = vld [vmem:[#allocation24_spill] sm:$0xff] }
 0x322   :  { %v4696_v31 = vpop.eup %3275  ;;  %v1189_v60 = vsel %vm79_vm0, %v4688_v51, 0.0 }
 0x323   :  { %v1433_v49 = vmul.f32 1.442695, %v1423_v37  ;;  %v4702_v5 = vpop.eup %3277  ;;  %v1443_v22 = vmul.f32 1.442695, %v1428_v36  ;;  %v1448_v7 = vsel %vm79_vm0, %v4696_v31, 0.0  ;;  %v1685_v37 = vsub.f32 %v5291_v55, %v4646_v29  ;;  %v5294_v55 = vld [vmem:[#allocation27_spill] sm:$0xff] }
 0x324   :  { %v4678_v21 = vpop.xlane.xlu1 %1416  ;;  %678 = vadd.xlane.f32.xlu1 %v677_v34  ;;  %v1932_v34 = vpop.xlane.xlu0 %1931  ;;  %v939_v50 = vsel %vm79_vm0, %v4702_v5, 0.0  ;;  %v1701_v43 = vmul.f32 1.442695, %v1688_v40 }
 0x325   :  { %1199 = vadd.xlane.f32.xlu0 %v1198_v58  ;;  %v4710_v61 = vpop.eup %3279  ;;  %3293 = vpow2.f32 %v1433_v49  ;;  %v1695_v29 = vmul.f32 1.442695, %v1685_v37 }
 0x326   :  { %v4716_v36 = vpop.eup %3281  ;;  %3295 = vpow2.f32 %v1443_v22 }
 0x327   :  { %v4722_v49 = vpop.eup %3283  ;;  %3297 = vpow2.f32 %v1691_v4  ;;  %v1195_v22 = vsel %vm79_vm0, %v4716_v36, 0.0 }
 0x328   :  { %v4692_v8 = vpop.xlane.xlu1 %1672  ;;  %928 = vadd.xlane.f32.xlu1 %v927_v28  ;;  %v2188_v28 = vpop.xlane.xlu0 %2187  ;;  %5293 = vst [vmem:[#allocation35_spill] sm:$0xff] %v4722_v49  ;;  %3299 = vpow2.f32 %v1701_v43 }
 0x329   :  { %1205 = vadd.xlane.f32.xlu0 %v1204_v59  ;;  %v1690_v59 = vsub.f32 %v5292_v10, %v4652_v16  ;;  %v4730_v40 = vpop.eup %3285  ;;  %v1710_v10 = vsel %vm79_vm0, %v4722_v49, 0.0  ;;  %3301 = vpow2.f32 %v1695_v29 }
 0x32a   :  { %v1201_v43 = vsel %vm79_vm0, %v4730_v40, 0.0 }
 0x32b   :  { %v1705_v16 = vmul.f32 1.442695, %v1690_v59 }
 0x32c   :  { %v4706_v58 = vpop.xlane.xlu1 %1678  ;;  %1190 = vadd.xlane.f32.xlu1 %v1189_v60  ;;  %v1454_v60 = vsel %vm79_vm0, %v4710_v61, 0.0  ;;  %v2194_v4 = vpop.xlane.xlu0 %2193 }
 0x32d   :  { %1449 = vadd.xlane.f32.xlu0 %v1448_v7  ;;  %v1425_v7 = vsub.f32 %v4326_v9, %v4662_v6  ;;  %v5296_v6 = vld [vmem:[#allocation33_spill] sm:$0xff]  ;;  %3303 = vpow2.f32 %v1705_v16 }
 0x32e   :  { %v1427_v37 = vsub.f32 %v5296_v6, %v4678_v21  ;;  %v1687_v21 = vsub.f32 %v4358_v11, %v4692_v8  ;;  %v5298_v8 = vld [vmem:[#allocation26_spill] sm:$0xff] }
 0x32f   :  { %v1437_v9 = vmul.f32 1.442695, %v1425_v7 }
 0x330   :  { %940 = vadd.xlane.f32.xlu1 %v939_v50  ;;  %v4724_v12 = vpop.xlane.xlu1 %1922  ;;  %v1946_v50 = vsub.f32 %v5294_v55, %v4670_v18  ;;  %v1441_v29 = vmul.f32 1.442695, %v1427_v37  ;;  %v1938_v7 = vpop.xlane.xlu0 %1937  ;;  %v1699_v11 = vmul.f32 1.442695, %v1687_v21  ;;  %v1689_v37 = vsub.f32 %v5298_v8, %v4706_v58 }
 0x331   :  { %1455 = vadd.xlane.f32.xlu0 %v1454_v60  ;;  %v4736_v60 = vpop.eup %3287  ;;  %3305 = vpow2.f32 %v1437_v9  ;;  %v1945_v58 = vsub.f32 %v4386_v32, %v4724_v12 }
 0x332   :  { %5295 = vst [vmem:[#allocation30_spill] sm:$0xff] %v4736_v60  ;;  %v4742_v59 = vpop.eup %3289  ;;  %v1955_v18 = vmul.f32 1.442695, %v1946_v50  ;;  %v1716_v49 = vsel %vm79_vm0, %v4736_v60, 0.0  ;;  %v1703_v21 = vmul.f32 1.442695, %v1689_v37 }
 0x333   :  { %v1445_v16 = vsel %vm79_vm0, %v4742_v59, 0.0 }
 0x334   :  { %1196 = vadd.xlane.f32.xlu1 %v1195_v22  ;;  %v1948_v22 = vsub.f32 %v4347_v23, %v1932_v34  ;;  %v1929_v55 = vpop.xlane.xlu1 %1928  ;;  %3307 = vpow2.f32 %v1955_v18  ;;  %v5297_v34 = vld [vmem:[#allocation18_spill] sm:$0xff] }
 0x335   :  { %1711 = vadd.xlane.f32.xlu0 %v1710_v10  ;;  %v4747_v10 = vpop.eup %3291  ;;  %v2208_v6 = vsub.f32 %v5297_v34, %v2188_v28  ;;  %3309 = vpow2.f32 %v1441_v29  ;;  %v1944_v29 = vpop.xlane.xlu0 %1943  ;;  %v1947_v32 = vsub.f32 %v4400_v27, %v1929_v55 }
 0x336   :  { %v4753_v50 = vpop.eup %3293  ;;  %v1959_v23 = vmul.f32 1.442695, %v1948_v22  ;;  %v2210_v22 = vsub.f32 %v4373_v20, %v2194_v4 }
 0x337   :  { %v1451_v60 = vsel %vm79_vm0, %v4753_v50, 0.0  ;;  %v2217_v28 = vmul.f32 1.442695, %v2208_v6  ;;  %v1957_v27 = vmul.f32 1.442695, %v1947_v32 }
 0x338   :  { %1202 = vadd.xlane.f32.xlu1 %v1201_v43  ;;  %v1460_v43 = vsel %vm79_vm0, %v4747_v10, 0.0  ;;  %v2185_v9 = vpop.xlane.xlu1 %2184  ;;  %3311 = vpow2.f32 %v1959_v23  ;;  %v2221_v20 = vmul.f32 1.442695, %v2210_v22  ;;  %v5301_v22 = vld [vmem:[#allocation36_spill] sm:$0xff] }
 0x339   :  { %1717 = vadd.xlane.f32.xlu0 %v1716_v49  ;;  %v4758_v49 = vpop.eup %3295  ;;  %3313 = vpow2.f32 %v1699_v11  ;;  %v1953_v11 = vmul.f32 1.442695, %v1945_v58  ;;  %v2200_v12 = vpop.xlane.xlu0 %2199  ;;  %v2207_v55 = vsub.f32 %v4412_v3, %v2185_v9 }
 0x33a   :  { %v4764_v18 = vpop.eup %3297  ;;  %3315 = vpow2.f32 %v2217_v28 }
 0x33b   :  { %v4769_v34 = vpop.eup %3299  ;;  %3317 = vpow2.f32 %v1703_v21 }
 0x33c   :  { %1446 = vadd.xlane.f32.xlu1 %v1445_v16  ;;  %v1466_v16 = vsel %vm79_vm0, %v4758_v49, 0.0  ;;  %5299 = vst [vmem:[#allocation38_spill] sm:$0xff] %v4769_v34  ;;  %v4775_v23 = vpop.eup %3301  ;;  %v2191_v6 = vpop.xlane.xlu1 %2190  ;;  %v1722_v8 = vsel %vm79_vm0, %v4769_v34, 0.0  ;;  %3319 = vpow2.f32 %v2221_v20 }
 0x33d   :  { %1461 = vadd.xlane.f32.xlu0 %v1460_v43  ;;  %v1707_v43 = vsel %vm79_vm0, %v4764_v18, 0.0  ;;  %v1713_v37 = vsel %vm79_vm0, %v4775_v23, 0.0  ;;  %3321 = vpow2.f32 %v1953_v11  ;;  %v2215_v11 = vmul.f32 1.442695, %v2207_v55 }
 0x33e   :  { %v2209_v3 = vsub.f32 %v4424_v30, %v2191_v6 }
 0x340   :  { %1452 = vadd.xlane.f32.xlu1 %v1451_v60  ;;  %v5300_v60 = vld [vmem:[#allocation28_spill] sm:$0xff]  ;;  %v1935_v21 = vpop.xlane.xlu1 %1934 }
 0x341   :  { %1467 = vadd.xlane.f32.xlu0 %v1466_v16  ;;  %v1950_v4 = vsub.f32 %v5300_v60, %v1938_v7  ;;  %v4780_v16 = vpop.eup %3303  ;;  %v1949_v30 = vsub.f32 %v4436_v46, %v1935_v21 }
 0x342   :  { %v4785_v28 = vpop.eup %3305  ;;  %v1728_v60 = vsel %vm79_vm0, %v4780_v16, 0.0 }
 0x343   :  { %v1963_v7 = vmul.f32 1.442695, %v1950_v4  ;;  %v4790_v34 = vpop.eup %3307  ;;  %v1457_v58 = vsel %vm79_vm0, %v4785_v28, 0.0 }
 0x344   :  { %1708 = vadd.xlane.f32.xlu1 %v1707_v43  ;;  %v1952_v43 = vsub.f32 %v5301_v22, %v1944_v29  ;;  %v2212_v29 = vsub.f32 %v4415_v45, %v2200_v12  ;;  %v1972_v4 = vsel %vm79_vm0, %v4790_v34, 0.0  ;;  %v2206_v22 = vpop.xlane.xlu0 %2205  ;;  %v1941_v12 = vpop.xlane.xlu1 %1940 }
 0x345   :  { %1723 = vadd.xlane.f32.xlu0 %v1722_v8  ;;  %v4795_v8 = vpop.eup %3309  ;;  %3323 = vpow2.f32 %v1963_v7  ;;  %v2214_v45 = vsub.f32 %v4427_v53, %v2206_v22  ;;  %v1951_v22 = vsub.f32 %v4443_v39, %v1941_v12 }
 0x346   :  { %v1967_v20 = vmul.f32 1.442695, %v1952_v43  ;;  %3325 = vpow2.f32 %v1957_v27  ;;  %v1463_v9 = vsel %vm79_vm0, %v4795_v8, 0.0  ;;  %v2225_v7 = vmul.f32 1.442695, %v2212_v29 }
 0x347   :  { %v2219_v27 = vmul.f32 1.442695, %v2209_v3 }
 0x348   :  { %1714 = vadd.xlane.f32.xlu1 %v1713_v37  ;;  %v4800_v37 = vpop.eup %3311  ;;  %3327 = vpow2.f32 %v1967_v20  ;;  %v2197_v29 = vpop.xlane.xlu1 %2196 }
 0x349   :  { %1729 = vadd.xlane.f32.xlu0 %v1728_v60  ;;  %5302 = vst [vmem:[#allocation23_spill] sm:$0xff] %v4800_v37  ;;  %v4805_v32 = vpop.eup %3313  ;;  %v1978_v43 = vsel %vm79_vm0, %v4800_v37, 0.0  ;;  %3329 = vpow2.f32 %v2215_v11 }
 0x34a   :  { %v4810_v60 = vpop.eup %3315  ;;  %v1719_v6 = vsel %vm79_vm0, %v4805_v32, 0.0  ;;  %3331 = vpow2.f32 %v2225_v7  ;;  %v2211_v7 = vsub.f32 %v4448_v52, %v2197_v29 }
 0x34b   :  { %5303 = vst [vmem:[#allocation31_spill] sm:$0xff] %v4810_v60  ;;  %v4815_v55 = vpop.eup %3317  ;;  %v2234_v53 = vsel %vm79_vm0, %v4810_v60, 0.0  ;;  %3333 = vpow2.f32 %v2219_v27 }
 0x34c   :  { %1458 = vadd.xlane.f32.xlu1 %v1457_v58  ;;  %v2229_v58 = vmul.f32 1.442695, %v2214_v45  ;;  %v4819_v20 = vpop.eup %3319  ;;  %v1725_v46 = vsel %vm79_vm0, %v4815_v55, 0.0  ;;  %v2203_v12 = vpop.xlane.xlu1 %2202 }
 0x34d   :  { %1973 = vadd.xlane.f32.xlu0 %v1972_v4  ;;  %5304 = vst [vmem:[#allocation20_spill] sm:$0xff] %v4819_v20  ;;  %v1961_v4 = vmul.f32 1.442695, %v1949_v30  ;;  %v4824_v21 = vpop.eup %3321  ;;  %v2240_v11 = vsel %vm79_vm0, %v4819_v20, 0.0  ;;  %v2223_v30 = vmul.f32 1.442695, %v2211_v7 }
 0x34e   :  { %3335 = vpow2.f32 %v2229_v58  ;;  %v1969_v39 = vsel %vm79_vm0, %v4824_v21, 0.0 }
 0x34f   :  { %3337 = vpow2.f32 %v1961_v4 }
 0x350   :  { %1464 = vadd.xlane.f32.xlu1 %v1463_v9  ;;  %v1965_v9 = vmul.f32 1.442695, %v1951_v22 }
 0x351   :  { %1979 = vadd.xlane.f32.xlu0 %v1978_v43 }
 0x352   :  { %v4828_v3 = vpop.eup %3323  ;;  %3339 = vpow2.f32 %v1965_v9 }
 0x353   :  { %5305 = vst [vmem:[#allocation34_spill] sm:$0xff] %v4828_v3  ;;  %v4833_v45 = vpop.eup %3325  ;;  %v1984_v43 = vsel %vm79_vm0, %v4828_v3, 0.0  ;;  %3341 = vpow2.f32 %v2223_v30 }
 0x354   :  { %1720 = vadd.xlane.f32.xlu1 %v1719_v6  ;;  %5306 = vst [vmem:[#allocation41_spill] sm:$0xff] %v4833_v45  ;;  %v2213_v6 = vsub.f32 %v4453_v41, %v2203_v12  ;;  %v1975_v52 = vsel %vm79_vm0, %v4833_v45, 0.0 }
 0x355   :  { %2235 = vadd.xlane.f32.xlu0 %v2234_v53  ;;  %v4837_v27 = vpop.eup %3327 }
 0x356   :  { %5307 = vst [vmem:[#allocation40_spill] sm:$0xff] %v4837_v27  ;;  %v4842_v58 = vpop.eup %3329  ;;  %v1990_v53 = vsel %vm79_vm0, %v4837_v27, 0.0  ;;  %v2227_v4 = vmul.f32 1.442695, %v2213_v6 }
 0x357   :  { %5308 = vst [vmem:[#allocation42_spill] sm:$0xff] %v4842_v58  ;;  %v4846_v29 = vpop.eup %3331  ;;  %v2231_v22 = vsel %vm79_vm0, %v4842_v58, 0.0 }
 0x358   :  { %1726 = vadd.xlane.f32.xlu1 %v1725_v46  ;;  %5309 = vst [vmem:[#allocation43_spill] sm:$0xff] %v4846_v29  ;;  %v4850_v46 = vpop.eup %3333  ;;  %v2246_v41 = vsel %vm79_vm0, %v4846_v29, 0.0  ;;  %3343 = vpow2.f32 %v2227_v4 }
 0x359   :  { %2241 = vadd.xlane.f32.xlu0 %v2240_v11  ;;  %5310 = vst [vmem:[#allocation44_spill] sm:$0xff] %v4850_v46  ;;  %v2237_v7 = vsel %vm79_vm0, %v4850_v46, 0.0 }
 0x35b   :  { %v4854_v11 = vpop.eup %3335 }
 0x35c   :  { %1970 = vadd.xlane.f32.xlu1 %v1969_v39  ;;  %5311 = vst [vmem:[#allocation45_spill] sm:$0xff] %v4854_v11  ;;  %v4858_v39 = vpop.eup %3337  ;;  %v2252_v12 = vsel %vm79_vm0, %v4854_v11, 0.0 }
 0x35d   :  { %1985 = vadd.xlane.f32.xlu0 %v1984_v43  ;;  %5312 = vst [vmem:[#allocation46_spill] sm:$0xff] %v4858_v39  ;;  %v1981_v30 = vsel %vm79_vm0, %v4858_v39, 0.0 }
 0x35f   :  { %v4864_v6 = vpop.eup %3339 }
 0x360   :  { %1976 = vadd.xlane.f32.xlu1 %v1975_v52  ;;  %5313 = vst [vmem:[#allocation47_spill] sm:$0xff] %v4864_v6  ;;  %v1987_v52 = vsel %vm79_vm0, %v4864_v6, 0.0 }
 0x361   :  { %1991 = vadd.xlane.f32.xlu0 %v1990_v53  ;;  %v4868_v53 = vpop.eup %3341 }
 0x362   :  { %5314 = vst [vmem:[#allocation48_spill] sm:$0xff] %v4868_v53  ;;  %v2243_v4 = vsel %vm79_vm0, %v4868_v53, 0.0 }
 0x364   :  { %2232 = vadd.xlane.f32.xlu1 %v2231_v22 }
 0x365   :  { %2247 = vadd.xlane.f32.xlu0 %v2246_v41  ;;  %v399_v9 = vpop.xlane.xlu1 %398  ;;  %v4872_v22 = vpop.eup %3343 }
 0x366   :  { %3345 = vrcp.f32 %v399_v9  ;;  %5315 = vst [vmem:[#allocation32_spill] sm:$0xff] %v4872_v22 }
 0x368   :  { %2238 = vadd.xlane.f32.xlu1 %v2237_v7 }
 0x369   :  { %2253 = vadd.xlane.f32.xlu0 %v2252_v12  ;;  %v402_v43 = vpop.xlane.xlu0 %401  ;;  %v2249_v12 = vsel %vm79_vm0, %v4872_v22, 0.0 }
 0x36a   :  { %3347 = vrcp.f32 %v402_v43  ;;  %v411_v53 = vpop.xlane.xlu1 %410 }
 0x36c   :  { %1982 = vadd.xlane.f32.xlu1 %v1981_v30 }
 0x36d   :  { %v414_v9 = vpop.xlane.xlu0 %413 }
 0x36e   :  { %v661_v6 = vpop.xlane.xlu1 %660 }
 0x370   :  { %1988 = vadd.xlane.f32.xlu1 %v1987_v52 }
 0x373   :  { %v3346_v41 = vpop.eup %3345 }
 0x374   :  { %2244 = vadd.xlane.f32.xlu1 %v2243_v4  ;;  %v429_v43 = vmul.f32 %v3346_v41, %v4470_v54 }
 0x377   :  { %v3348_v7 = vpop.eup %3347 }
 0x378   :  { %2250 = vadd.xlane.f32.xlu1 %v2249_v12  ;;  %v430_v30 = vmul.f32 %v3348_v7, %v4476_v24 }
 0x379   :  { %v673_v4 = vpop.xlane.xlu1 %672 }
 0x37a   :  { %v664_v11 = vpop.xlane.xlu0 %663  ;;  %v437_v29 = vpack.c.bf16 %v430_v30, %v429_v43 }
 0x37c   :  { %3006 = vmatprep.mubr.msk.bf16.mxu1 %vm79_vm0, %v437_v29 }
 0x37e   :  { %v676_v52 = vpop.xlane.xlu0 %675 }
 0x382   :  { %v926_v27 = vpop.xlane.xlu0 %925 }
 0x383   :  { %3349 = vrcp.f32 %v926_v27 }
 0x386   :  { %v4879_v3 = vpop.xlane.xlu0 %1187 }
 0x38d   :  { %v923_v39 = vpop.xlane.xlu1 %922 }
 0x38e   :  { %3351 = vrcp.f32 %v923_v39  ;;  %v938_v22 = vpop.xlane.xlu0 %937 }
 0x38f   :  { %3353 = vrcp.f32 %v414_v9 }
 0x390   :  { %v3350_v54 = vpop.eup %3349 }
 0x391   :  { %v954_v29 = vmul.f32 %v3350_v54, %v4522_v44 }
 0x392   :  { %v408_v12 = vpop.xlane.xlu0 %407 }
 0x393   :  { %3355 = vrcp.f32 %v408_v12 }
 0x394   :  { %3357 = vrcp.f32 %v411_v53 }
 0x395   :  { %v1185_v41 = vpop.xlane.xlu1 %1184 }
 0x396   :  { %v420_v46 = vpop.xlane.xlu0 %419 }
 0x39a   :  { %v670_v24 = vpop.xlane.xlu0 %669 }
 0x39b   :  { %v3352_v7 = vpop.eup %3351 }
 0x39c   :  { %v953_v43 = vmul.f32 %v3352_v7, %v4546_v48  ;;  %v3354_v44 = vpop.eup %3353 }
 0x39d   :  { %v935_v30 = vpop.xlane.xlu1 %934 }
 0x39e   :  { %v682_v20 = vpop.xlane.xlu0 %681  ;;  %v961_v60 = vpack.c.bf16 %v954_v29, %v953_v43  ;;  %v5316_v43 = vld [vmem:[#allocation29_spill] sm:$0xff] }
 0x3a0   :  { %3038 = vmatprep.mubr.msk.bf16.mxu0 %vm79_vm0, %v961_v60  ;;  %v3356_v54 = vpop.eup %3355 }
 0x3a1   :  { %v405_v27 = vpop.xlane.xlu1 %404  ;;  %v3358_v12 = vpop.eup %3357 }
 0x3a2   :  { %3359 = vrcp.f32 %v405_v27  ;;  %v932_v39 = vpop.xlane.xlu0 %931 }
 0x3a5   :  { %v417_v58 = vpop.xlane.xlu1 %416 }
 0x3a6   :  { %3361 = vrcp.f32 %v417_v58  ;;  %v1194_v45 = vpop.xlane.xlu0 %1193  ;;  %v434_v58 = vmul.f32 %v3354_v44, %v5316_v43  ;;  %v5318_v44 = vld [vmem:[#allocation14_spill] sm:$0xff] }
 0x3a7   :  { %3363 = vrcp.f32 %v664_v11  ;;  %v432_v11 = vmul.f32 %v3356_v54, %v4562_v47 }
 0x3a8   :  { %3365 = vrcp.f32 %v420_v46 }
 0x3a9   :  { %3367 = vrcp.f32 %v661_v6  ;;  %v667_v48 = vpop.xlane.xlu1 %666 }
 0x3aa   :  { %v944_v7 = vpop.xlane.xlu0 %943  ;;  %3369 = vrcp.f32 %v673_v4  ;;  %v5317_v4 = vld [vmem:[#allocation22_spill] sm:$0xff] }
 0x3ab   :  { %3371 = vrcp.f32 %v676_v52  ;;  %v433_v52 = vmul.f32 %v3358_v12, %v5317_v4  ;;  %v5320_v12 = vld [vmem:[#allocation19_spill] sm:$0xff]  ;;  %v5322_v4 = vld [vmem:[#allocation16_spill] sm:$0xff] }
 0x3ac   :  { %3373 = vrcp.f32 %v670_v24 }
 0x3ad   :  { %v679_v9 = vpop.xlane.xlu1 %678  ;;  %3375 = vrcp.f32 %v667_v48  ;;  %v439_v48 = vpack.c.bf16 %v434_v58, %v433_v52 }
 0x3ae   :  { %v4884_v60 = vpop.xlane.xlu0 %1199  ;;  %3377 = vrcp.f32 %v935_v30 }
 0x3af   :  { %v3360_v53 = vpop.eup %3359  ;;  %3379 = vrcp.f32 %v932_v39 }
 0x3b0   :  { %v431_v46 = vmul.f32 %v3360_v53, %v4610_v17  ;;  %3381 = vrcp.f32 %v938_v22  ;;  %v5319_v22 = vld [vmem:[#allocation15_spill] sm:$0xff] }
 0x3b1   :  { %v929_v6 = vpop.xlane.xlu1 %928 }
 0x3b2   :  { %v438_v29 = vpack.c.bf16 %v432_v11, %v431_v46  ;;  %3383 = vrcp.f32 %v929_v6  ;;  %v4890_v24 = vpop.xlane.xlu0 %1205  ;;  %v5321_v46 = vld [vmem:[#allocation25_spill] sm:$0xff] }
 0x3b3   :  { %v3362_v27 = vpop.eup %3361  ;;  %3385 = vrcp.f32 %v1185_v41 }
 0x3b4   :  { %v3364_v37 = vpop.eup %3363  ;;  %3007 = vmatmul.mubr.msk.bf16.vlgmr.msra.gmra.mxu1 %vm79_vm0, %v438_v29  ;;  %3387 = vrcp.f32 %v679_v9  ;;  %v435_v54 = vmul.f32 %v3362_v27, %v4626_v56 }
 0x3b5   :  { %v3366_v30 = vpop.eup %3365  ;;  %3015 = vmatpush3.bf16.msra.mxu1 %v5318_v44  ;;  %v1191_v47 = vpop.xlane.xlu1 %1190  ;;  %3010 = vmatprep.mubr.msk.bf16.mxu1 %vm79_vm0, %v439_v48  ;;  %3389 = vrcp.f32 %v682_v20  ;;  %v692_v53 = vmul.f32 %v3364_v37, %v5320_v12  ;;  %v5323_v48 = vld [vmem:[#allocation17_spill] sm:$0xff] }
 0x3b6   :  { %v3368_v17 = vpop.eup %3367  ;;  %3016 = vmatprep.subr.bf16.mxu1 %v5319_v22  ;;  %v1450_v39 = vpop.xlane.xlu0 %1449  ;;  %3391 = vrcp.f32 %v944_v7  ;;  %v436_v58 = vmul.f32 %v3366_v30, %v4574_v14 }
 0x3b7   :  { %v3370_v43 = vpop.eup %3369  ;;  %3393 = vrcp.f32 %v4879_v3  ;;  %v691_v9 = vmul.f32 %v3368_v17, %v5321_v46 }
 0x3b8   :  { %v3372_v41 = vpop.eup %3371  ;;  %v440_v20 = vpack.c.bf16 %v436_v58, %v435_v54 }
 0x3b9   :  { %3017 = vmatpush3.bf16.msra.mxu1 %v5319_v22  ;;  %v941_v11 = vpop.xlane.xlu1 %940  ;;  %v3374_v6 = vpop.eup %3373  ;;  %v699_v37 = vpack.c.bf16 %v692_v53, %v691_v9  ;;  %v696_v54 = vmul.f32 %v3372_v41, %v4512_v1  ;;  %v5324_v1 = vld [vmem:[#allocation37_spill] sm:$0xff] }
 0x3ba   :  { %3395 = vrcp.f32 %v941_v11  ;;  %3018 = vmatprep.subr.bf16.mxu1 %v5322_v4  ;;  %v1456_v56 = vpop.xlane.xlu0 %1455  ;;  %v3376_v52 = vpop.eup %3375  ;;  %v694_v12 = vmul.f32 %v3374_v6, %v4590_v42  ;;  %v695_v41 = vmul.f32 %v3370_v43, %v5324_v1 }
 0x3bb   :  { %v3378_v29 = vpop.eup %3377  ;;  %3397 = vrcp.f32 %v1194_v45  ;;  %v693_v27 = vmul.f32 %v3376_v52, %v4642_v57 }
 0x3bc   :  { %3011 = vmatmul.mubr.msk.bf16.gmra.mxu1 %vm79_vm0, %v440_v20  ;;  %v3380_v14 = vpop.eup %3379  ;;  %3399 = vrcp.f32 %v1191_v47  ;;  %v957_v58 = vmul.f32 %v3378_v29, %v4604_v38  ;;  %v701_v38 = vpack.c.bf16 %v696_v54, %v695_v41 }
 0x3bd   :  { %3019 = vmatpush3.bf16.msra.mxu1 %v5322_v4  ;;  %v1197_v3 = vpop.xlane.xlu1 %1196  ;;  %3022 = vmatprep.mubr.msk.bf16.mxu1 %vm79_vm0, %v699_v37  ;;  %v3382_v7 = vpop.eup %3381  ;;  %v956_v45 = vmul.f32 %v3380_v14, %v4620_v0  ;;  %v700_v11 = vpack.c.bf16 %v694_v12, %v693_v27 }
 0x3be   :  { %3020 = vmatprep.subr.bf16.mxu1 %v5323_v48  ;;  %v1712_v30 = vpop.xlane.xlu0 %1711  ;;  %3401 = vrcp.f32 %v1197_v3  ;;  %v958_v42 = vmul.f32 %v3382_v7, %v4548_v62 }
 0x3bf   :  { %v3384_v17 = vpop.eup %3383  ;;  %3403 = vrcp.f32 %v4884_v60 }
 0x3c0   :  { %v955_v53 = vmul.f32 %v3384_v17, %v4674_v15  ;;  %v3386_v47 = vpop.eup %3385  ;;  %3405 = vrcp.f32 %v1450_v39  ;;  %v963_v15 = vpack.c.bf16 %v958_v42, %v957_v58 }
 0x3c1   :  { %3021 = vmatpush3.bf16.msra.mxu1 %v5323_v48  ;;  %v1203_v57 = vpop.xlane.xlu1 %1202  ;;  %v3388_v0 = vpop.eup %3387  ;;  %v1215_v37 = vmul.f32 %v3386_v47, %v4576_v63 }
 0x3c2   :  { %v962_v46 = vpack.c.bf16 %v956_v45, %v955_v53  ;;  %3046 = vmatprep.subr.bf16.mxu1 %v5318_v44  ;;  %v1718_v9 = vpop.xlane.xlu0 %1717  ;;  %v3390_v6 = vpop.eup %3389  ;;  %3407 = vrcp.f32 %v1203_v57  ;;  %v697_v39 = vmul.f32 %v3388_v0, %v4658_v26 }
 0x3c3   :  { %v3392_v60 = vpop.eup %3391  ;;  %v698_v29 = vmul.f32 %v3390_v6, %v4602_v13 }
 0x3c4   :  { %3023 = vmatmul.mubr.msk.bf16.vlgmr.msra.gmra.mxu1 %vm79_vm0, %v700_v11  ;;  %3039 = vmatmul.mubr.msk.bf16.vlgmr.msra.gmra.mxu0 %vm79_vm0, %v962_v46  ;;  %v3394_v52 = vpop.eup %3393  ;;  %v960_v3 = vmul.f32 %v3392_v60, %v4650_v33 }
 0x3c5   :  { %3047 = vmatpush3.bf16.msra.mxu1 %v5318_v44  ;;  %3063 = vmatpush3.bf16.msra.mxu0 %v5318_v44  ;;  %v1447_v20 = vpop.xlane.xlu1 %1446  ;;  %v702_v63 = vpack.c.bf16 %v698_v29, %v697_v39  ;;  %v1216_v13 = vmul.f32 %v3394_v52, %v4530_v2 }
 0x3c6   :  { %3409 = vrcp.f32 %v1447_v20  ;;  %3026 = vmatprep.mubr.msk.bf16.mxu1 %vm79_vm0, %v701_v38  ;;  %3042 = vmatprep.mubr.msk.bf16.mxu0 %vm79_vm0, %v963_v15  ;;  %v1462_v62 = vpop.xlane.xlu0 %1461 }
 0x3c7   :  { %v3396_v43 = vpop.eup %3395  ;;  %3411 = vrcp.f32 %v4890_v24  ;;  %3048 = vmatprep.subr.bf16.mxu1 %v5319_v22  ;;  %3064 = vmatprep.subr.bf16.mxu0 %v5319_v22  ;;  %v1223_v33 = vpack.c.bf16 %v1216_v13, %v1215_v37 }
 0x3c8   :  { %3413 = vrcp.f32 %v1456_v56  ;;  %v959_v14 = vmul.f32 %v3396_v43, %v4702_v5  ;;  %v3398_v7 = vpop.eup %3397 }
 0x3c9   :  { %3049 = vmatpush3.bf16.msra.mxu1 %v5319_v22  ;;  %3065 = vmatpush3.bf16.msra.mxu0 %v5319_v22  ;;  %v1453_v26 = vpop.xlane.xlu1 %1452  ;;  %v3400_v27 = vpop.eup %3399  ;;  %v1218_v45 = vmul.f32 %v3398_v7, %v4636_v35 }
 0x3ca   :  { %3415 = vrcp.f32 %v1453_v26  ;;  %3050 = vmatprep.subr.bf16.mxu1 %v5322_v4  ;;  %3066 = vmatprep.subr.bf16.mxu0 %v5322_v4  ;;  %v1468_v24 = vpop.xlane.xlu0 %1467  ;;  %v964_v56 = vpack.c.bf16 %v960_v3, %v959_v14  ;;  %v1217_v12 = vmul.f32 %v3400_v27, %v4688_v51  ;;  %v5326_v26 = vld [vmem:[#allocation30_spill] sm:$0xff] }
 0x3cb   :  { %v3402_v5 = vpop.eup %3401  ;;  %3417 = vrcp.f32 %v1712_v30 }
 0x3cc   :  { %3027 = vmatmul.mubr.msk.bf16.gmra.mxu1 %vm79_vm0, %v702_v63  ;;  %3043 = vmatmul.mubr.msk.bf16.gmra.mxu0 %vm79_vm0, %v964_v56  ;;  %v3404_v54 = vpop.eup %3403  ;;  %v1219_v30 = vmul.f32 %v3402_v5, %v4716_v36  ;;  %v1224_v47 = vpack.c.bf16 %v1218_v45, %v1217_v12 }
 0x3cd   :  { %3051 = vmatpush3.bf16.msra.mxu1 %v5322_v4  ;;  %3067 = vmatpush3.bf16.msra.mxu0 %v5322_v4  ;;  %v1709_v17 = vpop.xlane.xlu1 %1708  ;;  %v3406_v53 = vpop.eup %3405  ;;  %v1220_v51 = vmul.f32 %v3404_v54, %v4666_v19 }
 0x3ce   :  { %3419 = vrcp.f32 %v1709_v17  ;;  %3052 = vmatprep.subr.bf16.mxu1 %v5323_v48  ;;  %3054 = vmatprep.mubr.msk.bf16.mxu1 %vm79_vm0, %v1223_v33  ;;  %v1724_v2 = vpop.xlane.xlu0 %1723  ;;  %v1478_v1 = vmul.f32 %v3406_v53, %v4696_v31 }
 0x3cf   :  { %3068 = vmatprep.subr.bf16.mxu0 %v5323_v48  ;;  %3421 = vrcp.f32 %v1718_v9  ;;  %v3408_v57 = vpop.eup %3407  ;;  %v1225_v46 = vpack.c.bf16 %v1220_v51, %v1219_v30 }
 0x3d0   :  { %v1221_v6 = vmul.f32 %v3408_v57, %v4730_v40 }
 0x3d1   :  { %3053 = vmatpush3.bf16.msra.mxu1 %v5323_v48  ;;  %3069 = vmatpush3.bf16.msra.mxu0 %v5323_v48  ;;  %v1715_v58 = vpop.xlane.xlu1 %1714 }
 0x3d2   :  { %3423 = vrcp.f32 %v1715_v58  ;;  %3078 = vmatprep.subr.bf16.mxu1 %v5318_v44  ;;  %3094 = vmatprep.subr.bf16.mxu0 %v5318_v44  ;;  %v1730_v11 = vpop.xlane.xlu0 %1729 }
 0x3d3   :  { %v3410_v36 = vpop.eup %3409  ;;  %3425 = vrcp.f32 %v1462_v62 }
 0x3d4   :  { %v3412_v35 = vpop.eup %3411  ;;  %3055 = vmatmul.mubr.msk.bf16.vlgmr.msra.gmra.mxu1 %vm79_vm0, %v1224_v47  ;;  %v1477_v9 = vmul.f32 %v3410_v36, %v4742_v59 }
 0x3d5   :  { %v3414_v41 = vpop.eup %3413  ;;  %3079 = vmatpush3.bf16.msra.mxu1 %v5318_v44  ;;  %v1459_v19 = vpop.xlane.xlu1 %1458  ;;  %3058 = vmatprep.mubr.msk.bf16.mxu1 %vm79_vm0, %v1225_v46  ;;  %v1222_v31 = vmul.f32 %v3412_v35, %v4682_v25 }
 0x3d6   :  { %3427 = vrcp.f32 %v1459_v19  ;;  %3080 = vmatprep.subr.bf16.mxu1 %v5319_v22  ;;  %v1974_v42 = vpop.xlane.xlu0 %1973  ;;  %v1485_v0 = vpack.c.bf16 %v1478_v1, %v1477_v9  ;;  %v1480_v15 = vmul.f32 %v3414_v41, %v4710_v61 }
 0x3d7   :  { %v3416_v38 = vpop.eup %3415  ;;  %3429 = vrcp.f32 %v1468_v24  ;;  %v1226_v40 = vpack.c.bf16 %v1222_v31, %v1221_v6  ;;  %v5328_v6 = vld [vmem:[#allocation23_spill] sm:$0xff] }
 0x3d8   :  { %v1479_v59 = vmul.f32 %v3416_v38, %v4753_v50  ;;  %3070 = vmatprep.mubr.msk.bf16.mxu0 %vm79_vm0, %v1485_v0  ;;  %v3418_v60 = vpop.eup %3417  ;;  %v5325_v50 = vld [vmem:[#allocation35_spill] sm:$0xff] }
 0x3d9   :  { %3081 = vmatpush3.bf16.msra.mxu1 %v5319_v22  ;;  %v1465_v20 = vpop.xlane.xlu1 %1464  ;;  %v1740_v25 = vmul.f32 %v3418_v60, %v5325_v50 }
 0x3da   :  { %v1486_v52 = vpack.c.bf16 %v1480_v15, %v1479_v59  ;;  %3431 = vrcp.f32 %v1465_v20  ;;  %3082 = vmatprep.subr.bf16.mxu1 %v5322_v4  ;;  %v1980_v62 = vpop.xlane.xlu0 %1979 }
 0x3db   :  { %v3420_v39 = vpop.eup %3419  ;;  %3433 = vrcp.f32 %v1724_v2 }
 0x3dc   :  { %3059 = vmatmul.mubr.msk.bf16.gmra.mxu1 %vm79_vm0, %v1226_v40  ;;  %3071 = vmatmul.mubr.msk.bf16.vlgmr.msra.gmra.mxu0 %vm79_vm0, %v1486_v52  ;;  %v1739_v61 = vmul.f32 %v3420_v39, %v4764_v18  ;;  %v3422_v43 = vpop.eup %3421  ;;  %v5331_v52 = vld [vmem:[#allocation31_spill] sm:$0xff] }
 0x3dd   :  { %3083 = vmatpush3.bf16.msra.mxu1 %v5322_v4  ;;  %3095 = vmatpush3.bf16.msra.mxu0 %v5318_v44  ;;  %v1721_v37 = vpop.xlane.xlu1 %1720  ;;  %v1742_v7 = vmul.f32 %v3422_v43, %v5326_v26  ;;  %v5332_v43 = vld [vmem:[#allocation20_spill] sm:$0xff] }
 0x3de   :  { %3435 = vrcp.f32 %v1721_v37  ;;  %3084 = vmatprep.subr.bf16.mxu1 %v5323_v48  ;;  %3096 = vmatprep.subr.bf16.mxu0 %v5319_v22  ;;  %v1747_v29 = vpack.c.bf16 %v1740_v25, %v1739_v61  ;;  %v2236_v3 = vpop.xlane.xlu0 %2235 }
 0x3df   :  { %v3424_v14 = vpop.eup %3423  ;;  %3437 = vrcp.f32 %v1730_v11 }
 0x3e0   :  { %v1741_v18 = vmul.f32 %v3424_v14, %v4775_v23  ;;  %3086 = vmatprep.mubr.msk.bf16.mxu1 %vm79_vm0, %v1747_v29  ;;  %v3426_v24 = vpop.eup %3425  ;;  %v5333_v29 = vld [vmem:[#allocation44_spill] sm:$0xff] }
 0x3e1   :  { %3085 = vmatpush3.bf16.msra.mxu1 %v5323_v48  ;;  %3097 = vmatpush3.bf16.msra.mxu0 %v5319_v22  ;;  %v1727_v63 = vpop.xlane.xlu1 %1726  ;;  %v1482_v27 = vmul.f32 %v3426_v24, %v4747_v10  ;;  %v5334_v24 = vld [vmem:[#allocation46_spill] sm:$0xff] }
 0x3e2   :  { %v1748_v56 = vpack.c.bf16 %v1742_v7, %v1741_v18  ;;  %3439 = vrcp.f32 %v1727_v63  ;;  %3098 = vmatprep.subr.bf16.mxu0 %v5322_v4  ;;  %3110 = vmatprep.subr.bf16.mxu1 %v5318_v44  ;;  %v2242_v33 = vpop.xlane.xlu0 %2241 }
 0x3e3   :  { %v3428_v13 = vpop.eup %3427  ;;  %3441 = vrcp.f32 %v1974_v42 }
 0x3e4   :  { %3087 = vmatmul.mubr.msk.bf16.vlgmr.msra.gmra.mxu1 %vm79_vm0, %v1748_v56  ;;  %v1481_v23 = vmul.f32 %v3428_v13, %v4785_v28  ;;  %v3430_v5 = vpop.eup %3429  ;;  %v5335_v56 = vld [vmem:[#allocation34_spill] sm:$0xff] }
 0x3e5   :  { %3099 = vmatpush3.bf16.msra.mxu0 %v5322_v4  ;;  %3111 = vmatpush3.bf16.msra.mxu1 %v5318_v44  ;;  %v1971_v17 = vpop.xlane.xlu1 %1970  ;;  %v1484_v10 = vmul.f32 %v3430_v5, %v4758_v49 }
 0x3e6   :  { %3443 = vrcp.f32 %v1971_v17  ;;  %3100 = vmatprep.subr.bf16.mxu0 %v5323_v48  ;;  %3112 = vmatprep.subr.bf16.mxu1 %v5319_v22  ;;  %v1487_v54 = vpack.c.bf16 %v1482_v27, %v1481_v23  ;;  %v1986_v53 = vpop.xlane.xlu0 %1985 }
 0x3e7   :  { %v3432_v12 = vpop.eup %3431  ;;  %3445 = vrcp.f32 %v1980_v62 }
 0x3e8   :  { %3074 = vmatprep.mubr.msk.bf16.mxu0 %vm79_vm0, %v1487_v54  ;;  %v1483_v28 = vmul.f32 %v3432_v12, %v4795_v8  ;;  %v3434_v2 = vpop.eup %3433  ;;  %v5327_v8 = vld [vmem:[#allocation38_spill] sm:$0xff]  ;;  %v5337_v54 = vld [vmem:[#allocation40_spill] sm:$0xff] }
 0x3e9   :  { %3101 = vmatpush3.bf16.msra.mxu0 %v5323_v48  ;;  %3113 = vmatpush3.bf16.msra.mxu1 %v5319_v22  ;;  %v1977_v44 = vpop.xlane.xlu1 %1976  ;;  %v1744_v51 = vmul.f32 %v3434_v2, %v5327_v8  ;;  %v5340_v8 = vmov 0  }
 0x3ea   :  { %3447 = vrcp.f32 %v1977_v44  ;;  %3114 = vmatprep.subr.bf16.mxu1 %v5322_v4  ;;  %v1488_v30 = vpack.c.bf16 %v1484_v10, %v1483_v28  ;;  %v5338_v44 = vld [vmem:[#allocation48_spill] sm:$0xff] }
 0x3eb   :  { %v3436_v45 = vpop.eup %3435  ;;  %3449 = vrcp.f32 %v2236_v3 }
 0x3ec   :  { %3075 = vmatmul.mubr.msk.bf16.gmra.mxu0 %vm79_vm0, %v1488_v30  ;;  %v1743_v58 = vmul.f32 %v3436_v45, %v4805_v32  ;;  %v3438_v49 = vpop.eup %3437  ;;  %v1992_v32 = vpop.xlane.xlu0 %1991  ;;  %v5339_v45 = vld [vmem:[#allocation43_spill] sm:$0xff] }
 0x3ed   :  { %3115 = vmatpush3.bf16.msra.mxu1 %v5322_v4  ;;  %v2233_v57 = vpop.xlane.xlu1 %2232  ;;  %v1746_v36 = vmul.f32 %v3438_v49, %v4780_v16 }
 0x3ee   :  { %3451 = vrcp.f32 %v2233_v57  ;;  %3116 = vmatprep.subr.bf16.mxu1 %v5323_v48  ;;  %v1749_v22 = vpack.c.bf16 %v1744_v51, %v1743_v58  ;;  %v5341_v57 = vld [vmem:[#allocation32_spill] sm:$0xff] }
 0x3ef   :  { %v3440_v47 = vpop.eup %3439  ;;  %3453 = vrcp.f32 %v2242_v33  ;;  %v5336_v33 = vld [vmem:[#allocation47_spill] sm:$0xff] }
 0x3f0   :  { %3090 = vmatprep.mubr.msk.bf16.mxu1 %vm79_vm0, %v1749_v22  ;;  %v1745_v11 = vmul.f32 %v3440_v47, %v4815_v55  ;;  %v3442_v46 = vpop.eup %3441  ;;  %v2248_v0 = vpop.xlane.xlu0 %2247  ;;  %v5342_v47 = vld [vmem:[#allocation45_spill] sm:$0xff] }
 0x3f1   :  { %3117 = vmatpush3.bf16.msra.mxu1 %v5323_v48  ;;  %v2239_v35 = vpop.xlane.xlu1 %2238  ;;  %v2002_v41 = vmul.f32 %v3442_v46, %v4790_v34  ;;  %v5329_v48 = vld [vmem:[#allocation41_spill] sm:$0xff]  ;;  %v5330_v34 = vld [vmem:[#allocation42_spill] sm:$0xff]  ;;  %v2465_v46 = vld [vmem:[#allocation9 + $0xe8] sm:$0xff] }
 0x3f2   :  { %3455 = vrcp.f32 %v2239_v35  ;;  %v1750_v4 = vpack.c.bf16 %v1746_v36, %v1745_v11  ;;  %v2464_v35 = vld [vmem:[#allocation9 + $0xe0] sm:$0xff] }
 0x3f3   :  { %v3444_v9 = vpop.eup %3443  ;;  %3457 = vrcp.f32 %v1986_v53 }
 0x3f4   :  { %3091 = vmatmul.mubr.msk.bf16.gmra.mxu1 %vm79_vm0, %v1750_v4  ;;  %v2001_v1 = vmul.f32 %v3444_v9, %v4824_v21  ;;  %v3446_v19 = vpop.eup %3445  ;;  %v2254_v39 = vpop.xlane.xlu0 %2253  ;;  %v2466_v9 = vld [vmem:[#allocation9 + $0xf0] sm:$0xff] }
 0x3f5   :  { %v1983_v42 = vpop.xlane.xlu1 %1982  ;;  %v2004_v38 = vmul.f32 %v3446_v19, %v5328_v6  ;;  %v2463_v19 = vld [vmem:[#allocation9 + $0xd8] sm:$0xff]  ;;  %v2457_v6 = vld [vmem:[#allocation9 + $0xa8] sm:$0xff] }
 0x3f6   :  { %3459 = vrcp.f32 %v1983_v42  ;;  %v2009_v55 = vpack.c.bf16 %v2002_v41, %v2001_v1  ;;  %v2482_v1 = vpack.c.bf16 %v2466_v9, %v2464_v35  ;;  %v2461_v41 = vld [vmem:[#allocation9 + $0xc8] sm:$0xff]  ;;  %v2460_v42 = vld [vmem:[#allocation9 + $0xc0] sm:$0xff] }
 0x3f7   :  { %v3448_v16 = vpop.eup %3447  ;;  %3461 = vrcp.f32 %v1992_v32  ;;  %v2467_v32 = vld [vmem:[#allocation9 + $0xf8] sm:$0xff] }
 0x3f8   :  { %v2003_v15 = vmul.f32 %v3448_v16, %v5329_v48  ;;  %3102 = vmatprep.mubr.msk.bf16.mxu0 %vm79_vm0, %v2009_v55  ;;  %v3450_v59 = vpop.eup %3449  ;;  %v2483_v4 = vpack.c.bf16 %v2467_v32, %v2465_v46  ;;  %v2481_v55 = vpack.c.bf16 %v2463_v19, %v2461_v41  ;;  %v2462_v16 = vld [vmem:[#allocation9 + $0xd0] sm:$0xff]  ;;  %v2456_v48 = vld [vmem:[#allocation9 + $0xa0] sm:$0xff] }
 0x3f9   :  { %v1989_v31 = vpop.xlane.xlu1 %1988  ;;  %v2264_v62 = vmul.f32 %v3450_v59, %v5331_v52  ;;  %v2458_v59 = vld [vmem:[#allocation9 + $0xb0] sm:$0xff] }
 0x3fa   :  { %v2010_v60 = vpack.c.bf16 %v2004_v38, %v2003_v15  ;;  %3463 = vrcp.f32 %v1989_v31  ;;  %2484 = vmatprep.subr.bf16.mxu0 %v2483_v4  ;;  %v2459_v38 = vld [vmem:[#allocation9 + $0xb8] sm:$0xff]  ;;  %v2478_v31 = vpack.c.bf16 %v2458_v59, %v2456_v48  ;;  %v2454_v52 = vld [vmem:[#allocation9 + $0x90] sm:$0xff] }
 0x3fb   :  { %v3452_v21 = vpop.eup %3451  ;;  %3465 = vrcp.f32 %v2248_v0  ;;  %v2480_v0 = vpack.c.bf16 %v2462_v16, %v2460_v42  ;;  %v2479_v15 = vpack.c.bf16 %v2459_v38, %v2457_v6 }
 0x3fc   :  { %3103 = vmatmul.mubr.msk.bf16.vlgmr.msra.gmra.mxu0 %vm79_vm0, %v2010_v60  ;;  %v2263_v20 = vmul.f32 %v3452_v21, %v5330_v34  ;;  %v3454_v40 = vpop.eup %3453  ;;  %v2453_v60 = vld [vmem:[#allocation9 + $0x88] sm:$0xff]  ;;  %v2455_v21 = vld [vmem:[#allocation9 + $0x98] sm:$0xff]  ;;  %v2452_v34 = vld [vmem:[#allocation9 + $0x80] sm:$0xff] }
 0x3fd   :  { %v2245_v61 = vpop.xlane.xlu1 %2244  ;;  %v2266_v37 = vmul.f32 %v3454_v40, %v5332_v43  ;;  %2485 = vmatpush1.bf16.msra.mxu0 %v2482_v1  ;;  %v2449_v40 = vld [vmem:[#allocation9 + $0x68] sm:$0xff] }
 0x3fe   :  { %3467 = vrcp.f32 %v2245_v61  ;;  %v2271_v50 = vpack.c.bf16 %v2264_v62, %v2263_v20  ;;  %2486 = vmatprep.subr.bf16.mxu0 %v2481_v55  ;;  %v2477_v20 = vpack.c.bf16 %v2455_v21, %v2453_v60  ;;  %v2476_v62 = vpack.c.bf16 %v2454_v52, %v2452_v34  ;;  %v2448_v61 = vld [vmem:[#allocation9 + $0x60] sm:$0xff]  ;;  %v2445_v43 = vld [vmem:[#allocation9 + $0x48] sm:$0xff] }
 0x3ff   :  { %v3456_v25 = vpop.eup %3455  ;;  %3469 = vrcp.f32 %v2254_v39  ;;  %v2451_v39 = vld [vmem:[#allocation9 + $0x78] sm:$0xff] }
 0x400   :  { %v2265_v14 = vmul.f32 %v3456_v25, %v5333_v29  ;;  %3118 = vmatprep.mubr.msk.bf16.mxu1 %vm79_vm0, %v2271_v50  ;;  %v3458_v3 = vpop.eup %3457  ;;  %v2475_v50 = vpack.c.bf16 %v2451_v39, %v2449_v40  ;;  %v2450_v25 = vld [vmem:[#allocation9 + $0x70] sm:$0xff] }
 0x401   :  { %v2251_v26 = vpop.xlane.xlu1 %2250  ;;  %v2006_v13 = vmul.f32 %v3458_v3, %v5335_v56  ;;  %2487 = vmatpush1.bf16.msra.mxu0 %v2480_v0  ;;  %v2474_v29 = vpack.c.bf16 %v2450_v25, %v2448_v61  ;;  %v2444_v3 = vld [vmem:[#allocation9 + $0x40] sm:$0xff] }
 0x402   :  { %v2272_v7 = vpack.c.bf16 %v2266_v37, %v2265_v14  ;;  %3471 = vrcp.f32 %v2251_v26  ;;  %2488 = vmatprep.subr.bf16.mxu0 %v2479_v15  ;;  %v2447_v37 = vld [vmem:[#allocation9 + $0x58] sm:$0xff]  ;;  %v2446_v26 = vld [vmem:[#allocation9 + $0x50] sm:$0xff]  ;;  %v2440_v56 = vld [vmem:[#allocation9 + $0x20] sm:$0xff] }
 0x403   :  { %v3460_v18 = vpop.eup %3459  ;;  %v2473_v14 = vpack.c.bf16 %v2447_v37, %v2445_v43 }
 0x404   :  { %3119 = vmatmul.mubr.msk.bf16.vlgmr.msra.gmra.mxu1 %vm79_vm0, %v2272_v7  ;;  %v2005_v63 = vmul.f32 %v3460_v18, %v5334_v24  ;;  %v3462_v23 = vpop.eup %3461  ;;  %v2441_v7 = vld [vmem:[#allocation9 + $0x28] sm:$0xff]  ;;  %v2443_v18 = vld [vmem:[#allocation9 + $0x38] sm:$0xff]  ;;  %v2472_v24 = vpack.c.bf16 %v2446_v26, %v2444_v3 }
 0x405   :  { %v2008_v12 = vmul.f32 %v3462_v23, %v5337_v54  ;;  %2489 = vmatpush1.bf16.msra.mxu0 %v2478_v31  ;;  %v2437_v23 = vld [vmem:[#allocation9 + $0x8] sm:$0xff]  ;;  %v2438_v54 = vld [vmem:[#allocation9 + $0x10] sm:$0xff] }
 0x406   :  { %v2011_v27 = vpack.c.bf16 %v2006_v13, %v2005_v63  ;;  %2490 = vmatprep.subr.bf16.mxu0 %v2477_v20  ;;  %v2471_v63 = vpack.c.bf16 %v2443_v18, %v2441_v7  ;;  %v2442_v13 = vld [vmem:[#allocation9 + $0x30] sm:$0xff] }
 0x407   :  { %v3464_v5 = vpop.eup %3463 }
 0x408   :  { %3106 = vmatprep.mubr.msk.bf16.mxu0 %vm79_vm0, %v2011_v27  ;;  %v2007_v17 = vmul.f32 %v3464_v5, %v5336_v33  ;;  %v3466_v28 = vpop.eup %3465  ;;  %v2439_v27 = vld [vmem:[#allocation9 + $0x18] sm:$0xff]  ;;  %v2470_v5 = vpack.c.bf16 %v2442_v13, %v2440_v56 }
 0x409   :  { %v2268_v53 = vmul.f32 %v3466_v28, %v5339_v45  ;;  %2491 = vmatpush1.bf16.msra.mxu0 %v2476_v62  ;;  %v2469_v33 = vpack.c.bf16 %v2439_v27, %v2437_v23 }
 0x40a   :  { %v2012_v10 = vpack.c.bf16 %v2008_v12, %v2007_v17  ;;  %2492 = vmatprep.subr.bf16.mxu0 %v2475_v50  ;;  %v2436_v17 = vld [vmem:[#allocation9] sm:$0xff] }
 0x40b   :  { %v3468_v2 = vpop.eup %3467  ;;  %v2468_v12 = vpack.c.bf16 %v2438_v54, %v2436_v17 }
 0x40c   :  { %3107 = vmatmul.mubr.msk.bf16.gmra.mxu0 %vm79_vm0, %v2012_v10  ;;  %v2267_v30 = vmul.f32 %v3468_v2, %v5338_v44  ;;  %v3470_v58 = vpop.eup %3469 }
 0x40d   :  { %2516 = vmatprep.mubr.bf16.mxu0 %v5340_v8  ;;  %v2270_v11 = vmul.f32 %v3470_v58, %v5342_v47  ;;  %2493 = vmatpush1.bf16.msra.mxu0 %v2474_v29 }
 0x40e   :  { %v2273_v51 = vpack.c.bf16 %v2268_v53, %v2267_v30  ;;  %2494 = vmatprep.subr.bf16.mxu0 %v2473_v14 }
 0x40f   :  { %v3472_v49 = vpop.eup %3471 }
 0x410   :  { %3122 = vmatprep.mubr.msk.bf16.mxu1 %vm79_vm0, %v2273_v51  ;;  %v2269_v22 = vmul.f32 %v3472_v49, %v5341_v57 }
 0x411   :  { %2495 = vmatpush1.bf16.msra.mxu0 %v2472_v24 }
 0x412   :  { %v2274_v36 = vpack.c.bf16 %v2270_v11, %v2269_v22  ;;  %2496 = vmatprep.subr.bf16.mxu0 %v2471_v63 }
 0x414   :  { %3123 = vmatmul.mubr.msk.bf16.gmra.mxu1 %vm79_vm0, %v2274_v36 }
 0x415   :  { %2497 = vmatpush1.bf16.msra.mxu0 %v2470_v5 }
 0x416   :  { %2498 = vmatprep.subr.bf16.mxu0 %v2469_v33  ;;  %v2912_v33 = vld [vmem:[%s5155_s3] ss:$0 sm:$0xff] }
 0x419   :  { %2499 = vmatpush1.bf16.msra.mxu0 %v2468_v12 }
 0x474   :  { %v3008_v28 = vpop.f32.mrf.mxu1 }
 0x475   :  { %521 = vst.msk [vmem:[#allocation3 + $0x10] sm:$0xff] %vm518_vm7, %v3008_v28 }
 0x476   :  { %v487_v10 = vpop.f32.mrf.mxu1 }
 0x477   :  { %519 = vst.msk [vmem:[#allocation3] sm:$0xff] %vm518_vm7, %v487_v10 }
 0x478   :  { %v3009_v2 = vpop.f32.mrf.mxu1 }
 0x479   :  { %522 = vst.msk [vmem:[#allocation3 + $0x18] sm:$0xff] %vm518_vm7, %v3009_v2 }
 0x47a   :  { %v490_v44 = vpop.f32.mrf.mxu1 }
 0x47b   :  { %520 = vst.msk [vmem:[#allocation3 + $0x8] sm:$0xff] %vm518_vm7, %v490_v44 }
 0x47c   :  { %v3012_v30 = vpop.f32.mrf.mxu1 }
 0x47d   :  { %525 = vst.msk [vmem:[#allocation3 + $0x30] sm:$0xff] %vm518_vm7, %v3012_v30 }
 0x47e   :  { %v503_v45 = vpop.f32.mrf.mxu1 }
 0x47f   :  { %523 = vst.msk [vmem:[#allocation3 + $0x20] sm:$0xff] %vm518_vm7, %v503_v45 }
 0x480   :  { %v3013_v53 = vpop.f32.mrf.mxu1 }
 0x481   :  { %526 = vst.msk [vmem:[#allocation3 + $0x38] sm:$0xff] %vm518_vm7, %v3013_v53 }
 0x482   :  { %v506_v58 = vpop.f32.mrf.mxu1 }
 0x483   :  { %524 = vst.msk [vmem:[#allocation3 + $0x28] sm:$0xff] %vm518_vm7, %v506_v58 }
 0x484   :  { %v3024_v51 = vpop.f32.mrf.mxu1  ;;  %v3040_v49 = vpop.f32.mrf.mxu0 }
 0x485   :  { %783 = vst.msk [vmem:[#allocation3 + $0x10] sm:$0xff] %vm780_vm8, %v3024_v51 }
 0x486   :  { %1045 = vst.msk [vmem:[#allocation3 + $0x10] sm:$0xff] %vm1042_vm9, %v3040_v49  ;;  %v749_v57 = vpop.f32.mrf.mxu1  ;;  %v1011_v22 = vpop.f32.mrf.mxu0 }
 0x487   :  { %781 = vst.msk [vmem:[#allocation3] sm:$0xff] %vm780_vm8, %v749_v57 }
 0x488   :  { %1043 = vst.msk [vmem:[#allocation3] sm:$0xff] %vm1042_vm9, %v1011_v22  ;;  %v3025_v47 = vpop.f32.mrf.mxu1  ;;  %v3041_v11 = vpop.f32.mrf.mxu0 }
 0x489   :  { %784 = vst.msk [vmem:[#allocation3 + $0x18] sm:$0xff] %vm780_vm8, %v3025_v47 }
 0x48a   :  { %1046 = vst.msk [vmem:[#allocation3 + $0x18] sm:$0xff] %vm1042_vm9, %v3041_v11  ;;  %v752_v36 = vpop.f32.mrf.mxu1  ;;  %v1014_v46 = vpop.f32.mrf.mxu0 }
 0x48b   :  { %782 = vst.msk [vmem:[#allocation3 + $0x8] sm:$0xff] %vm780_vm8, %v752_v36 }
 0x48c   :  { %1044 = vst.msk [vmem:[#allocation3 + $0x8] sm:$0xff] %vm1042_vm9, %v1014_v46  ;;  %v3028_v32 = vpop.f32.mrf.mxu1  ;;  %v3044_v35 = vpop.f32.mrf.mxu0 }
 0x48d   :  { %787 = vst.msk [vmem:[#allocation3 + $0x30] sm:$0xff] %vm780_vm8, %v3028_v32 }
 0x48e   :  { %1049 = vst.msk [vmem:[#allocation3 + $0x30] sm:$0xff] %vm1042_vm9, %v3044_v35  ;;  %v765_v4 = vpop.f32.mrf.mxu1  ;;  %v1027_v9 = vpop.f32.mrf.mxu0 }
 0x48f   :  { %785 = vst.msk [vmem:[#allocation3 + $0x20] sm:$0xff] %vm780_vm8, %v765_v4 }
 0x490   :  { %1047 = vst.msk [vmem:[#allocation3 + $0x20] sm:$0xff] %vm1042_vm9, %v1027_v9  ;;  %v3029_v1 = vpop.f32.mrf.mxu1  ;;  %v3045_v41 = vpop.f32.mrf.mxu0 }
 0x491   :  { %788 = vst.msk [vmem:[#allocation3 + $0x38] sm:$0xff] %vm780_vm8, %v3029_v1 }
 0x492   :  { %1050 = vst.msk [vmem:[#allocation3 + $0x38] sm:$0xff] %vm1042_vm9, %v3045_v41  ;;  %v768_v19 = vpop.f32.mrf.mxu1  ;;  %v1030_v42 = vpop.f32.mrf.mxu0 }
 0x493   :  { %786 = vst.msk [vmem:[#allocation3 + $0x28] sm:$0xff] %vm780_vm8, %v768_v19 }
 0x494   :  { %1048 = vst.msk [vmem:[#allocation3 + $0x28] sm:$0xff] %vm1042_vm9, %v1030_v42  ;;  %v3056_v55 = vpop.f32.mrf.mxu1 }
 0x495   :  { %1307 = vst.msk [vmem:[#allocation3 + $0x10] sm:$0xff] %vm1304_vm10, %v3056_v55 }
 0x496   :  { %v1273_v16 = vpop.f32.mrf.mxu1 }
 0x497   :  { %1305 = vst.msk [vmem:[#allocation3] sm:$0xff] %vm1304_vm10, %v1273_v16 }
 0x498   :  { %v3057_v0 = vpop.f32.mrf.mxu1 }
 0x499   :  { %1308 = vst.msk [vmem:[#allocation3 + $0x18] sm:$0xff] %vm1304_vm10, %v3057_v0 }
 0x49a   :  { %v1276_v6 = vpop.f32.mrf.mxu1 }
 0x49b   :  { %1306 = vst.msk [vmem:[#allocation3 + $0x8] sm:$0xff] %vm1304_vm10, %v1276_v6 }
 0x49c   :  { %v3060_v38 = vpop.f32.mrf.mxu1  ;;  %v3072_v48 = vpop.f32.mrf.mxu0 }
 0x49d   :  { %1311 = vst.msk [vmem:[#allocation3 + $0x30] sm:$0xff] %vm1304_vm10, %v3060_v38 }
 0x49e   :  { %1569 = vst.msk [vmem:[#allocation3 + $0x10] sm:$0xff] %vm1566_vm11, %v3072_v48  ;;  %v1289_v15 = vpop.f32.mrf.mxu1  ;;  %v1535_v59 = vpop.f32.mrf.mxu0 }
 0x49f   :  { %1309 = vst.msk [vmem:[#allocation3 + $0x20] sm:$0xff] %vm1304_vm10, %v1289_v15 }
 0x4a0   :  { %1567 = vst.msk [vmem:[#allocation3] sm:$0xff] %vm1566_vm11, %v1535_v59  ;;  %v3061_v31 = vpop.f32.mrf.mxu1  ;;  %v3073_v60 = vpop.f32.mrf.mxu0 }
 0x4a1   :  { %1312 = vst.msk [vmem:[#allocation3 + $0x38] sm:$0xff] %vm1304_vm10, %v3061_v31 }
 0x4a2   :  { %1570 = vst.msk [vmem:[#allocation3 + $0x18] sm:$0xff] %vm1566_vm11, %v3073_v60  ;;  %v1292_v21 = vpop.f32.mrf.mxu1  ;;  %v1538_v34 = vpop.f32.mrf.mxu0 }
 0x4a3   :  { %1310 = vst.msk [vmem:[#allocation3 + $0x28] sm:$0xff] %vm1304_vm10, %v1292_v21 }
 0x4a4   :  { %1568 = vst.msk [vmem:[#allocation3 + $0x8] sm:$0xff] %vm1566_vm11, %v1538_v34  ;;  %v3088_v20 = vpop.f32.mrf.mxu1 }
 0x4a5   :  { %1831 = vst.msk [vmem:[#allocation3 + $0x10] sm:$0xff] %vm1828_vm12, %v3088_v20 }
 0x4a6   :  { %v1797_v52 = vpop.f32.mrf.mxu1 }
 0x4a7   :  { %1829 = vst.msk [vmem:[#allocation3] sm:$0xff] %vm1828_vm12, %v1797_v52 }
 0x4a8   :  { %v3089_v62 = vpop.f32.mrf.mxu1 }
 0x4a9   :  { %1832 = vst.msk [vmem:[#allocation3 + $0x18] sm:$0xff] %vm1828_vm12, %v3089_v62 }
 0x4aa   :  { %v1800_v40 = vpop.f32.mrf.mxu1 }
 0x4ab   :  { %1830 = vst.msk [vmem:[#allocation3 + $0x8] sm:$0xff] %vm1828_vm12, %v1800_v40 }
 0x4ac   :  { %v3076_v39 = vpop.f32.mrf.mxu0 }
 0x4ad   :  { %1573 = vst.msk [vmem:[#allocation3 + $0x30] sm:$0xff] %vm1566_vm11, %v3076_v39 }
 0x4ae   :  { %v1551_v61 = vpop.f32.mrf.mxu0 }
 0x4af   :  { %1571 = vst.msk [vmem:[#allocation3 + $0x20] sm:$0xff] %vm1566_vm11, %v1551_v61 }
 0x4b0   :  { %v3077_v50 = vpop.f32.mrf.mxu0 }
 0x4b1   :  { %1574 = vst.msk [vmem:[#allocation3 + $0x38] sm:$0xff] %vm1566_vm11, %v3077_v50 }
 0x4b2   :  { %v1554_v25 = vpop.f32.mrf.mxu0 }
 0x4b3   :  { %1572 = vst.msk [vmem:[#allocation3 + $0x28] sm:$0xff] %vm1566_vm11, %v1554_v25 }
 0x4b4   :  { %v3092_v43 = vpop.f32.mrf.mxu1 }
 0x4b5   :  { %1835 = vst.msk [vmem:[#allocation3 + $0x30] sm:$0xff] %vm1828_vm12, %v3092_v43 }
 0x4b6   :  { %v1813_v37 = vpop.f32.mrf.mxu1 }
 0x4b7   :  { %1833 = vst.msk [vmem:[#allocation3 + $0x20] sm:$0xff] %vm1828_vm12, %v1813_v37 }
 0x4b8   :  { %v3093_v29 = vpop.f32.mrf.mxu1 }
 0x4b9   :  { %1836 = vst.msk [vmem:[#allocation3 + $0x38] sm:$0xff] %vm1828_vm12, %v3093_v29 }
 0x4ba   :  { %v1816_v14 = vpop.f32.mrf.mxu1 }
 0x4bb   :  { %1834 = vst.msk [vmem:[#allocation3 + $0x28] sm:$0xff] %vm1828_vm12, %v1816_v14 }
 0x4bc   :  { %v3104_v3 = vpop.f32.mrf.mxu0 }
 0x4bd   :  { %2093 = vst.msk [vmem:[#allocation3 + $0x10] sm:$0xff] %vm2090_vm13, %v3104_v3 }
 0x4be   :  { %v2059_v26 = vpop.f32.mrf.mxu0 }
 0x4bf   :  { %2091 = vst.msk [vmem:[#allocation3] sm:$0xff] %vm2090_vm13, %v2059_v26 }
 0x4c0   :  { %v3105_v7 = vpop.f32.mrf.mxu0 }
 0x4c1   :  { %2094 = vst.msk [vmem:[#allocation3 + $0x18] sm:$0xff] %vm2090_vm13, %v3105_v7 }
 0x4c2   :  { %v2062_v18 = vpop.f32.mrf.mxu0 }
 0x4c3   :  { %2092 = vst.msk [vmem:[#allocation3 + $0x8] sm:$0xff] %vm2090_vm13, %v2062_v18 }
 0x4c4   :  { %v3120_v24 = vpop.f32.mrf.mxu1 }
 0x4c5   :  { %2355 = vst.msk [vmem:[#allocation3 + $0x10] sm:$0xff] %vm2352_vm14, %v3120_v24 }
 0x4c6   :  { %v2321_v63 = vpop.f32.mrf.mxu1 }
 0x4c7   :  { %2353 = vst.msk [vmem:[#allocation3] sm:$0xff] %vm2352_vm14, %v2321_v63 }
 0x4c8   :  { %v3121_v56 = vpop.f32.mrf.mxu1 }
 0x4c9   :  { %2356 = vst.msk [vmem:[#allocation3 + $0x18] sm:$0xff] %vm2352_vm14, %v3121_v56 }
 0x4ca   :  { %v2324_v13 = vpop.f32.mrf.mxu1 }
 0x4cb   :  { %2354 = vst.msk [vmem:[#allocation3 + $0x8] sm:$0xff] %vm2352_vm14, %v2324_v13 }
 0x4cc   :  { %v3108_v23 = vpop.f32.mrf.mxu0  ;;  %v2363_v17 = vld [vmem:[#allocation3 + $0x10] sm:$0xff] }
 0x4cd   :  { %2097 = vst.msk [vmem:[#allocation3 + $0x30] sm:$0xff] %vm2090_vm13, %v3108_v23  ;;  %v5090_v2 = vadd.f32 %v2912_v33, %v2363_v17 }
 0x4ce   :  { %v2075_v27 = vpop.f32.mrf.mxu0  ;;  %v2361_v5 = vld [vmem:[#allocation3] sm:$0xff] }
 0x4cf   :  { %2095 = vst.msk [vmem:[#allocation3 + $0x20] sm:$0xff] %vm2090_vm13, %v2075_v27  ;;  %v2376_v54 = vadd.f32 %v2912_v33, %v2361_v5  ;;  %v2394_v22 = vmin.f32 %v5090_v2, 0.0  ;;  %vm2386_vm3 = vcmp.gt.f32.partialorder %v5090_v2, 0.0 }
 0x4d0   :  { %v3109_v12 = vpop.f32.mrf.mxu0  ;;  %v2364_v28 = vld [vmem:[#allocation3 + $0x18] sm:$0xff] }
 0x4d1   :  { %2098 = vst.msk [vmem:[#allocation3 + $0x38] sm:$0xff] %vm2090_vm13, %v3109_v12  ;;  %v2392_v10 = vmin.f32 %v2376_v54, 0.0  ;;  %v2379_v44 = vadd.f32 %v2912_v33, %v2364_v28  ;;  %v2404_v32 = vmul.f32 1.442695, %v2394_v22  ;;  %vm2384_vm15 = vcmp.gt.f32.partialorder %v2376_v54, 0.0 }
 0x4d2   :  { %v2078_v30 = vpop.f32.mrf.mxu0  ;;  %v2362_v45 = vld [vmem:[#allocation3 + $0x8] sm:$0xff] }
 0x4d3   :  { %2096 = vst.msk [vmem:[#allocation3 + $0x28] sm:$0xff] %vm2090_vm13, %v2078_v30  ;;  %v2377_v53 = vadd.f32 %v2912_v33, %v2362_v45  ;;  %v2400_v58 = vmul.f32 1.442695, %v2392_v10  ;;  %v2395_v51 = vmin.f32 %v2379_v44, 0.0  ;;  %vm2387_vm2 = vcmp.gt.f32.partialorder %v2379_v44, 0.0 }
 0x4d4   :  { %v3124_v49 = vpop.f32.mrf.mxu1 }
 0x4d5   :  { %2359 = vst.msk [vmem:[#allocation3 + $0x30] sm:$0xff] %vm2352_vm14, %v3124_v49  ;;  %v2393_v57 = vmin.f32 %v2377_v53, 0.0  ;;  %3473 = vpow2.f32 %v2400_v58  ;;  %v2406_v36 = vmul.f32 1.442695, %v2395_v51  ;;  %vm2385_vm1 = vcmp.gt.f32.partialorder %v2377_v53, 0.0 }
 0x4d6   :  { %v2337_v47 = vpop.f32.mrf.mxu1 }
 0x4d7   :  { %2357 = vst.msk [vmem:[#allocation3 + $0x20] sm:$0xff] %vm2352_vm14, %v2337_v47  ;;  %v2402_v11 = vmul.f32 1.442695, %v2393_v57 }
 0x4d8   :  { %v3125_v46 = vpop.f32.mrf.mxu1 }
 0x4d9   :  { %2360 = vst.msk [vmem:[#allocation3 + $0x38] sm:$0xff] %vm2352_vm14, %v3125_v46  ;;  %3475 = vpow2.f32 %v2402_v11 }
 0x4da   :  { %v2340_v35 = vpop.f32.mrf.mxu1  ;;  %3477 = vpow2.f32 %v2406_v36 }
 0x4db   :  { %2358 = vst.msk [vmem:[#allocation3 + $0x28] sm:$0xff] %vm2352_vm14, %v2340_v35  ;;  %3479 = vpow2.f32 %v2404_v32 }
 0x4dc   :  { %v2367_v9 = vld [vmem:[#allocation3 + $0x30] sm:$0xff] }
 0x4dd   :  { %v2382_v42 = vadd.f32 %v2912_v33, %v2367_v9 }
 0x4de   :  { %v2365_v4 = vld [vmem:[#allocation3 + $0x20] sm:$0xff] }
 0x4df   :  { %v2380_v1 = vadd.f32 %v2912_v33, %v2365_v4  ;;  %v2398_v31 = vmin.f32 %v2382_v42, 0.0  ;;  %vm2390_vm7 = vcmp.gt.f32.partialorder %v2382_v42, 0.0 }
 0x4e0   :  { %v2368_v41 = vld [vmem:[#allocation3 + $0x38] sm:$0xff] }
 0x4e1   :  { %v2396_v19 = vmin.f32 %v2380_v1, 0.0  ;;  %v2383_v55 = vadd.f32 %v2912_v33, %v2368_v41  ;;  %v2412_v39 = vmul.f32 1.442695, %v2398_v31  ;;  %vm2388_vm4 = vcmp.gt.f32.partialorder %v2380_v1, 0.0 }
 0x4e2   :  { %v3474_v16 = vpop.eup %3473  ;;  %v2366_v0 = vld [vmem:[#allocation3 + $0x28] sm:$0xff] }
 0x4e3   :  { %v2381_v6 = vadd.f32 %v2912_v33, %v2366_v0  ;;  %v2408_v38 = vmul.f32 1.442695, %v2396_v19  ;;  %v2399_v48 = vmin.f32 %v2383_v55, 0.0  ;;  %v2913_v15 = vadd.f32 -1.0, %v3474_v16  ;;  %v5343_v0 = vld [vmem:[#allocation39_spill] sm:$0xff] }
 0x4e4   :  { %vm2391_vm6 = vcmp.gt.f32.partialorder %v2383_v55, 0.0 }
 0x4e5   :  { %v2397_v59 = vmin.f32 %v2381_v6, 0.0  ;;  %3481 = vpow2.f32 %v2408_v38  ;;  %v2414_v20 = vmul.f32 1.442695, %v2399_v48  ;;  %v2424_v62 = vsel %vm2384_vm15, %v2376_v54, %v2913_v15 }
 0x4e6   :  { %v3476_v60 = vpop.eup %3475  ;;  %vm2389_vm5 = vcmp.gt.f32.partialorder %v2381_v6, 0.0 }
 0x4e7   :  { %v2914_v21 = vadd.f32 -1.0, %v3476_v60  ;;  %v2410_v34 = vmul.f32 1.442695, %v2397_v59  ;;  %v3478_v52 = vpop.eup %3477  ;;  %v2669_v60 = vld [vmem:[#allocation6] sm:$0xff] }
 0x4e8   :  { %v3480_v61 = vpop.eup %3479  ;;  %v2916_v25 = vadd.f32 -1.0, %v3478_v52 }
 0x4e9   :  { %v2425_v40 = vsel %vm2385_vm1, %v2377_v53, %v2914_v21  ;;  %3483 = vpow2.f32 %v2410_v34  ;;  %v2915_v43 = vadd.f32 -1.0, %v3480_v61 }
 0x4ea   :  { %v2432_v50 = vpack.c.bf16 %v2425_v40, %v2424_v62  ;;  %3485 = vpow2.f32 %v2414_v20  ;;  %v2427_v37 = vsel %vm2387_vm2, %v2379_v44, %v2916_v25  ;;  %v2670_v62 = vld [vmem:[#allocation6 + $0x8] sm:$0xff] }
 0x4eb   :  { %3487 = vpow2.f32 %v2412_v39  ;;  %v2426_v29 = vsel %vm2386_vm3, %v5090_v2, %v2915_v43 }
 0x4ec   :  { %2517 = vmatmul.mubr.bf16.vlgmr.msra.gmra.mxu0 %v2432_v50  ;;  %v2433_v14 = vpack.c.bf16 %v2427_v37, %v2426_v29  ;;  %v2671_v37 = vld [vmem:[#allocation6 + $0x10] sm:$0xff] }
 0x4ed   :  { %2526 = vmatprep.mubr.bf16.mxu0 %v5340_v8 }
 0x4f2   :  { %v3482_v3 = vpop.eup %3481 }
 0x4f3   :  { %v2917_v26 = vadd.f32 -1.0, %v3482_v3 }
 0x4f4   :  { %2527 = vmatmul.mubr.bf16.gmra.mxu0 %v2433_v14 }
 0x4f5   :  { %2536 = vmatprep.mubr.bf16.mxu0 %v5340_v8  ;;  %v2428_v63 = vsel %vm2388_vm4, %v2380_v1, %v2917_v26 }
 0x4f6   :  { %v3484_v7 = vpop.eup %3483 }
 0x4f7   :  { %v2918_v18 = vadd.f32 -1.0, %v3484_v7  ;;  %v3486_v24 = vpop.eup %3485 }
 0x4f8   :  { %v3488_v13 = vpop.eup %3487  ;;  %v2920_v27 = vadd.f32 -1.0, %v3486_v24 }
 0x4f9   :  { %v2429_v56 = vsel %vm2389_vm5, %v2381_v6, %v2918_v18  ;;  %v2919_v5 = vadd.f32 -1.0, %v3488_v13  ;;  %v5344_v6 = vsub.s32 1, %v5343_v0  ;;  %v2672_v18 = vld [vmem:[#allocation6 + $0x18] sm:$0xff] }
 0x4fa   :  { %v2434_v23 = vpack.c.bf16 %v2429_v56, %v2428_v63  ;;  %v2431_v33 = vsel %vm2391_vm6, %v2383_v55, %v2920_v27  ;;  %v2673_v27 = vld [vmem:[#allocation6 + $0x20] sm:$0xff] }
 0x4fb   :  { %v2430_v17 = vsel %vm2390_vm7, %v2382_v42, %v2919_v5 }
 0x4fc   :  { %2537 = vmatmul.mubr.bf16.gmra.mxu0 %v2434_v23  ;;  %v2435_v54 = vpack.c.bf16 %v2431_v33, %v2430_v17 }
 0x4fd   :  { %2546 = vmatprep.mubr.bf16.mxu0 %v5340_v8 }
 0x504   :  { %2547 = vmatmul.mubr.bf16.gmra.mxu0 %v2435_v54 }
 0x5ac   :  { %v2518_v12 = vpop.f32.mrf.mxu0 }
 0x5ae   :  { %v2520_v28 = vpop.f32.mrf.mxu0 }
 0x5af   :  { %2595 = vperm.xlu1 %3216, %v2520_v28  }
 0x5b0   :  { %v2522_v10 = vpop.f32.mrf.mxu0 }
 0x5b1   :  { %v2557_v35 = vpack.c.bf16 %v2522_v10, %v2518_v12 }
 0x5b2   :  { %v2524_v2 = vpop.f32.mrf.mxu0 }
 0x5b3   :  { %2600 = vperm.xlu0 %3212, %v2524_v2  }
 0x5b4   :  { %v2528_v44 = vpop.f32.mrf.mxu0 }
 0x5b6   :  { %v2530_v30 = vpop.f32.mrf.mxu0 }
 0x5b7   :  { %2605 = vperm.xlu1 %3216, %v2530_v30  }
 0x5b8   :  { %v2532_v45 = vpop.f32.mrf.mxu0 }
 0x5b9   :  { %v2558_v32 = vpack.c.bf16 %v2532_v45, %v2528_v44 }
 0x5ba   :  { %v2534_v53 = vpop.f32.mrf.mxu0 }
 0x5bb   :  { %2610 = vperm.xlu1 %3216, %v2534_v53  }
 0x5bc   :  { %v2538_v8 = vpop.f32.mrf.mxu0 }
 0x5be   :  { %v2540_v58 = vpop.f32.mrf.mxu0 }
 0x5bf   :  { %2615 = vperm.xlu1 %3216, %v2540_v58  }
 0x5c0   :  { %v2542_v51 = vpop.f32.mrf.mxu0 }
 0x5c1   :  { %v2559_v46 = vpack.c.bf16 %v2542_v51, %v2538_v8 }
 0x5c2   :  { %v2544_v49 = vpop.f32.mrf.mxu0 }
 0x5c3   :  { %2620 = vperm.xlu1 %3216, %v2544_v49  }
 0x5c4   :  { %v2548_v57 = vpop.f32.mrf.mxu0 }
 0x5c6   :  { %v2550_v22 = vpop.f32.mrf.mxu0 }
 0x5c7   :  { %2625 = vperm.xlu1 %3216, %v2550_v22  }
 0x5c8   :  { %v2552_v47 = vpop.f32.mrf.mxu0 }
 0x5c9   :  { %v2560_v11 = vpack.c.bf16 %v2552_v47, %v2548_v57  ;;  %v2676_v57 = vld [vmem:[#allocation6 + $0x38] sm:$0xff] }
 0x5ca   :  { %v2554_v36 = vpop.f32.mrf.mxu0 }
 0x5cb   :  { %3126 = vmatprep.subr.bf16.mxu1 %v2560_v11  ;;  %2630 = vperm.xlu1 %3216, %v2554_v36  }
 0x5cc   :  { %3127 = vmatpush3.bf16.msra.mxu1 %v2560_v11 }
 0x5cd   :  { %3128 = vmatprep.subr.bf16.mxu1 %v2559_v46 }
 0x5d0   :  { %3129 = vmatpush3.bf16.msra.mxu1 %v2559_v46 }
 0x5d1   :  { %3130 = vmatprep.subr.bf16.mxu1 %v2558_v32 }
 0x5d4   :  { %3131 = vmatpush3.bf16.msra.mxu1 %v2558_v32 }
 0x5d5   :  { %3132 = vmatprep.subr.bf16.mxu1 %v2557_v35 }
 0x5d8   :  { %3133 = vmatpush3.bf16.msra.mxu1 %v2557_v35 }
 0x5f4   :  { %2561 = vxpose.xlu1.b32.start [1/8] (short) (narrow) %v2520_v28, 8  ;;  %v2674_v28 = vld [vmem:[#allocation6 + $0x28] sm:$0xff] }
 0x5f8   :  { %2562 = vxpose.xlu1.b32.cont [2/8] (short) (narrow) %v2524_v2, 8 }
 0x5fc   :  { %2563 = vxpose.xlu1.b32.cont [3/8] (short) (narrow) %v2530_v30, 8 }
 0x600   :  { %2564 = vxpose.xlu1.b32.cont [4/8] (short) (narrow) %v2534_v53, 8  ;;  %v2675_v53 = vld [vmem:[#allocation6 + $0x30] sm:$0xff] }
 0x604   :  { %2565 = vxpose.xlu1.b32.cont [5/8] (short) (narrow) %v2540_v58, 8 }
 0x608   :  { %2566 = vxpose.xlu1.b32.cont [6/8] (short) (narrow) %v2544_v49, 8 }
 0x60c   :  { %2567 = vxpose.xlu1.b32.cont [7/8] (short) (narrow) %v2550_v22, 8 }
 0x610   :  { %2568 = vxpose.xlu1.b32.end [8/8] (short) (narrow) %v2554_v36, 8 }
 0x62a   :  { %v2596_v4 = vpop.permute.xlu1 %2595 }
 0x62e   :  { %v2601_v48 = vpop.permute.xlu0 %2600 }
 0x632   :  { %v2606_v9 = vpop.permute.xlu1 %2605 }
 0x636   :  { %v2611_v1 = vpop.permute.xlu1 %2610 }
 0x63a   :  { %v2616_v41 = vpop.permute.xlu1 %2615 }
 0x63e   :  { %v2621_v19 = vpop.permute.xlu1 %2620 }
 0x642   :  { %v2626_v42 = vpop.permute.xlu1 %2625 }
 0x646   :  { %v2631_v55 = vpop.permute.xlu1 %2630 }
 0x670   :  { %v2577_v16 = vpop.trf.xlu1 }
 0x671   :  { %v2636_v38 = vrot.slane %v2577_v16, %v5344_v6 }
 0x673   :  { %v2637_v15 = vadd.f32 %v2636_v38, %v2596_v4  ;;  %v2638_v59 = vadd.f32 %v2636_v38, %v2601_v48  ;;  %v2639_v31 = vadd.f32 %v2636_v38, %v2606_v9  ;;  %v2640_v39 = vadd.f32 %v2636_v38, %v2611_v1 }
 0x674   :  { %v2641_v14 = vadd.f32 %v2636_v38, %v2616_v41  ;;  %v2642_v63 = vadd.f32 %v2636_v38, %v2621_v19  ;;  %v2643_v33 = vadd.f32 %v2636_v38, %v2626_v42  ;;  %v2644_v2 = vadd.f32 %v2636_v38, %v2631_v55 }
 0x675   :  { %vm2645_vm8 = vcmp.ge.f32.partialorder %v2637_v15, 0.0  ;;  %v2653_v21 = vmul.f32 0.2, %v2637_v15  ;;  %vm2646_vm9 = vcmp.ge.f32.partialorder %v2638_v59, 0.0  ;;  %v2654_v34 = vmul.f32 0.2, %v2638_v59 }
 0x676   :  { %v2655_v40 = vmul.f32 0.2, %v2639_v31  ;;  %vm2647_vm10 = vcmp.ge.f32.partialorder %v2639_v31, 0.0  ;;  %v2656_v29 = vmul.f32 0.2, %v2640_v39  ;;  %vm2648_vm11 = vcmp.ge.f32.partialorder %v2640_v39, 0.0 }
 0x677   :  { %v2661_v20 = vsel %vm2645_vm8, %v2637_v15, %v2653_v21  ;;  %v2662_v52 = vsel %vm2646_vm9, %v2638_v59, %v2654_v34  ;;  %v2657_v24 = vmul.f32 0.2, %v2641_v14  ;;  %vm2649_vm12 = vcmp.ge.f32.partialorder %v2641_v14, 0.0 }
 0x678   :  { %v2677_v61 = vadd.f32 %v2669_v60, %v2661_v20  ;;  %v2678_v25 = vadd.f32 %v2670_v62, %v2662_v52  ;;  %v2663_v43 = vsel %vm2647_vm10, %v2639_v31, %v2655_v40  ;;  %v2664_v7 = vsel %vm2648_vm11, %v2640_v39, %v2656_v29 }
 0x679   :  { %v2679_v26 = vadd.f32 %v2671_v37, %v2663_v43  ;;  %v2680_v13 = vadd.f32 %v2672_v18, %v2664_v7  ;;  %v2665_v23 = vsel %vm2649_vm12, %v2641_v14, %v2657_v24  ;;  %v2658_v5 = vmul.f32 0.2, %v2642_v63 }
 0x67a   :  { %v2685_v50 = vsel %vm79_vm0, %v2677_v61, -inf  ;;  %v2688_v3 = vsel %vm79_vm0, %v2678_v25, -inf  ;;  %vm2650_vm13 = vcmp.ge.f32.partialorder %v2642_v63, 0.0  ;;  %v2681_v54 = vadd.f32 %v2673_v27, %v2665_v23 }
 0x67b   :  { %2686 = vmax.xlane.f32.xlu0 %v2685_v50  ;;  %v2691_v56 = vsel %vm79_vm0, %v2679_v26, -inf  ;;  %v2694_v17 = vsel %vm79_vm0, %v2680_v13, -inf  ;;  %v2666_v12 = vsel %vm2650_vm13, %v2642_v63, %v2658_v5  ;;  %v2659_v10 = vmul.f32 0.2, %v2643_v33 }
 0x67c   :  { %vm2651_vm14 = vcmp.ge.f32.partialorder %v2643_v33, 0.0  ;;  %v2697_v44 = vsel %vm79_vm0, %v2681_v54, -inf  ;;  %v2682_v30 = vadd.f32 %v2674_v28, %v2666_v12  ;;  %v2660_v8 = vmul.f32 0.2, %v2644_v2 }
 0x67d   :  { %v2667_v45 = vsel %vm2651_vm14, %v2643_v33, %v2659_v10  ;;  %vm2652_vm15 = vcmp.ge.f32.partialorder %v2644_v2, 0.0 }
 0x67e   :  { %v2700_v58 = vsel %vm79_vm0, %v2682_v30, -inf  ;;  %v2683_v51 = vadd.f32 %v2675_v53, %v2667_v45  ;;  %v2668_v49 = vsel %vm2652_vm15, %v2644_v2, %v2660_v8 }
 0x67f   :  { %2689 = vmax.xlane.f32.xlu0 %v2688_v3  ;;  %v2684_v47 = vadd.f32 %v2676_v57, %v2668_v49 }
 0x680   :  { %v2703_v22 = vsel %vm79_vm0, %v2683_v51, -inf }
 0x681   :  { %v2706_v11 = vsel %vm79_vm0, %v2684_v47, -inf }
 0x683   :  { %2692 = vmax.xlane.f32.xlu0 %v2691_v56 }
 0x687   :  { %2695 = vmax.xlane.f32.xlu0 %v2694_v17 }
 0x68b   :  { %2698 = vmax.xlane.f32.xlu0 %v2697_v44 }
 0x68f   :  { %2701 = vmax.xlane.f32.xlu0 %v2700_v58 }
 0x693   :  { %2704 = vmax.xlane.f32.xlu0 %v2703_v22 }
 0x697   :  { %2707 = vmax.xlane.f32.xlu0 %v2706_v11 }
 0x704   :  { %v2687_v36 = vpop.xlane.xlu0 %2686 }
 0x705   :  { %v2709_v46 = vsub.f32 %v2677_v61, %v2687_v36 }
 0x707   :  { %v2717_v32 = vmul.f32 1.442695, %v2709_v46 }
 0x708   :  { %v2690_v35 = vpop.xlane.xlu0 %2689 }
 0x709   :  { %3489 = vpow2.f32 %v2717_v32  ;;  %v2710_v4 = vsub.f32 %v2678_v25, %v2690_v35 }
 0x70b   :  { %v2719_v9 = vmul.f32 1.442695, %v2710_v4  ;;  %v2921_v4 = vld [vmem:[%s5157_s5] ss:$0 sm:$0xff] }
 0x70c   :  { %v2693_v1 = vpop.xlane.xlu0 %2692 }
 0x70d   :  { %3491 = vpow2.f32 %v2719_v9  ;;  %v2711_v41 = vsub.f32 %v2679_v26, %v2693_v1 }
 0x70f   :  { %v2721_v19 = vmul.f32 1.442695, %v2711_v41 }
 0x710   :  { %v2696_v42 = vpop.xlane.xlu0 %2695 }
 0x711   :  { %3493 = vpow2.f32 %v2721_v19  ;;  %v2712_v55 = vsub.f32 %v2680_v13, %v2696_v42 }
 0x713   :  { %v2723_v16 = vmul.f32 1.442695, %v2712_v55 }
 0x714   :  { %v2699_v0 = vpop.xlane.xlu0 %2698 }
 0x715   :  { %3495 = vpow2.f32 %v2723_v16  ;;  %v2713_v6 = vsub.f32 %v2681_v54, %v2699_v0 }
 0x716   :  { %v3490_v38 = vpop.eup %3489 }
 0x717   :  { %v2725_v48 = vmul.f32 1.442695, %v2713_v6  ;;  %v2733_v15 = vsel %vm79_vm0, %v3490_v38, 0.0 }
 0x718   :  { %2734 = vadd.xlane.f32.xlu0 %v2733_v15  ;;  %v2702_v59 = vpop.xlane.xlu0 %2701 }
 0x719   :  { %3497 = vpow2.f32 %v2725_v48  ;;  %v2714_v31 = vsub.f32 %v2682_v30, %v2702_v59 }
 0x71a   :  { %v3492_v60 = vpop.eup %3491 }
 0x71b   :  { %v2727_v21 = vmul.f32 1.442695, %v2714_v31  ;;  %v2736_v34 = vsel %vm79_vm0, %v3492_v60, 0.0 }
 0x71c   :  { %2737 = vadd.xlane.f32.xlu1 %v2736_v34  ;;  %v2705_v20 = vpop.xlane.xlu0 %2704 }
 0x71d   :  { %3499 = vpow2.f32 %v2727_v21  ;;  %v2715_v52 = vsub.f32 %v2683_v51, %v2705_v20 }
 0x71e   :  { %v3494_v62 = vpop.eup %3493 }
 0x71f   :  { %v2729_v40 = vmul.f32 1.442695, %v2715_v52  ;;  %v2739_v39 = vsel %vm79_vm0, %v3494_v62, 0.0 }
 0x720   :  { %2740 = vadd.xlane.f32.xlu0 %v2739_v39  ;;  %v2708_v61 = vpop.xlane.xlu0 %2707 }
 0x721   :  { %3501 = vpow2.f32 %v2729_v40  ;;  %v2716_v50 = vsub.f32 %v2684_v47, %v2708_v61 }
 0x722   :  { %v3496_v25 = vpop.eup %3495 }
 0x723   :  { %v2731_v43 = vmul.f32 1.442695, %v2716_v50  ;;  %v2742_v37 = vsel %vm79_vm0, %v3496_v25, 0.0 }
 0x724   :  { %2743 = vadd.xlane.f32.xlu0 %v2742_v37 }
 0x725   :  { %3503 = vpow2.f32 %v2731_v43 }
 0x726   :  { %v3498_v29 = vpop.eup %3497 }
 0x727   :  { %v2745_v14 = vsel %vm79_vm0, %v3498_v29, 0.0 }
 0x728   :  { %2746 = vadd.xlane.f32.xlu0 %v2745_v14 }
 0x72a   :  { %v3500_v3 = vpop.eup %3499 }
 0x72b   :  { %v2748_v26 = vsel %vm79_vm0, %v3500_v3, 0.0 }
 0x72c   :  { %2749 = vadd.xlane.f32.xlu0 %v2748_v26 }
 0x72e   :  { %v3502_v7 = vpop.eup %3501 }
 0x72f   :  { %v2751_v18 = vsel %vm79_vm0, %v3502_v7, 0.0 }
 0x730   :  { %2752 = vadd.xlane.f32.xlu0 %v2751_v18 }
 0x732   :  { %v3504_v24 = vpop.eup %3503 }
 0x733   :  { %v2754_v63 = vsel %vm79_vm0, %v3504_v24, 0.0 }
 0x734   :  { %2755 = vadd.xlane.f32.xlu0 %v2754_v63 }
 0x7a1   :  { %v2735_v56 = vpop.xlane.xlu0 %2734 }
 0x7a2   :  { %3505 = vrcp.f32 %v2735_v56 }
 0x7a5   :  { %v2738_v13 = vpop.xlane.xlu1 %2737 }
 0x7a6   :  { %3507 = vrcp.f32 %v2738_v13 }
 0x7a9   :  { %v2741_v23 = vpop.xlane.xlu0 %2740 }
 0x7aa   :  { %3509 = vrcp.f32 %v2741_v23 }
 0x7ad   :  { %v2744_v27 = vpop.xlane.xlu0 %2743 }
 0x7ae   :  { %3511 = vrcp.f32 %v2744_v27 }
 0x7af   :  { %v3506_v5 = vpop.eup %3505 }
 0x7b0   :  { %v2765_v54 = vmul.f32 %v3506_v5, %v3490_v38 }
 0x7b1   :  { %v2747_v33 = vpop.xlane.xlu0 %2746 }
 0x7b2   :  { %3513 = vrcp.f32 %v2747_v33 }
 0x7b3   :  { %v3508_v17 = vpop.eup %3507 }
 0x7b4   :  { %v2766_v12 = vmul.f32 %v3508_v17, %v3492_v60 }
 0x7b5   :  { %v2750_v28 = vpop.xlane.xlu0 %2749 }
 0x7b6   :  { %3515 = vrcp.f32 %v2750_v28  ;;  %v2773_v10 = vpack.c.bf16 %v2766_v12, %v2765_v54 }
 0x7b7   :  { %v3510_v2 = vpop.eup %3509 }
 0x7b8   :  { %3134 = vmatprep.mubr.msk.bf16.mxu1 %vm79_vm0, %v2773_v10  ;;  %v2767_v45 = vmul.f32 %v3510_v2, %v3494_v62 }
 0x7b9   :  { %v2753_v44 = vpop.xlane.xlu0 %2752 }
 0x7ba   :  { %3517 = vrcp.f32 %v2753_v44 }
 0x7bb   :  { %v3512_v30 = vpop.eup %3511 }
 0x7bc   :  { %v2768_v53 = vmul.f32 %v3512_v30, %v3496_v25 }
 0x7bd   :  { %v2756_v8 = vpop.xlane.xlu0 %2755 }
 0x7be   :  { %v2774_v58 = vpack.c.bf16 %v2768_v53, %v2767_v45  ;;  %3519 = vrcp.f32 %v2756_v8 }
 0x7bf   :  { %v3514_v51 = vpop.eup %3513 }
 0x7c0   :  { %3135 = vmatmul.mubr.msk.bf16.vlgmr.msra.gmra.mxu1 %vm79_vm0, %v2774_v58  ;;  %v2769_v57 = vmul.f32 %v3514_v51, %v3498_v29 }
 0x7c3   :  { %v3516_v49 = vpop.eup %3515 }
 0x7c4   :  { %v2770_v22 = vmul.f32 %v3516_v49, %v3500_v3 }
 0x7c6   :  { %v2775_v47 = vpack.c.bf16 %v2770_v22, %v2769_v57 }
 0x7c7   :  { %v3518_v11 = vpop.eup %3517 }
 0x7c8   :  { %3138 = vmatprep.mubr.msk.bf16.mxu1 %vm79_vm0, %v2775_v47  ;;  %v2771_v46 = vmul.f32 %v3518_v11, %v3502_v7 }
 0x7cb   :  { %v3520_v36 = vpop.eup %3519 }
 0x7cc   :  { %v2772_v32 = vmul.f32 %v3520_v36, %v3504_v24 }
 0x7ce   :  { %v2776_v35 = vpack.c.bf16 %v2772_v32, %v2771_v46 }
 0x7d0   :  { %3139 = vmatmul.mubr.msk.bf16.gmra.mxu1 %vm79_vm0, %v2776_v35 }
 0x880   :  { %v3136_v9 = vpop.f32.mrf.mxu1 }
 0x881   :  { %v2839_v1 = vadd.f32 %v3136_v9, %v2921_v4 }
 0x882   :  { %v2830_v41 = vpop.f32.mrf.mxu1 }
 0x883   :  { %2863 = vst [vmem:[%s5158_s6 + $0x10] sm:$0xff] %v2839_v1  ;;  %v2831_v19 = vadd.f32 %v2921_v4, %v2830_v41 }
 0x884   :  { %v3137_v42 = vpop.f32.mrf.mxu1 }
 0x885   :  { %2861 = vst [vmem:[%s5158_s6] sm:$0xff] %v2831_v19  ;;  %v2842_v55 = vadd.f32 %v3137_v42, %v2921_v4 }
 0x886   :  { %v2833_v16 = vpop.f32.mrf.mxu1 }
 0x887   :  { %2864 = vst [vmem:[%s5158_s6 + $0x18] sm:$0xff] %v2842_v55  ;;  %v2834_v0 = vadd.f32 %v2921_v4, %v2833_v16 }
 0x889   :  { %2862 = vst [vmem:[%s5158_s6 + $0x8] sm:$0xff] %v2834_v0 }
 0x890   :  { %v3140_v6 = vpop.f32.mrf.mxu1 }
 0x891   :  { %v2855_v38 = vadd.f32 %v3140_v6, %v2921_v4 }
 0x892   :  { %v2846_v48 = vpop.f32.mrf.mxu1 }
 0x893   :  { %2867 = vst [vmem:[%s5158_s6 + $0x30] sm:$0xff] %v2855_v38  ;;  %v2847_v15 = vadd.f32 %v2921_v4, %v2846_v48 }
 0x894   :  { %v3141_v59 = vpop.f32.mrf.mxu1 }
 0x895   :  { %2865 = vst [vmem:[%s5158_s6 + $0x20] sm:$0xff] %v2847_v15  ;;  %v2858_v31 = vadd.f32 %v3141_v59, %v2921_v4 }
 0x896   :  { %v2849_v60 = vpop.f32.mrf.mxu1 }
 0x897   :  { %2868 = vst [vmem:[%s5158_s6 + $0x38] sm:$0xff] %v2858_v31  ;;  %v2850_v21 = vadd.f32 %v2921_v4, %v2849_v60 }
 0x899   :  { %2866 = vst [vmem:[%s5158_s6 + $0x28] sm:$0xff] %v2850_v21 }
 0x89a   :  { %2873 = vsyncpa [#allocation5], 1 }
 0x89b   :  { %2874 = vsyncpa [#allocation7], 1 }
 0x89c   :  { %2875 = vsyncpa [#allocation10], 1 }

</bundles_post_ra>
